<compile_context>
chip_gen: v6e
topology: v6e:2x2x1
jax: 0.10.0
libtpu: 0.0.40
codegen_flags: <defaults>
</compile_context>

<pallas_src>
import functools

import jax
import jax.numpy as jnp
import numpy as np
from jax import lax
from jax.experimental import pallas as pl
from jax.experimental.pallas import tpu as pltpu

LANES = 128
_INV_SQRT2 = 0.7071067811865476
_BN_EPS = 1e-5


def _round_up(v, m):
    return ((v + m - 1) // m) * m


def _erf(x):
    # Abramowitz & Stegun 7.1.26 rational approximation (max abs err ~1.5e-7).
    a1, a2, a3, a4, a5 = 0.254829592, -0.284496736, 1.421413741, -1.453152027, 1.061405429
    p = 0.3275911
    sgn = jnp.where(x >= 0.0, 1.0, -1.0)
    ax = jnp.abs(x)
    t = 1.0 / (1.0 + p * ax)        # exact divide (feeds t^5; approx recip removed)
    poly = ((((a5 * t + a4) * t + a3) * t + a2) * t + a1) * t
    return sgn * (1.0 - poly * jnp.exp(-ax * ax))


def _gelu_exact(x):
    # torch.nn.GELU() default (approximate='none'): 0.5*x*(1+erf(x/sqrt(2)))
    return 0.5 * x * (1.0 + _erf(x * _INV_SQRT2))


def _convnet_kernel(*refs, cfg, n_batch, in_pitch, scratch_pitch, lin_taps, out_rows):
    """Fused whole-network forward (single TensorCore, grid-free).

    refs = (x, biases, w_hbm_0..w_hbm_{nl-1}, lin_w_hbm, out,
            bufA, bufB, w_vmem_0..w_vmem_nl, w_sem)
    cfg  = per-layer static tuple (k, r_in, r_out, use_bn)
    """
    nl = len(cfg)
    x_ref = refs[0]
    b_ref = refs[1]
    w_hbm = refs[2:3 + nl]                 # nl conv weights + the linear weight (HBM)
    out_ref = refs[3 + nl]
    bufs = refs[4 + nl:6 + nl]
    w_vmem = refs[6 + nl:7 + 2 * nl]
    w_sem = refs[7 + 2 * nl]

    # Kick off every weight HBM->VMEM DMA now; layer l only waits for its own
    # weight, so the DMA for layers l+1.. overlaps with layer l's compute.
    copies = []
    for l in range(nl + 1):
        cp = pltpu.make_async_copy(w_hbm[l], w_vmem[l], w_sem.at[l])
        cp.start()
        copies.append(cp)

    src_ref, src_pitch = x_ref, in_pitch
    for li, (k, _r_in, r_out, use_bn) in enumerate(cfg):
        copies[li].wait()
        w_ref = w_vmem[li]
        dst_ref = bufs[li % 2]
        bias = b_ref[li:li + 1, :]                                   # (1, 128) f32

        def tap_sum(n, k=k, r_out=r_out, w_ref=w_ref, bias=bias,
                    src_ref=src_ref, src_pitch=src_pitch):
            # Conv1d(stride=2) over compacted rows: out[j] = sum_t x[2j+t] @ W[t].
            base = n * src_pitch
            acc = jnp.dot(
                src_ref[pl.ds(base, r_out, stride=2), :].astype(jnp.bfloat16),
                w_ref[0], preferred_element_type=jnp.float32)
            for t in range(1, k):
                xs = src_ref[pl.ds(base + t, r_out, stride=2), :].astype(jnp.bfloat16)
                acc = acc + jnp.dot(xs, w_ref[t], preferred_element_type=jnp.float32)
            return acc + bias                                         # (r_out, 128) f32

        if not use_bn:
            # Fused per-sample tap-sum -> GELU -> store (no batched accumulators).
            for n in range(n_batch):
                d = n * scratch_pitch
                dst_ref[d:d + r_out, :] = _gelu_exact(tap_sum(n))     # lane-dense
        else:
            # BatchNorm1d training-mode (gamma=1, beta=0, biased var, eps=1e-5);
            # statistics over all N*r_out real rows, (1,128) partial reductions.
            inv_cnt = 1.0 / float(n_batch * r_out)
            accs = []
            s = jnp.zeros((1, LANES), jnp.float32)
            for n in range(n_batch):
                a = tap_sum(n)
                accs.append(a)
                s = s + jnp.sum(a, axis=0, keepdims=True)
            mean = s * inv_cnt
            accs = [a - mean for a in accs]
            sq = jnp.zeros((1, LANES), jnp.float32)
            for a in accs:
                sq = sq + jnp.sum(a * a, axis=0, keepdims=True)
            scale = lax.rsqrt(sq * inv_cnt + _BN_EPS)
            for n in range(n_batch):
                d = n * scratch_pitch
                dst_ref[d:d + r_out, :] = _gelu_exact(accs[n] * scale)

        src_ref, src_pitch = dst_ref, scratch_pitch

    # Flatten (torch C-major order folded into the pre-permuted linear weight)
    # + LazyLinear, as lin_taps row-matmuls per sample; direct row stores.
    copies[nl].wait()
    lw_ref = w_vmem[nl]
    lin_bias = b_ref[nl:nl + 1, :]
    out_ref[...] = jnp.zeros((out_rows, LANES), jnp.float32)          # pad rows
    for n in range(n_batch):
        base = n * src_pitch
        acc = jnp.dot(src_ref[base:base + 1, :].astype(jnp.bfloat16),
                      lw_ref[0], preferred_element_type=jnp.float32)
        for l in range(1, lin_taps):
            xr = src_ref[base + l:base + l + 1, :].astype(jnp.bfloat16)
            acc = acc + jnp.dot(xr, lw_ref[l], preferred_element_type=jnp.float32)
        out_ref[n:n + 1, :] = acc + lin_bias


# ----------------------------------------------------------------------------- host


def _layer_defs(depth, batch, kw):
    defs = [(2, 16, kw, False), (16, 24, kw - 2, False)]
    inc = 24
    for _ in range(depth):
        defs.append((inc, inc + 8, kw - 2, bool(batch)))
        inc += 8
    return defs, inc


def _conv_cfg(defs, length):
    # Static geometry for the compacted (real-rows-only) scheme.
    cfg, r = [], length
    for (_ci, _co, k, use_bn) in defs:
        r_out = (r - k) // 2 + 1
        cfg.append((k, r, r_out, use_bn))
        r = r_out
    return tuple(cfg), r


def pack_conv_weight(w):
    # (C_out, C_in, k) -> (k, 128, 128) bf16, zero-padded, channels-last matmul layout.
    c_out, c_in, k = w.shape
    wk = jnp.zeros((k, LANES, LANES), jnp.float32)
    wk = wk.at[:, :c_in, :c_out].set(jnp.transpose(w, (2, 1, 0)).astype(jnp.float32))
    return wk.astype(jnp.bfloat16)


def pack_biases(conv_biases, lin_b):
    rows = _round_up(len(conv_biases) + 1, 8)
    b = jnp.zeros((rows, LANES), jnp.float32)
    for i, bi in enumerate(conv_biases):
        b = b.at[i, :bi.shape[0]].set(bi.astype(jnp.float32))
    b = b.at[len(conv_biases), :lin_b.shape[0]].set(lin_b.astype(jnp.float32))
    return b


def pack_linear_weight(lin_w, c_last, l_last, outsize):
    # torch Flatten on (N, C, L): flat index = c * L_last + l  (C-major).
    w3 = lin_w.reshape(c_last, l_last, outsize).transpose(1, 0, 2)    # (L_last, C, O)
    wk = jnp.zeros((l_last, LANES, LANES), jnp.float32)
    wk = wk.at[:, :c_last, :outsize].set(w3.astype(jnp.float32))
    return wk.astype(jnp.bfloat16)


def convnet_forward(x, conv_w_packed, b_packed, lin_w_packed, *,
                    cfg, outsize, scratch_pitch, out_rows):
    N, C, L = x.shape
    # One-time layout glue (tiny): NCL -> channels-last, pad channels to 128 lanes,
    # stack samples along rows (per-sample pitch = L).
    x_cl = jnp.transpose(x, (0, 2, 1))
    x_cl = jnp.pad(x_cl, ((0, 0), (0, 0), (0, LANES - C)))
    x_packed = x_cl.reshape(N * L, LANES).astype(jnp.float32)

    nl = len(cfg)
    lin_taps = lin_w_packed.shape[0]

    kernel = functools.partial(
        _convnet_kernel, cfg=cfg, n_batch=N, in_pitch=L,
        scratch_pitch=scratch_pitch, lin_taps=lin_taps, out_rows=out_rows)

    vmem = pl.BlockSpec(memory_space=pltpu.MemorySpace.VMEM)
    hbm = pl.BlockSpec(memory_space=pl.ANY)

    # TODO(synk): on v7x the second TensorCore stays idle; for larger batches add a
    # grid over batch with dimension_semantics=("parallel",) plus a cross-core BN
    # statistics exchange (not worth the barrier at N=2, latency-bound).
    out = pl.pallas_call(
        kernel,
        out_shape=jax.ShapeDtypeStruct((out_rows, LANES), jnp.float32),
        in_specs=[vmem, vmem] + [hbm] * (nl + 1),
        out_specs=vmem,
        scratch_shapes=(
            [pltpu.VMEM((N * scratch_pitch, LANES), jnp.float32),
             pltpu.VMEM((N * scratch_pitch, LANES), jnp.float32)]
            + [pltpu.VMEM(w.shape, jnp.bfloat16) for w in conv_w_packed]
            + [pltpu.VMEM(lin_w_packed.shape, jnp.bfloat16),
               pltpu.SemaphoreType.DMA((nl + 1,))]
        ),
    )(x_packed, b_packed, *conv_w_packed, lin_w_packed)
    return out[:N, :outsize]


def _ref_forward(x, conv_params, lin_w, lin_b, defs):
    # Pure-JAX reference of the torch forward (training-mode BN, exact-erf GELU).
    h = x
    for (w, b), (_ci, _co, _k, use_bn) in zip(conv_params, defs):
        h = lax.conv_general_dilated(
            h, w, window_strides=(2,), padding="VALID",
            dimension_numbers=("NCH", "OIH", "NCH")) + b[None, :, None]
        if use_bn:
            mean = jnp.mean(h, axis=(0, 2), keepdims=True)
            var = jnp.mean((h - mean) ** 2, axis=(0, 2), keepdims=True)
            h = (h - mean) * lax.rsqrt(var + _BN_EPS)
        h = 0.5 * h * (1.0 + lax.erf(h * _INV_SQRT2))
    flat = h.reshape(h.shape[0], -1)
    return flat @ lin_w + lin_b


if __name__ == "__main__":
    DEPTH, BATCH, OUTSIZE, KW = 2, True, 8, 5
    N, C_IN, L = 2, 2, 128                       # Conv1d input: (N, 2, L)

    defs, final_c = _layer_defs(DEPTH, BATCH, KW)
    cfg, l_last = _conv_cfg(defs, L)             # l_last == LazyLinear's L dimension
    flat_dim = final_c * l_last                  # LazyLinear in_features (static)

    key = jax.random.PRNGKey(0)
    conv_params = []
    for (ci, co, k, _) in defs:
        key, k1, k2 = jax.random.split(key, 3)
        w = jax.random.normal(k1, (co, ci, k), jnp.float32) * (1.0 / (ci * k) ** 0.5)
        b = jax.random.normal(k2, (co,), jnp.float32) * 0.01
        conv_params.append((w, b))
    key, k1, k2, kx = jax.random.split(key, 4)
    lin_w = jax.random.normal(k1, (flat_dim, OUTSIZE), jnp.float32) * (1.0 / flat_dim ** 0.5)
    lin_b = jax.random.normal(k2, (OUTSIZE,), jnp.float32) * 0.01
    x = jax.random.normal(kx, (N, C_IN, L), jnp.float32)

    # One-time static packing of parameters (outside the jitted forward).
    w_packed = tuple(pack_conv_weight(w) for w, _ in conv_params)
    b_packed = pack_biases([b for _, b in conv_params], lin_b)
    lw_packed = pack_linear_weight(lin_w, final_c, l_last, OUTSIZE)

    scratch_pitch = _round_up(max(c[2] for c in cfg), 8)
    fwd = jax.jit(functools.partial(
        convnet_forward, cfg=cfg, outsize=OUTSIZE,
        scratch_pitch=scratch_pitch, out_rows=_round_up(N, 8)))

    # TODO(synk): BatchNorm1d running-stat (momentum) buffer updates are not modeled;
    # only training-mode batch normalization with gamma=1/beta=0 is applied, matching
    # a freshly initialized torch module.
    y = fwd(x, w_packed, b_packed, lw_packed)
    jax.block_until_ready(y)
    assert y.shape == (N, OUTSIZE) and y.dtype == jnp.float32

    y_ref = _ref_forward(x, conv_params, lin_w, lin_b, defs)
    np.testing.assert_allclose(np.asarray(y), np.asarray(y_ref), rtol=5e-2, atol=5e-2)
    print("KERNEL_OK")
</pallas_src>

<mosaic_0001>
module attributes {stable_mosaic.version = 11 : i64} {
  func.func @_convnet_kernel(%arg0: memref<256x128xf32, #tpu.memory_space<vmem>>, %arg1: memref<8x128xf32, #tpu.memory_space<vmem>>, %arg2: memref<5x128x128xbf16, #tpu.memory_space<any>>, %arg3: memref<3x128x128xbf16, #tpu.memory_space<any>>, %arg4: memref<3x128x128xbf16, #tpu.memory_space<any>>, %arg5: memref<3x128x128xbf16, #tpu.memory_space<any>>, %arg6: memref<6x128x128xbf16, #tpu.memory_space<any>>, %arg7: memref<8x128xf32, #tpu.memory_space<vmem>>, %arg8: memref<128x128xf32, #tpu.memory_space<vmem>>, %arg9: memref<128x128xf32, #tpu.memory_space<vmem>>, %arg10: memref<5x128x128xbf16, #tpu.memory_space<vmem>>, %arg11: memref<3x128x128xbf16, #tpu.memory_space<vmem>>, %arg12: memref<3x128x128xbf16, #tpu.memory_space<vmem>>, %arg13: memref<3x128x128xbf16, #tpu.memory_space<vmem>>, %arg14: memref<6x128x128xbf16, #tpu.memory_space<vmem>>, %arg15: memref<5x!tpu.dma_semaphore, #tpu.memory_space<semaphore_mem>>) attributes {dimension_semantics = [], scalar_prefetch = 0 : i64, scratch_operands = 8 : i64, tpu.core_type = #tpu.core_type<tc>} {
    %c0_i32 = arith.constant 0 : i32
    %0 = tpu.memref_slice %arg15[%c0_i32] : memref<5x!tpu.dma_semaphore, #tpu.memory_space<semaphore_mem>> -> memref<1x!tpu.dma_semaphore, #tpu.memory_space<semaphore_mem>>
    %1 = tpu.memref_squeeze %0 : memref<1x!tpu.dma_semaphore, #tpu.memory_space<semaphore_mem>> -> memref<!tpu.dma_semaphore, #tpu.memory_space<semaphore_mem>>
    tpu.enqueue_dma source(%arg2 : memref<5x128x128xbf16, #tpu.memory_space<any>>) target(%arg10 : memref<5x128x128xbf16, #tpu.memory_space<vmem>>) target_semaphore(%1 : memref<!tpu.dma_semaphore, #tpu.memory_space<semaphore_mem>>)
    %c1_i32 = arith.constant 1 : i32
    %2 = tpu.memref_slice %arg15[%c1_i32] : memref<5x!tpu.dma_semaphore, #tpu.memory_space<semaphore_mem>> -> memref<1x!tpu.dma_semaphore, #tpu.memory_space<semaphore_mem>>
    %3 = tpu.memref_squeeze %2 : memref<1x!tpu.dma_semaphore, #tpu.memory_space<semaphore_mem>> -> memref<!tpu.dma_semaphore, #tpu.memory_space<semaphore_mem>>
    tpu.enqueue_dma source(%arg3 : memref<3x128x128xbf16, #tpu.memory_space<any>>) target(%arg11 : memref<3x128x128xbf16, #tpu.memory_space<vmem>>) target_semaphore(%3 : memref<!tpu.dma_semaphore, #tpu.memory_space<semaphore_mem>>)
    %c2_i32 = arith.constant 2 : i32
    %4 = tpu.memref_slice %arg15[%c2_i32] : memref<5x!tpu.dma_semaphore, #tpu.memory_space<semaphore_mem>> -> memref<1x!tpu.dma_semaphore, #tpu.memory_space<semaphore_mem>>
    %5 = tpu.memref_squeeze %4 : memref<1x!tpu.dma_semaphore, #tpu.memory_space<semaphore_mem>> -> memref<!tpu.dma_semaphore, #tpu.memory_space<semaphore_mem>>
    tpu.enqueue_dma source(%arg4 : memref<3x128x128xbf16, #tpu.memory_space<any>>) target(%arg12 : memref<3x128x128xbf16, #tpu.memory_space<vmem>>) target_semaphore(%5 : memref<!tpu.dma_semaphore, #tpu.memory_space<semaphore_mem>>)
    %c3_i32 = arith.constant 3 : i32
    %6 = tpu.memref_slice %arg15[%c3_i32] : memref<5x!tpu.dma_semaphore, #tpu.memory_space<semaphore_mem>> -> memref<1x!tpu.dma_semaphore, #tpu.memory_space<semaphore_mem>>
    %7 = tpu.memref_squeeze %6 : memref<1x!tpu.dma_semaphore, #tpu.memory_space<semaphore_mem>> -> memref<!tpu.dma_semaphore, #tpu.memory_space<semaphore_mem>>
    tpu.enqueue_dma source(%arg5 : memref<3x128x128xbf16, #tpu.memory_space<any>>) target(%arg13 : memref<3x128x128xbf16, #tpu.memory_space<vmem>>) target_semaphore(%7 : memref<!tpu.dma_semaphore, #tpu.memory_space<semaphore_mem>>)
    %c4_i32 = arith.constant 4 : i32
    %8 = tpu.memref_slice %arg15[%c4_i32] : memref<5x!tpu.dma_semaphore, #tpu.memory_space<semaphore_mem>> -> memref<1x!tpu.dma_semaphore, #tpu.memory_space<semaphore_mem>>
    %9 = tpu.memref_squeeze %8 : memref<1x!tpu.dma_semaphore, #tpu.memory_space<semaphore_mem>> -> memref<!tpu.dma_semaphore, #tpu.memory_space<semaphore_mem>>
    tpu.enqueue_dma source(%arg6 : memref<6x128x128xbf16, #tpu.memory_space<any>>) target(%arg14 : memref<6x128x128xbf16, #tpu.memory_space<vmem>>) target_semaphore(%9 : memref<!tpu.dma_semaphore, #tpu.memory_space<semaphore_mem>>)
    %c0_i32_0 = arith.constant 0 : i32
    %10 = tpu.memref_slice %arg15[%c0_i32_0] : memref<5x!tpu.dma_semaphore, #tpu.memory_space<semaphore_mem>> -> memref<1x!tpu.dma_semaphore, #tpu.memory_space<semaphore_mem>>
    %11 = tpu.memref_squeeze %10 : memref<1x!tpu.dma_semaphore, #tpu.memory_space<semaphore_mem>> -> memref<!tpu.dma_semaphore, #tpu.memory_space<semaphore_mem>>
    tpu.wait_dma2 semaphore(%11 : memref<!tpu.dma_semaphore, #tpu.memory_space<semaphore_mem>>) src(%arg2 : memref<5x128x128xbf16, #tpu.memory_space<any>>) dst(%arg10 : memref<5x128x128xbf16, #tpu.memory_space<vmem>>)
    %c0 = arith.constant 0 : index
    %c0_1 = arith.constant 0 : index
    %12 = vector.load %arg1[%c0, %c0_1] : memref<8x128xf32, #tpu.memory_space<vmem>>, vector<1x128xf32>
    %c0_2 = arith.constant 0 : index
    %c0_3 = arith.constant 0 : index
    %13 = tpu.strided_load %arg0[%c0_2, %c0_3] {strides = array<i32: 2, 1>} : memref<256x128xf32, #tpu.memory_space<vmem>>, vector<62x128xf32>
    %14 = arith.truncf %13 : vector<62x128xf32> to vector<62x128xbf16>
    %c0_4 = arith.constant 0 : index
    %c0_5 = arith.constant 0 : index
    %c0_6 = arith.constant 0 : index
    %15 = vector.load %arg10[%c0_4, %c0_5, %c0_6] : memref<5x128x128xbf16, #tpu.memory_space<vmem>>, vector<1x128x128xbf16>
    %16 = vector.shape_cast %15 : vector<1x128x128xbf16> to vector<128x128xbf16>
    %cst = arith.constant dense<0.000000e+00> : vector<62x128xf32>
    %17 = tpu.matmul %14, %16, %cst {dimension_numbers = #tpu.dot_dimension_numbers<[1], [0], [0], [1], [0, 0, 1, 1], [], []>} : vector<62x128xbf16>, vector<128x128xbf16>, vector<62x128xf32> -> vector<62x128xf32>
    %c1 = arith.constant 1 : index
    %c0_7 = arith.constant 0 : index
    %18 = tpu.strided_load %arg0[%c1, %c0_7] {strides = array<i32: 2, 1>} : memref<256x128xf32, #tpu.memory_space<vmem>>, vector<62x128xf32>
    %19 = arith.truncf %18 : vector<62x128xf32> to vector<62x128xbf16>
    %c1_8 = arith.constant 1 : index
    %c0_9 = arith.constant 0 : index
    %c0_10 = arith.constant 0 : index
    %20 = vector.load %arg10[%c1_8, %c0_9, %c0_10] : memref<5x128x128xbf16, #tpu.memory_space<vmem>>, vector<1x128x128xbf16>
    %21 = vector.shape_cast %20 : vector<1x128x128xbf16> to vector<128x128xbf16>
    %cst_11 = arith.constant dense<0.000000e+00> : vector<62x128xf32>
    %22 = tpu.matmul %19, %21, %cst_11 {dimension_numbers = #tpu.dot_dimension_numbers<[1], [0], [0], [1], [0, 0, 1, 1], [], []>} : vector<62x128xbf16>, vector<128x128xbf16>, vector<62x128xf32> -> vector<62x128xf32>
    %23 = arith.addf %17, %22 : vector<62x128xf32>
    %c2 = arith.constant 2 : index
    %c0_12 = arith.constant 0 : index
    %24 = tpu.strided_load %arg0[%c2, %c0_12] {strides = array<i32: 2, 1>} : memref<256x128xf32, #tpu.memory_space<vmem>>, vector<62x128xf32>
    %25 = arith.truncf %24 : vector<62x128xf32> to vector<62x128xbf16>
    %c2_13 = arith.constant 2 : index
    %c0_14 = arith.constant 0 : index
    %c0_15 = arith.constant 0 : index
    %26 = vector.load %arg10[%c2_13, %c0_14, %c0_15] : memref<5x128x128xbf16, #tpu.memory_space<vmem>>, vector<1x128x128xbf16>
    %27 = vector.shape_cast %26 : vector<1x128x128xbf16> to vector<128x128xbf16>
    %cst_16 = arith.constant dense<0.000000e+00> : vector<62x128xf32>
    %28 = tpu.matmul %25, %27, %cst_16 {dimension_numbers = #tpu.dot_dimension_numbers<[1], [0], [0], [1], [0, 0, 1, 1], [], []>} : vector<62x128xbf16>, vector<128x128xbf16>, vector<62x128xf32> -> vector<62x128xf32>
    %29 = arith.addf %23, %28 : vector<62x128xf32>
    %c3 = arith.constant 3 : index
    %c0_17 = arith.constant 0 : index
    %30 = tpu.strided_load %arg0[%c3, %c0_17] {strides = array<i32: 2, 1>} : memref<256x128xf32, #tpu.memory_space<vmem>>, vector<62x128xf32>
    %31 = arith.truncf %30 : vector<62x128xf32> to vector<62x128xbf16>
    %c3_18 = arith.constant 3 : index
    %c0_19 = arith.constant 0 : index
    %c0_20 = arith.constant 0 : index
    %32 = vector.load %arg10[%c3_18, %c0_19, %c0_20] : memref<5x128x128xbf16, #tpu.memory_space<vmem>>, vector<1x128x128xbf16>
    %33 = vector.shape_cast %32 : vector<1x128x128xbf16> to vector<128x128xbf16>
    %cst_21 = arith.constant dense<0.000000e+00> : vector<62x128xf32>
    %34 = tpu.matmul %31, %33, %cst_21 {dimension_numbers = #tpu.dot_dimension_numbers<[1], [0], [0], [1], [0, 0, 1, 1], [], []>} : vector<62x128xbf16>, vector<128x128xbf16>, vector<62x128xf32> -> vector<62x128xf32>
    %35 = arith.addf %29, %34 : vector<62x128xf32>
    %c4 = arith.constant 4 : index
    %c0_22 = arith.constant 0 : index
    %36 = tpu.strided_load %arg0[%c4, %c0_22] {strides = array<i32: 2, 1>} : memref<256x128xf32, #tpu.memory_space<vmem>>, vector<62x128xf32>
    %37 = arith.truncf %36 : vector<62x128xf32> to vector<62x128xbf16>
    %c4_23 = arith.constant 4 : index
    %c0_24 = arith.constant 0 : index
    %c0_25 = arith.constant 0 : index
    %38 = vector.load %arg10[%c4_23, %c0_24, %c0_25] : memref<5x128x128xbf16, #tpu.memory_space<vmem>>, vector<1x128x128xbf16>
    %39 = vector.shape_cast %38 : vector<1x128x128xbf16> to vector<128x128xbf16>
    %cst_26 = arith.constant dense<0.000000e+00> : vector<62x128xf32>
    %40 = tpu.matmul %37, %39, %cst_26 {dimension_numbers = #tpu.dot_dimension_numbers<[1], [0], [0], [1], [0, 0, 1, 1], [], []>} : vector<62x128xbf16>, vector<128x128xbf16>, vector<62x128xf32> -> vector<62x128xf32>
    %41 = arith.addf %35, %40 : vector<62x128xf32>
    %42 = vector.broadcast %12 : vector<1x128xf32> to vector<62x128xf32>
    %43 = arith.addf %41, %42 : vector<62x128xf32>
    %cst_27 = arith.constant 5.000000e-01 : f32
    %44 = vector.broadcast %cst_27 : f32 to vector<62x128xf32>
    %45 = arith.mulf %44, %43 : vector<62x128xf32>
    %cst_28 = arith.constant 0.707106769 : f32
    %46 = vector.broadcast %cst_28 : f32 to vector<62x128xf32>
    %47 = arith.mulf %43, %46 : vector<62x128xf32>
    %cst_29 = arith.constant 0.000000e+00 : f32
    %48 = vector.broadcast %cst_29 : f32 to vector<62x128xf32>
    %49 = arith.cmpf oge, %47, %48 : vector<62x128xf32>
    %cst_30 = arith.constant 1.000000e+00 : f32
    %cst_31 = arith.constant -1.000000e+00 : f32
    %50 = vector.broadcast %cst_30 : f32 to vector<62x128xf32>
    %51 = vector.broadcast %cst_31 : f32 to vector<62x128xf32>
    %52 = arith.select %49, %50, %51 : vector<62x128xi1>, vector<62x128xf32>
    %53 = math.absf %47 : vector<62x128xf32>
    %cst_32 = arith.constant 0.327591091 : f32
    %54 = vector.broadcast %cst_32 : f32 to vector<62x128xf32>
    %55 = arith.mulf %54, %53 : vector<62x128xf32>
    %cst_33 = arith.constant 1.000000e+00 : f32
    %56 = vector.broadcast %cst_33 : f32 to vector<62x128xf32>
    %57 = arith.addf %56, %55 : vector<62x128xf32>
    %cst_34 = arith.constant 1.000000e+00 : f32
    %58 = vector.broadcast %cst_34 : f32 to vector<62x128xf32>
    %59 = arith.divf %58, %57 : vector<62x128xf32>
    %cst_35 = arith.constant 1.06140542 : f32
    %60 = vector.broadcast %cst_35 : f32 to vector<62x128xf32>
    %61 = arith.mulf %60, %59 : vector<62x128xf32>
    %cst_36 = arith.constant -1.45315206 : f32
    %62 = vector.broadcast %cst_36 : f32 to vector<62x128xf32>
    %63 = arith.addf %61, %62 : vector<62x128xf32>
    %64 = arith.mulf %63, %59 : vector<62x128xf32>
    %cst_37 = arith.constant 1.42141378 : f32
    %65 = vector.broadcast %cst_37 : f32 to vector<62x128xf32>
    %66 = arith.addf %64, %65 : vector<62x128xf32>
    %67 = arith.mulf %66, %59 : vector<62x128xf32>
    %cst_38 = arith.constant -0.284496725 : f32
    %68 = vector.broadcast %cst_38 : f32 to vector<62x128xf32>
    %69 = arith.addf %67, %68 : vector<62x128xf32>
    %70 = arith.mulf %69, %59 : vector<62x128xf32>
    %cst_39 = arith.constant 0.254829586 : f32
    %71 = vector.broadcast %cst_39 : f32 to vector<62x128xf32>
    %72 = arith.addf %70, %71 : vector<62x128xf32>
    %73 = arith.mulf %72, %59 : vector<62x128xf32>
    %cst_40 = arith.constant 0.000000e+00 : f32
    %74 = vector.broadcast %cst_40 : f32 to vector<62x128xf32>
    %75 = arith.subf %74, %53 : vector<62x128xf32>
    %76 = arith.mulf %75, %53 : vector<62x128xf32>
    %77 = math.exp %76 : vector<62x128xf32>
    %78 = arith.mulf %73, %77 : vector<62x128xf32>
    %cst_41 = arith.constant 1.000000e+00 : f32
    %79 = vector.broadcast %cst_41 : f32 to vector<62x128xf32>
    %80 = arith.subf %79, %78 : vector<62x128xf32>
    %81 = arith.mulf %52, %80 : vector<62x128xf32>
    %cst_42 = arith.constant 1.000000e+00 : f32
    %82 = vector.broadcast %cst_42 : f32 to vector<62x128xf32>
    %83 = arith.addf %82, %81 : vector<62x128xf32>
    %84 = arith.mulf %45, %83 : vector<62x128xf32>
    %c0_43 = arith.constant 0 : index
    %c0_44 = arith.constant 0 : index
    %85 = vector.load %arg8[%c0_43, %c0_44] : memref<128x128xf32, #tpu.memory_space<vmem>>, vector<62x128xf32>
    tpu.vector_store %arg8[%c0_43, %c0_44], %84 {strides = array<i32>} : memref<128x128xf32, #tpu.memory_space<vmem>>, vector<62x128xf32>,
    %c128 = arith.constant 128 : index
    %c0_45 = arith.constant 0 : index
    %86 = tpu.strided_load %arg0[%c128, %c0_45] {strides = array<i32: 2, 1>} : memref<256x128xf32, #tpu.memory_space<vmem>>, vector<62x128xf32>
    %87 = arith.truncf %86 : vector<62x128xf32> to vector<62x128xbf16>
    %c0_46 = arith.constant 0 : index
    %c0_47 = arith.constant 0 : index
    %c0_48 = arith.constant 0 : index
    %88 = vector.load %arg10[%c0_46, %c0_47, %c0_48] : memref<5x128x128xbf16, #tpu.memory_space<vmem>>, vector<1x128x128xbf16>
    %89 = vector.shape_cast %88 : vector<1x128x128xbf16> to vector<128x128xbf16>
    %cst_49 = arith.constant dense<0.000000e+00> : vector<62x128xf32>
    %90 = tpu.matmul %87, %89, %cst_49 {dimension_numbers = #tpu.dot_dimension_numbers<[1], [0], [0], [1], [0, 0, 1, 1], [], []>} : vector<62x128xbf16>, vector<128x128xbf16>, vector<62x128xf32> -> vector<62x128xf32>
    %c129 = arith.constant 129 : index
    %c0_50 = arith.constant 0 : index
    %91 = tpu.strided_load %arg0[%c129, %c0_50] {strides = array<i32: 2, 1>} : memref<256x128xf32, #tpu.memory_space<vmem>>, vector<62x128xf32>
    %92 = arith.truncf %91 : vector<62x128xf32> to vector<62x128xbf16>
    %c1_51 = arith.constant 1 : index
    %c0_52 = arith.constant 0 : index
    %c0_53 = arith.constant 0 : index
    %93 = vector.load %arg10[%c1_51, %c0_52, %c0_53] : memref<5x128x128xbf16, #tpu.memory_space<vmem>>, vector<1x128x128xbf16>
    %94 = vector.shape_cast %93 : vector<1x128x128xbf16> to vector<128x128xbf16>
    %cst_54 = arith.constant dense<0.000000e+00> : vector<62x128xf32>
    %95 = tpu.matmul %92, %94, %cst_54 {dimension_numbers = #tpu.dot_dimension_numbers<[1], [0], [0], [1], [0, 0, 1, 1], [], []>} : vector<62x128xbf16>, vector<128x128xbf16>, vector<62x128xf32> -> vector<62x128xf32>
    %96 = arith.addf %90, %95 : vector<62x128xf32>
    %c130 = arith.constant 130 : index
    %c0_55 = arith.constant 0 : index
    %97 = tpu.strided_load %arg0[%c130, %c0_55] {strides = array<i32: 2, 1>} : memref<256x128xf32, #tpu.memory_space<vmem>>, vector<62x128xf32>
    %98 = arith.truncf %97 : vector<62x128xf32> to vector<62x128xbf16>
    %c2_56 = arith.constant 2 : index
    %c0_57 = arith.constant 0 : index
    %c0_58 = arith.constant 0 : index
    %99 = vector.load %arg10[%c2_56, %c0_57, %c0_58] : memref<5x128x128xbf16, #tpu.memory_space<vmem>>, vector<1x128x128xbf16>
    %100 = vector.shape_cast %99 : vector<1x128x128xbf16> to vector<128x128xbf16>
    %cst_59 = arith.constant dense<0.000000e+00> : vector<62x128xf32>
    %101 = tpu.matmul %98, %100, %cst_59 {dimension_numbers = #tpu.dot_dimension_numbers<[1], [0], [0], [1], [0, 0, 1, 1], [], []>} : vector<62x128xbf16>, vector<128x128xbf16>, vector<62x128xf32> -> vector<62x128xf32>
    %102 = arith.addf %96, %101 : vector<62x128xf32>
    %c131 = arith.constant 131 : index
    %c0_60 = arith.constant 0 : index
    %103 = tpu.strided_load %arg0[%c131, %c0_60] {strides = array<i32: 2, 1>} : memref<256x128xf32, #tpu.memory_space<vmem>>, vector<62x128xf32>
    %104 = arith.truncf %103 : vector<62x128xf32> to vector<62x128xbf16>
    %c3_61 = arith.constant 3 : index
    %c0_62 = arith.constant 0 : index
    %c0_63 = arith.constant 0 : index
    %105 = vector.load %arg10[%c3_61, %c0_62, %c0_63] : memref<5x128x128xbf16, #tpu.memory_space<vmem>>, vector<1x128x128xbf16>
    %106 = vector.shape_cast %105 : vector<1x128x128xbf16> to vector<128x128xbf16>
    %cst_64 = arith.constant dense<0.000000e+00> : vector<62x128xf32>
    %107 = tpu.matmul %104, %106, %cst_64 {dimension_numbers = #tpu.dot_dimension_numbers<[1], [0], [0], [1], [0, 0, 1, 1], [], []>} : vector<62x128xbf16>, vector<128x128xbf16>, vector<62x128xf32> -> vector<62x128xf32>
    %108 = arith.addf %102, %107 : vector<62x128xf32>
    %c132 = arith.constant 132 : index
    %c0_65 = arith.constant 0 : index
    %109 = tpu.strided_load %arg0[%c132, %c0_65] {strides = array<i32: 2, 1>} : memref<256x128xf32, #tpu.memory_space<vmem>>, vector<62x128xf32>
    %110 = arith.truncf %109 : vector<62x128xf32> to vector<62x128xbf16>
    %c4_66 = arith.constant 4 : index
    %c0_67 = arith.constant 0 : index
    %c0_68 = arith.constant 0 : index
    %111 = vector.load %arg10[%c4_66, %c0_67, %c0_68] : memref<5x128x128xbf16, #tpu.memory_space<vmem>>, vector<1x128x128xbf16>
    %112 = vector.shape_cast %111 : vector<1x128x128xbf16> to vector<128x128xbf16>
    %cst_69 = arith.constant dense<0.000000e+00> : vector<62x128xf32>
    %113 = tpu.matmul %110, %112, %cst_69 {dimension_numbers = #tpu.dot_dimension_numbers<[1], [0], [0], [1], [0, 0, 1, 1], [], []>} : vector<62x128xbf16>, vector<128x128xbf16>, vector<62x128xf32> -> vector<62x128xf32>
    %114 = arith.addf %108, %113 : vector<62x128xf32>
    %115 = vector.broadcast %12 : vector<1x128xf32> to vector<62x128xf32>
    %116 = arith.addf %114, %115 : vector<62x128xf32>
    %cst_70 = arith.constant 5.000000e-01 : f32
    %117 = vector.broadcast %cst_70 : f32 to vector<62x128xf32>
    %118 = arith.mulf %117, %116 : vector<62x128xf32>
    %cst_71 = arith.constant 0.707106769 : f32
    %119 = vector.broadcast %cst_71 : f32 to vector<62x128xf32>
    %120 = arith.mulf %116, %119 : vector<62x128xf32>
    %cst_72 = arith.constant 0.000000e+00 : f32
    %121 = vector.broadcast %cst_72 : f32 to vector<62x128xf32>
    %122 = arith.cmpf oge, %120, %121 : vector<62x128xf32>
    %cst_73 = arith.constant 1.000000e+00 : f32
    %cst_74 = arith.constant -1.000000e+00 : f32
    %123 = vector.broadcast %cst_73 : f32 to vector<62x128xf32>
    %124 = vector.broadcast %cst_74 : f32 to vector<62x128xf32>
    %125 = arith.select %122, %123, %124 : vector<62x128xi1>, vector<62x128xf32>
    %126 = math.absf %120 : vector<62x128xf32>
    %cst_75 = arith.constant 0.327591091 : f32
    %127 = vector.broadcast %cst_75 : f32 to vector<62x128xf32>
    %128 = arith.mulf %127, %126 : vector<62x128xf32>
    %cst_76 = arith.constant 1.000000e+00 : f32
    %129 = vector.broadcast %cst_76 : f32 to vector<62x128xf32>
    %130 = arith.addf %129, %128 : vector<62x128xf32>
    %cst_77 = arith.constant 1.000000e+00 : f32
    %131 = vector.broadcast %cst_77 : f32 to vector<62x128xf32>
    %132 = arith.divf %131, %130 : vector<62x128xf32>
    %cst_78 = arith.constant 1.06140542 : f32
    %133 = vector.broadcast %cst_78 : f32 to vector<62x128xf32>
    %134 = arith.mulf %133, %132 : vector<62x128xf32>
    %cst_79 = arith.constant -1.45315206 : f32
    %135 = vector.broadcast %cst_79 : f32 to vector<62x128xf32>
    %136 = arith.addf %134, %135 : vector<62x128xf32>
    %137 = arith.mulf %136, %132 : vector<62x128xf32>
    %cst_80 = arith.constant 1.42141378 : f32
    %138 = vector.broadcast %cst_80 : f32 to vector<62x128xf32>
    %139 = arith.addf %137, %138 : vector<62x128xf32>
    %140 = arith.mulf %139, %132 : vector<62x128xf32>
    %cst_81 = arith.constant -0.284496725 : f32
    %141 = vector.broadcast %cst_81 : f32 to vector<62x128xf32>
    %142 = arith.addf %140, %141 : vector<62x128xf32>
    %143 = arith.mulf %142, %132 : vector<62x128xf32>
    %cst_82 = arith.constant 0.254829586 : f32
    %144 = vector.broadcast %cst_82 : f32 to vector<62x128xf32>
    %145 = arith.addf %143, %144 : vector<62x128xf32>
    %146 = arith.mulf %145, %132 : vector<62x128xf32>
    %cst_83 = arith.constant 0.000000e+00 : f32
    %147 = vector.broadcast %cst_83 : f32 to vector<62x128xf32>
    %148 = arith.subf %147, %126 : vector<62x128xf32>
    %149 = arith.mulf %148, %126 : vector<62x128xf32>
    %150 = math.exp %149 : vector<62x128xf32>
    %151 = arith.mulf %146, %150 : vector<62x128xf32>
    %cst_84 = arith.constant 1.000000e+00 : f32
    %152 = vector.broadcast %cst_84 : f32 to vector<62x128xf32>
    %153 = arith.subf %152, %151 : vector<62x128xf32>
    %154 = arith.mulf %125, %153 : vector<62x128xf32>
    %cst_85 = arith.constant 1.000000e+00 : f32
    %155 = vector.broadcast %cst_85 : f32 to vector<62x128xf32>
    %156 = arith.addf %155, %154 : vector<62x128xf32>
    %157 = arith.mulf %118, %156 : vector<62x128xf32>
    %c64 = arith.constant 64 : index
    %c0_86 = arith.constant 0 : index
    %158 = vector.load %arg8[%c64, %c0_86] : memref<128x128xf32, #tpu.memory_space<vmem>>, vector<62x128xf32>
    tpu.vector_store %arg8[%c64, %c0_86], %157 {strides = array<i32>} : memref<128x128xf32, #tpu.memory_space<vmem>>, vector<62x128xf32>,
    %c1_i32_87 = arith.constant 1 : i32
    %159 = tpu.memref_slice %arg15[%c1_i32_87] : memref<5x!tpu.dma_semaphore, #tpu.memory_space<semaphore_mem>> -> memref<1x!tpu.dma_semaphore, #tpu.memory_space<semaphore_mem>>
    %160 = tpu.memref_squeeze %159 : memref<1x!tpu.dma_semaphore, #tpu.memory_space<semaphore_mem>> -> memref<!tpu.dma_semaphore, #tpu.memory_space<semaphore_mem>>
    tpu.wait_dma2 semaphore(%160 : memref<!tpu.dma_semaphore, #tpu.memory_space<semaphore_mem>>) src(%arg3 : memref<3x128x128xbf16, #tpu.memory_space<any>>) dst(%arg11 : memref<3x128x128xbf16, #tpu.memory_space<vmem>>)
    %c1_88 = arith.constant 1 : index
    %c0_89 = arith.constant 0 : index
    %161 = vector.load %arg1[%c1_88, %c0_89] : memref<8x128xf32, #tpu.memory_space<vmem>>, vector<1x128xf32>
    %c0_90 = arith.constant 0 : index
    %c0_91 = arith.constant 0 : index
    %162 = tpu.strided_load %arg8[%c0_90, %c0_91] {strides = array<i32: 2, 1>} : memref<128x128xf32, #tpu.memory_space<vmem>>, vector<30x128xf32>
    %163 = arith.truncf %162 : vector<30x128xf32> to vector<30x128xbf16>
    %c0_92 = arith.constant 0 : index
    %c0_93 = arith.constant 0 : index
    %c0_94 = arith.constant 0 : index
    %164 = vector.load %arg11[%c0_92, %c0_93, %c0_94] : memref<3x128x128xbf16, #tpu.memory_space<vmem>>, vector<1x128x128xbf16>
    %165 = vector.shape_cast %164 : vector<1x128x128xbf16> to vector<128x128xbf16>
    %cst_95 = arith.constant dense<0.000000e+00> : vector<30x128xf32>
    %166 = tpu.matmul %163, %165, %cst_95 {dimension_numbers = #tpu.dot_dimension_numbers<[1], [0], [0], [1], [0, 0, 1, 1], [], []>} : vector<30x128xbf16>, vector<128x128xbf16>, vector<30x128xf32> -> vector<30x128xf32>
    %c1_96 = arith.constant 1 : index
    %c0_97 = arith.constant 0 : index
    %167 = tpu.strided_load %arg8[%c1_96, %c0_97] {strides = array<i32: 2, 1>} : memref<128x128xf32, #tpu.memory_space<vmem>>, vector<30x128xf32>
    %168 = arith.truncf %167 : vector<30x128xf32> to vector<30x128xbf16>
    %c1_98 = arith.constant 1 : index
    %c0_99 = arith.constant 0 : index
    %c0_100 = arith.constant 0 : index
    %169 = vector.load %arg11[%c1_98, %c0_99, %c0_100] : memref<3x128x128xbf16, #tpu.memory_space<vmem>>, vector<1x128x128xbf16>
    %170 = vector.shape_cast %169 : vector<1x128x128xbf16> to vector<128x128xbf16>
    %cst_101 = arith.constant dense<0.000000e+00> : vector<30x128xf32>
    %171 = tpu.matmul %168, %170, %cst_101 {dimension_numbers = #tpu.dot_dimension_numbers<[1], [0], [0], [1], [0, 0, 1, 1], [], []>} : vector<30x128xbf16>, vector<128x128xbf16>, vector<30x128xf32> -> vector<30x128xf32>
    %172 = arith.addf %166, %171 : vector<30x128xf32>
    %c2_102 = arith.constant 2 : index
    %c0_103 = arith.constant 0 : index
    %173 = tpu.strided_load %arg8[%c2_102, %c0_103] {strides = array<i32: 2, 1>} : memref<128x128xf32, #tpu.memory_space<vmem>>, vector<30x128xf32>
    %174 = arith.truncf %173 : vector<30x128xf32> to vector<30x128xbf16>
    %c2_104 = arith.constant 2 : index
    %c0_105 = arith.constant 0 : index
    %c0_106 = arith.constant 0 : index
    %175 = vector.load %arg11[%c2_104, %c0_105, %c0_106] : memref<3x128x128xbf16, #tpu.memory_space<vmem>>, vector<1x128x128xbf16>
    %176 = vector.shape_cast %175 : vector<1x128x128xbf16> to vector<128x128xbf16>
    %cst_107 = arith.constant dense<0.000000e+00> : vector<30x128xf32>
    %177 = tpu.matmul %174, %176, %cst_107 {dimension_numbers = #tpu.dot_dimension_numbers<[1], [0], [0], [1], [0, 0, 1, 1], [], []>} : vector<30x128xbf16>, vector<128x128xbf16>, vector<30x128xf32> -> vector<30x128xf32>
    %178 = arith.addf %172, %177 : vector<30x128xf32>
    %179 = vector.broadcast %161 : vector<1x128xf32> to vector<30x128xf32>
    %180 = arith.addf %178, %179 : vector<30x128xf32>
    %cst_108 = arith.constant 5.000000e-01 : f32
    %181 = vector.broadcast %cst_108 : f32 to vector<30x128xf32>
    %182 = arith.mulf %181, %180 : vector<30x128xf32>
    %cst_109 = arith.constant 0.707106769 : f32
    %183 = vector.broadcast %cst_109 : f32 to vector<30x128xf32>
    %184 = arith.mulf %180, %183 : vector<30x128xf32>
    %cst_110 = arith.constant 0.000000e+00 : f32
    %185 = vector.broadcast %cst_110 : f32 to vector<30x128xf32>
    %186 = arith.cmpf oge, %184, %185 : vector<30x128xf32>
    %cst_111 = arith.constant 1.000000e+00 : f32
    %cst_112 = arith.constant -1.000000e+00 : f32
    %187 = vector.broadcast %cst_111 : f32 to vector<30x128xf32>
    %188 = vector.broadcast %cst_112 : f32 to vector<30x128xf32>
    %189 = arith.select %186, %187, %188 : vector<30x128xi1>, vector<30x128xf32>
    %190 = math.absf %184 : vector<30x128xf32>
    %cst_113 = arith.constant 0.327591091 : f32
    %191 = vector.broadcast %cst_113 : f32 to vector<30x128xf32>
    %192 = arith.mulf %191, %190 : vector<30x128xf32>
    %cst_114 = arith.constant 1.000000e+00 : f32
    %193 = vector.broadcast %cst_114 : f32 to vector<30x128xf32>
    %194 = arith.addf %193, %192 : vector<30x128xf32>
    %cst_115 = arith.constant 1.000000e+00 : f32
    %195 = vector.broadcast %cst_115 : f32 to vector<30x128xf32>
    %196 = arith.divf %195, %194 : vector<30x128xf32>
    %cst_116 = arith.constant 1.06140542 : f32
    %197 = vector.broadcast %cst_116 : f32 to vector<30x128xf32>
    %198 = arith.mulf %197, %196 : vector<30x128xf32>
    %cst_117 = arith.constant -1.45315206 : f32
    %199 = vector.broadcast %cst_117 : f32 to vector<30x128xf32>
    %200 = arith.addf %198, %199 : vector<30x128xf32>
    %201 = arith.mulf %200, %196 : vector<30x128xf32>
    %cst_118 = arith.constant 1.42141378 : f32
    %202 = vector.broadcast %cst_118 : f32 to vector<30x128xf32>
    %203 = arith.addf %201, %202 : vector<30x128xf32>
    %204 = arith.mulf %203, %196 : vector<30x128xf32>
    %cst_119 = arith.constant -0.284496725 : f32
    %205 = vector.broadcast %cst_119 : f32 to vector<30x128xf32>
    %206 = arith.addf %204, %205 : vector<30x128xf32>
    %207 = arith.mulf %206, %196 : vector<30x128xf32>
    %cst_120 = arith.constant 0.254829586 : f32
    %208 = vector.broadcast %cst_120 : f32 to vector<30x128xf32>
    %209 = arith.addf %207, %208 : vector<30x128xf32>
    %210 = arith.mulf %209, %196 : vector<30x128xf32>
    %cst_121 = arith.constant 0.000000e+00 : f32
    %211 = vector.broadcast %cst_121 : f32 to vector<30x128xf32>
    %212 = arith.subf %211, %190 : vector<30x128xf32>
    %213 = arith.mulf %212, %190 : vector<30x128xf32>
    %214 = math.exp %213 : vector<30x128xf32>
    %215 = arith.mulf %210, %214 : vector<30x128xf32>
    %cst_122 = arith.constant 1.000000e+00 : f32
    %216 = vector.broadcast %cst_122 : f32 to vector<30x128xf32>
    %217 = arith.subf %216, %215 : vector<30x128xf32>
    %218 = arith.mulf %189, %217 : vector<30x128xf32>
    %cst_123 = arith.constant 1.000000e+00 : f32
    %219 = vector.broadcast %cst_123 : f32 to vector<30x128xf32>
    %220 = arith.addf %219, %218 : vector<30x128xf32>
    %221 = arith.mulf %182, %220 : vector<30x128xf32>
    %c0_124 = arith.constant 0 : index
    %c0_125 = arith.constant 0 : index
    %222 = vector.load %arg9[%c0_124, %c0_125] : memref<128x128xf32, #tpu.memory_space<vmem>>, vector<30x128xf32>
    tpu.vector_store %arg9[%c0_124, %c0_125], %221 {strides = array<i32>} : memref<128x128xf32, #tpu.memory_space<vmem>>, vector<30x128xf32>,
    %c64_126 = arith.constant 64 : index
    %c0_127 = arith.constant 0 : index
    %223 = tpu.strided_load %arg8[%c64_126, %c0_127] {strides = array<i32: 2, 1>} : memref<128x128xf32, #tpu.memory_space<vmem>>, vector<30x128xf32>
    %224 = arith.truncf %223 : vector<30x128xf32> to vector<30x128xbf16>
    %c0_128 = arith.constant 0 : index
    %c0_129 = arith.constant 0 : index
    %c0_130 = arith.constant 0 : index
    %225 = vector.load %arg11[%c0_128, %c0_129, %c0_130] : memref<3x128x128xbf16, #tpu.memory_space<vmem>>, vector<1x128x128xbf16>
    %226 = vector.shape_cast %225 : vector<1x128x128xbf16> to vector<128x128xbf16>
    %cst_131 = arith.constant dense<0.000000e+00> : vector<30x128xf32>
    %227 = tpu.matmul %224, %226, %cst_131 {dimension_numbers = #tpu.dot_dimension_numbers<[1], [0], [0], [1], [0, 0, 1, 1], [], []>} : vector<30x128xbf16>, vector<128x128xbf16>, vector<30x128xf32> -> vector<30x128xf32>
    %c65 = arith.constant 65 : index
    %c0_132 = arith.constant 0 : index
    %228 = tpu.strided_load %arg8[%c65, %c0_132] {strides = array<i32: 2, 1>} : memref<128x128xf32, #tpu.memory_space<vmem>>, vector<30x128xf32>
    %229 = arith.truncf %228 : vector<30x128xf32> to vector<30x128xbf16>
    %c1_133 = arith.constant 1 : index
    %c0_134 = arith.constant 0 : index
    %c0_135 = arith.constant 0 : index
    %230 = vector.load %arg11[%c1_133, %c0_134, %c0_135] : memref<3x128x128xbf16, #tpu.memory_space<vmem>>, vector<1x128x128xbf16>
    %231 = vector.shape_cast %230 : vector<1x128x128xbf16> to vector<128x128xbf16>
    %cst_136 = arith.constant dense<0.000000e+00> : vector<30x128xf32>
    %232 = tpu.matmul %229, %231, %cst_136 {dimension_numbers = #tpu.dot_dimension_numbers<[1], [0], [0], [1], [0, 0, 1, 1], [], []>} : vector<30x128xbf16>, vector<128x128xbf16>, vector<30x128xf32> -> vector<30x128xf32>
    %233 = arith.addf %227, %232 : vector<30x128xf32>
    %c66 = arith.constant 66 : index
    %c0_137 = arith.constant 0 : index
    %234 = tpu.strided_load %arg8[%c66, %c0_137] {strides = array<i32: 2, 1>} : memref<128x128xf32, #tpu.memory_space<vmem>>, vector<30x128xf32>
    %235 = arith.truncf %234 : vector<30x128xf32> to vector<30x128xbf16>
    %c2_138 = arith.constant 2 : index
    %c0_139 = arith.constant 0 : index
    %c0_140 = arith.constant 0 : index
    %236 = vector.load %arg11[%c2_138, %c0_139, %c0_140] : memref<3x128x128xbf16, #tpu.memory_space<vmem>>, vector<1x128x128xbf16>
    %237 = vector.shape_cast %236 : vector<1x128x128xbf16> to vector<128x128xbf16>
    %cst_141 = arith.constant dense<0.000000e+00> : vector<30x128xf32>
    %238 = tpu.matmul %235, %237, %cst_141 {dimension_numbers = #tpu.dot_dimension_numbers<[1], [0], [0], [1], [0, 0, 1, 1], [], []>} : vector<30x128xbf16>, vector<128x128xbf16>, vector<30x128xf32> -> vector<30x128xf32>
    %239 = arith.addf %233, %238 : vector<30x128xf32>
    %240 = vector.broadcast %161 : vector<1x128xf32> to vector<30x128xf32>
    %241 = arith.addf %239, %240 : vector<30x128xf32>
    %cst_142 = arith.constant 5.000000e-01 : f32
    %242 = vector.broadcast %cst_142 : f32 to vector<30x128xf32>
    %243 = arith.mulf %242, %241 : vector<30x128xf32>
    %cst_143 = arith.constant 0.707106769 : f32
    %244 = vector.broadcast %cst_143 : f32 to vector<30x128xf32>
    %245 = arith.mulf %241, %244 : vector<30x128xf32>
    %cst_144 = arith.constant 0.000000e+00 : f32
    %246 = vector.broadcast %cst_144 : f32 to vector<30x128xf32>
    %247 = arith.cmpf oge, %245, %246 : vector<30x128xf32>
    %cst_145 = arith.constant 1.000000e+00 : f32
    %cst_146 = arith.constant -1.000000e+00 : f32
    %248 = vector.broadcast %cst_145 : f32 to vector<30x128xf32>
    %249 = vector.broadcast %cst_146 : f32 to vector<30x128xf32>
    %250 = arith.select %247, %248, %249 : vector<30x128xi1>, vector<30x128xf32>
    %251 = math.absf %245 : vector<30x128xf32>
    %cst_147 = arith.constant 0.327591091 : f32
    %252 = vector.broadcast %cst_147 : f32 to vector<30x128xf32>
    %253 = arith.mulf %252, %251 : vector<30x128xf32>
    %cst_148 = arith.constant 1.000000e+00 : f32
    %254 = vector.broadcast %cst_148 : f32 to vector<30x128xf32>
    %255 = arith.addf %254, %253 : vector<30x128xf32>
    %cst_149 = arith.constant 1.000000e+00 : f32
    %256 = vector.broadcast %cst_149 : f32 to vector<30x128xf32>
    %257 = arith.divf %256, %255 : vector<30x128xf32>
    %cst_150 = arith.constant 1.06140542 : f32
    %258 = vector.broadcast %cst_150 : f32 to vector<30x128xf32>
    %259 = arith.mulf %258, %257 : vector<30x128xf32>
    %cst_151 = arith.constant -1.45315206 : f32
    %260 = vector.broadcast %cst_151 : f32 to vector<30x128xf32>
    %261 = arith.addf %259, %260 : vector<30x128xf32>
    %262 = arith.mulf %261, %257 : vector<30x128xf32>
    %cst_152 = arith.constant 1.42141378 : f32
    %263 = vector.broadcast %cst_152 : f32 to vector<30x128xf32>
    %264 = arith.addf %262, %263 : vector<30x128xf32>
    %265 = arith.mulf %264, %257 : vector<30x128xf32>
    %cst_153 = arith.constant -0.284496725 : f32
    %266 = vector.broadcast %cst_153 : f32 to vector<30x128xf32>
    %267 = arith.addf %265, %266 : vector<30x128xf32>
    %268 = arith.mulf %267, %257 : vector<30x128xf32>
    %cst_154 = arith.constant 0.254829586 : f32
    %269 = vector.broadcast %cst_154 : f32 to vector<30x128xf32>
    %270 = arith.addf %268, %269 : vector<30x128xf32>
    %271 = arith.mulf %270, %257 : vector<30x128xf32>
    %cst_155 = arith.constant 0.000000e+00 : f32
    %272 = vector.broadcast %cst_155 : f32 to vector<30x128xf32>
    %273 = arith.subf %272, %251 : vector<30x128xf32>
    %274 = arith.mulf %273, %251 : vector<30x128xf32>
    %275 = math.exp %274 : vector<30x128xf32>
    %276 = arith.mulf %271, %275 : vector<30x128xf32>
    %cst_156 = arith.constant 1.000000e+00 : f32
    %277 = vector.broadcast %cst_156 : f32 to vector<30x128xf32>
    %278 = arith.subf %277, %276 : vector<30x128xf32>
    %279 = arith.mulf %250, %278 : vector<30x128xf32>
    %cst_157 = arith.constant 1.000000e+00 : f32
    %280 = vector.broadcast %cst_157 : f32 to vector<30x128xf32>
    %281 = arith.addf %280, %279 : vector<30x128xf32>
    %282 = arith.mulf %243, %281 : vector<30x128xf32>
    %c64_158 = arith.constant 64 : index
    %c0_159 = arith.constant 0 : index
    %283 = vector.load %arg9[%c64_158, %c0_159] : memref<128x128xf32, #tpu.memory_space<vmem>>, vector<30x128xf32>
    tpu.vector_store %arg9[%c64_158, %c0_159], %282 {strides = array<i32>} : memref<128x128xf32, #tpu.memory_space<vmem>>, vector<30x128xf32>,
    %c2_i32_160 = arith.constant 2 : i32
    %284 = tpu.memref_slice %arg15[%c2_i32_160] : memref<5x!tpu.dma_semaphore, #tpu.memory_space<semaphore_mem>> -> memref<1x!tpu.dma_semaphore, #tpu.memory_space<semaphore_mem>>
    %285 = tpu.memref_squeeze %284 : memref<1x!tpu.dma_semaphore, #tpu.memory_space<semaphore_mem>> -> memref<!tpu.dma_semaphore, #tpu.memory_space<semaphore_mem>>
    tpu.wait_dma2 semaphore(%285 : memref<!tpu.dma_semaphore, #tpu.memory_space<semaphore_mem>>) src(%arg4 : memref<3x128x128xbf16, #tpu.memory_space<any>>) dst(%arg12 : memref<3x128x128xbf16, #tpu.memory_space<vmem>>)
    %c2_161 = arith.constant 2 : index
    %c0_162 = arith.constant 0 : index
    %286 = vector.load %arg1[%c2_161, %c0_162] : memref<8x128xf32, #tpu.memory_space<vmem>>, vector<1x128xf32>
    %cst_163 = arith.constant 0.000000e+00 : f32
    %287 = vector.broadcast %cst_163 : f32 to vector<1x128xf32>
    %c0_164 = arith.constant 0 : index
    %c0_165 = arith.constant 0 : index
    %288 = tpu.strided_load %arg9[%c0_164, %c0_165] {strides = array<i32: 2, 1>} : memref<128x128xf32, #tpu.memory_space<vmem>>, vector<14x128xf32>
    %289 = arith.truncf %288 : vector<14x128xf32> to vector<14x128xbf16>
    %c0_166 = arith.constant 0 : index
    %c0_167 = arith.constant 0 : index
    %c0_168 = arith.constant 0 : index
    %290 = vector.load %arg12[%c0_166, %c0_167, %c0_168] : memref<3x128x128xbf16, #tpu.memory_space<vmem>>, vector<1x128x128xbf16>
    %291 = vector.shape_cast %290 : vector<1x128x128xbf16> to vector<128x128xbf16>
    %cst_169 = arith.constant dense<0.000000e+00> : vector<14x128xf32>
    %292 = tpu.matmul %289, %291, %cst_169 {dimension_numbers = #tpu.dot_dimension_numbers<[1], [0], [0], [1], [0, 0, 1, 1], [], []>} : vector<14x128xbf16>, vector<128x128xbf16>, vector<14x128xf32> -> vector<14x128xf32>
    %c1_170 = arith.constant 1 : index
    %c0_171 = arith.constant 0 : index
    %293 = tpu.strided_load %arg9[%c1_170, %c0_171] {strides = array<i32: 2, 1>} : memref<128x128xf32, #tpu.memory_space<vmem>>, vector<14x128xf32>
    %294 = arith.truncf %293 : vector<14x128xf32> to vector<14x128xbf16>
    %c1_172 = arith.constant 1 : index
    %c0_173 = arith.constant 0 : index
    %c0_174 = arith.constant 0 : index
    %295 = vector.load %arg12[%c1_172, %c0_173, %c0_174] : memref<3x128x128xbf16, #tpu.memory_space<vmem>>, vector<1x128x128xbf16>
    %296 = vector.shape_cast %295 : vector<1x128x128xbf16> to vector<128x128xbf16>
    %cst_175 = arith.constant dense<0.000000e+00> : vector<14x128xf32>
    %297 = tpu.matmul %294, %296, %cst_175 {dimension_numbers = #tpu.dot_dimension_numbers<[1], [0], [0], [1], [0, 0, 1, 1], [], []>} : vector<14x128xbf16>, vector<128x128xbf16>, vector<14x128xf32> -> vector<14x128xf32>
    %298 = arith.addf %292, %297 : vector<14x128xf32>
    %c2_176 = arith.constant 2 : index
    %c0_177 = arith.constant 0 : index
    %299 = tpu.strided_load %arg9[%c2_176, %c0_177] {strides = array<i32: 2, 1>} : memref<128x128xf32, #tpu.memory_space<vmem>>, vector<14x128xf32>
    %300 = arith.truncf %299 : vector<14x128xf32> to vector<14x128xbf16>
    %c2_178 = arith.constant 2 : index
    %c0_179 = arith.constant 0 : index
    %c0_180 = arith.constant 0 : index
    %301 = vector.load %arg12[%c2_178, %c0_179, %c0_180] : memref<3x128x128xbf16, #tpu.memory_space<vmem>>, vector<1x128x128xbf16>
    %302 = vector.shape_cast %301 : vector<1x128x128xbf16> to vector<128x128xbf16>
    %cst_181 = arith.constant dense<0.000000e+00> : vector<14x128xf32>
    %303 = tpu.matmul %300, %302, %cst_181 {dimension_numbers = #tpu.dot_dimension_numbers<[1], [0], [0], [1], [0, 0, 1, 1], [], []>} : vector<14x128xbf16>, vector<128x128xbf16>, vector<14x128xf32> -> vector<14x128xf32>
    %304 = arith.addf %298, %303 : vector<14x128xf32>
    %305 = vector.broadcast %286 : vector<1x128xf32> to vector<14x128xf32>
    %306 = arith.addf %304, %305 : vector<14x128xf32>
    %cst_182 = arith.constant dense<0.000000e+00> : vector<128xf32>
    %307 = vector.multi_reduction <add>, %306, %cst_182 [0] : vector<14x128xf32> to vector<128xf32>
    %308 = vector.shape_cast %307 : vector<128xf32> to vector<1x128xf32>
    %309 = arith.addf %287, %308 : vector<1x128xf32>
    %c64_183 = arith.constant 64 : index
    %c0_184 = arith.constant 0 : index
    %310 = tpu.strided_load %arg9[%c64_183, %c0_184] {strides = array<i32: 2, 1>} : memref<128x128xf32, #tpu.memory_space<vmem>>, vector<14x128xf32>
    %311 = arith.truncf %310 : vector<14x128xf32> to vector<14x128xbf16>
    %c0_185 = arith.constant 0 : index
    %c0_186 = arith.constant 0 : index
    %c0_187 = arith.constant 0 : index
    %312 = vector.load %arg12[%c0_185, %c0_186, %c0_187] : memref<3x128x128xbf16, #tpu.memory_space<vmem>>, vector<1x128x128xbf16>
    %313 = vector.shape_cast %312 : vector<1x128x128xbf16> to vector<128x128xbf16>
    %cst_188 = arith.constant dense<0.000000e+00> : vector<14x128xf32>
    %314 = tpu.matmul %311, %313, %cst_188 {dimension_numbers = #tpu.dot_dimension_numbers<[1], [0], [0], [1], [0, 0, 1, 1], [], []>} : vector<14x128xbf16>, vector<128x128xbf16>, vector<14x128xf32> -> vector<14x128xf32>
    %c65_189 = arith.constant 65 : index
    %c0_190 = arith.constant 0 : index
    %315 = tpu.strided_load %arg9[%c65_189, %c0_190] {strides = array<i32: 2, 1>} : memref<128x128xf32, #tpu.memory_space<vmem>>, vector<14x128xf32>
    %316 = arith.truncf %315 : vector<14x128xf32> to vector<14x128xbf16>
    %c1_191 = arith.constant 1 : index
    %c0_192 = arith.constant 0 : index
    %c0_193 = arith.constant 0 : index
    %317 = vector.load %arg12[%c1_191, %c0_192, %c0_193] : memref<3x128x128xbf16, #tpu.memory_space<vmem>>, vector<1x128x128xbf16>
    %318 = vector.shape_cast %317 : vector<1x128x128xbf16> to vector<128x128xbf16>
    %cst_194 = arith.constant dense<0.000000e+00> : vector<14x128xf32>
    %319 = tpu.matmul %316, %318, %cst_194 {dimension_numbers = #tpu.dot_dimension_numbers<[1], [0], [0], [1], [0, 0, 1, 1], [], []>} : vector<14x128xbf16>, vector<128x128xbf16>, vector<14x128xf32> -> vector<14x128xf32>
    %320 = arith.addf %314, %319 : vector<14x128xf32>
    %c66_195 = arith.constant 66 : index
    %c0_196 = arith.constant 0 : index
    %321 = tpu.strided_load %arg9[%c66_195, %c0_196] {strides = array<i32: 2, 1>} : memref<128x128xf32, #tpu.memory_space<vmem>>, vector<14x128xf32>
    %322 = arith.truncf %321 : vector<14x128xf32> to vector<14x128xbf16>
    %c2_197 = arith.constant 2 : index
    %c0_198 = arith.constant 0 : index
    %c0_199 = arith.constant 0 : index
    %323 = vector.load %arg12[%c2_197, %c0_198, %c0_199] : memref<3x128x128xbf16, #tpu.memory_space<vmem>>, vector<1x128x128xbf16>
    %324 = vector.shape_cast %323 : vector<1x128x128xbf16> to vector<128x128xbf16>
    %cst_200 = arith.constant dense<0.000000e+00> : vector<14x128xf32>
    %325 = tpu.matmul %322, %324, %cst_200 {dimension_numbers = #tpu.dot_dimension_numbers<[1], [0], [0], [1], [0, 0, 1, 1], [], []>} : vector<14x128xbf16>, vector<128x128xbf16>, vector<14x128xf32> -> vector<14x128xf32>
    %326 = arith.addf %320, %325 : vector<14x128xf32>
    %327 = vector.broadcast %286 : vector<1x128xf32> to vector<14x128xf32>
    %328 = arith.addf %326, %327 : vector<14x128xf32>
    %cst_201 = arith.constant dense<0.000000e+00> : vector<128xf32>
    %329 = vector.multi_reduction <add>, %328, %cst_201 [0] : vector<14x128xf32> to vector<128xf32>
    %330 = vector.shape_cast %329 : vector<128xf32> to vector<1x128xf32>
    %331 = arith.addf %309, %330 : vector<1x128xf32>
    %cst_202 = arith.constant 0.0357142873 : f32
    %332 = vector.broadcast %cst_202 : f32 to vector<1x128xf32>
    %333 = arith.mulf %331, %332 : vector<1x128xf32>
    %334 = vector.broadcast %333 : vector<1x128xf32> to vector<14x128xf32>
    %335 = arith.subf %306, %334 : vector<14x128xf32>
    %336 = vector.broadcast %333 : vector<1x128xf32> to vector<14x128xf32>
    %337 = arith.subf %328, %336 : vector<14x128xf32>
    %cst_203 = arith.constant 0.000000e+00 : f32
    %338 = vector.broadcast %cst_203 : f32 to vector<1x128xf32>
    %339 = arith.mulf %335, %335 : vector<14x128xf32>
    %cst_204 = arith.constant dense<0.000000e+00> : vector<128xf32>
    %340 = vector.multi_reduction <add>, %339, %cst_204 [0] : vector<14x128xf32> to vector<128xf32>
    %341 = vector.shape_cast %340 : vector<128xf32> to vector<1x128xf32>
    %342 = arith.addf %338, %341 : vector<1x128xf32>
    %343 = arith.mulf %337, %337 : vector<14x128xf32>
    %cst_205 = arith.constant dense<0.000000e+00> : vector<128xf32>
    %344 = vector.multi_reduction <add>, %343, %cst_205 [0] : vector<14x128xf32> to vector<128xf32>
    %345 = vector.shape_cast %344 : vector<128xf32> to vector<1x128xf32>
    %346 = arith.addf %342, %345 : vector<1x128xf32>
    %cst_206 = arith.constant 0.0357142873 : f32
    %347 = vector.broadcast %cst_206 : f32 to vector<1x128xf32>
    %348 = arith.mulf %346, %347 : vector<1x128xf32>
    %cst_207 = arith.constant 9.99999974E-6 : f32
    %349 = vector.broadcast %cst_207 : f32 to vector<1x128xf32>
    %350 = arith.addf %348, %349 : vector<1x128xf32>
    %351 = math.rsqrt %350 : vector<1x128xf32>
    %352 = vector.broadcast %351 : vector<1x128xf32> to vector<14x128xf32>
    %353 = arith.mulf %335, %352 : vector<14x128xf32>
    %cst_208 = arith.constant 5.000000e-01 : f32
    %354 = vector.broadcast %cst_208 : f32 to vector<14x128xf32>
    %355 = arith.mulf %354, %353 : vector<14x128xf32>
    %cst_209 = arith.constant 0.707106769 : f32
    %356 = vector.broadcast %cst_209 : f32 to vector<14x128xf32>
    %357 = arith.mulf %353, %356 : vector<14x128xf32>
    %cst_210 = arith.constant 0.000000e+00 : f32
    %358 = vector.broadcast %cst_210 : f32 to vector<14x128xf32>
    %359 = arith.cmpf oge, %357, %358 : vector<14x128xf32>
    %cst_211 = arith.constant 1.000000e+00 : f32
    %cst_212 = arith.constant -1.000000e+00 : f32
    %360 = vector.broadcast %cst_211 : f32 to vector<14x128xf32>
    %361 = vector.broadcast %cst_212 : f32 to vector<14x128xf32>
    %362 = arith.select %359, %360, %361 : vector<14x128xi1>, vector<14x128xf32>
    %363 = math.absf %357 : vector<14x128xf32>
    %cst_213 = arith.constant 0.327591091 : f32
    %364 = vector.broadcast %cst_213 : f32 to vector<14x128xf32>
    %365 = arith.mulf %364, %363 : vector<14x128xf32>
    %cst_214 = arith.constant 1.000000e+00 : f32
    %366 = vector.broadcast %cst_214 : f32 to vector<14x128xf32>
    %367 = arith.addf %366, %365 : vector<14x128xf32>
    %cst_215 = arith.constant 1.000000e+00 : f32
    %368 = vector.broadcast %cst_215 : f32 to vector<14x128xf32>
    %369 = arith.divf %368, %367 : vector<14x128xf32>
    %cst_216 = arith.constant 1.06140542 : f32
    %370 = vector.broadcast %cst_216 : f32 to vector<14x128xf32>
    %371 = arith.mulf %370, %369 : vector<14x128xf32>
    %cst_217 = arith.constant -1.45315206 : f32
    %372 = vector.broadcast %cst_217 : f32 to vector<14x128xf32>
    %373 = arith.addf %371, %372 : vector<14x128xf32>
    %374 = arith.mulf %373, %369 : vector<14x128xf32>
    %cst_218 = arith.constant 1.42141378 : f32
    %375 = vector.broadcast %cst_218 : f32 to vector<14x128xf32>
    %376 = arith.addf %374, %375 : vector<14x128xf32>
    %377 = arith.mulf %376, %369 : vector<14x128xf32>
    %cst_219 = arith.constant -0.284496725 : f32
    %378 = vector.broadcast %cst_219 : f32 to vector<14x128xf32>
    %379 = arith.addf %377, %378 : vector<14x128xf32>
    %380 = arith.mulf %379, %369 : vector<14x128xf32>
    %cst_220 = arith.constant 0.254829586 : f32
    %381 = vector.broadcast %cst_220 : f32 to vector<14x128xf32>
    %382 = arith.addf %380, %381 : vector<14x128xf32>
    %383 = arith.mulf %382, %369 : vector<14x128xf32>
    %cst_221 = arith.constant 0.000000e+00 : f32
    %384 = vector.broadcast %cst_221 : f32 to vector<14x128xf32>
    %385 = arith.subf %384, %363 : vector<14x128xf32>
    %386 = arith.mulf %385, %363 : vector<14x128xf32>
    %387 = math.exp %386 : vector<14x128xf32>
    %388 = arith.mulf %383, %387 : vector<14x128xf32>
    %cst_222 = arith.constant 1.000000e+00 : f32
    %389 = vector.broadcast %cst_222 : f32 to vector<14x128xf32>
    %390 = arith.subf %389, %388 : vector<14x128xf32>
    %391 = arith.mulf %362, %390 : vector<14x128xf32>
    %cst_223 = arith.constant 1.000000e+00 : f32
    %392 = vector.broadcast %cst_223 : f32 to vector<14x128xf32>
    %393 = arith.addf %392, %391 : vector<14x128xf32>
    %394 = arith.mulf %355, %393 : vector<14x128xf32>
    %c0_224 = arith.constant 0 : index
    %c0_225 = arith.constant 0 : index
    %395 = vector.load %arg8[%c0_224, %c0_225] : memref<128x128xf32, #tpu.memory_space<vmem>>, vector<14x128xf32>
    tpu.vector_store %arg8[%c0_224, %c0_225], %394 {strides = array<i32>} : memref<128x128xf32, #tpu.memory_space<vmem>>, vector<14x128xf32>,
    %396 = vector.broadcast %351 : vector<1x128xf32> to vector<14x128xf32>
    %397 = arith.mulf %337, %396 : vector<14x128xf32>
    %cst_226 = arith.constant 5.000000e-01 : f32
    %398 = vector.broadcast %cst_226 : f32 to vector<14x128xf32>
    %399 = arith.mulf %398, %397 : vector<14x128xf32>
    %cst_227 = arith.constant 0.707106769 : f32
    %400 = vector.broadcast %cst_227 : f32 to vector<14x128xf32>
    %401 = arith.mulf %397, %400 : vector<14x128xf32>
    %cst_228 = arith.constant 0.000000e+00 : f32
    %402 = vector.broadcast %cst_228 : f32 to vector<14x128xf32>
    %403 = arith.cmpf oge, %401, %402 : vector<14x128xf32>
    %cst_229 = arith.constant 1.000000e+00 : f32
    %cst_230 = arith.constant -1.000000e+00 : f32
    %404 = vector.broadcast %cst_229 : f32 to vector<14x128xf32>
    %405 = vector.broadcast %cst_230 : f32 to vector<14x128xf32>
    %406 = arith.select %403, %404, %405 : vector<14x128xi1>, vector<14x128xf32>
    %407 = math.absf %401 : vector<14x128xf32>
    %cst_231 = arith.constant 0.327591091 : f32
    %408 = vector.broadcast %cst_231 : f32 to vector<14x128xf32>
    %409 = arith.mulf %408, %407 : vector<14x128xf32>
    %cst_232 = arith.constant 1.000000e+00 : f32
    %410 = vector.broadcast %cst_232 : f32 to vector<14x128xf32>
    %411 = arith.addf %410, %409 : vector<14x128xf32>
    %cst_233 = arith.constant 1.000000e+00 : f32
    %412 = vector.broadcast %cst_233 : f32 to vector<14x128xf32>
    %413 = arith.divf %412, %411 : vector<14x128xf32>
    %cst_234 = arith.constant 1.06140542 : f32
    %414 = vector.broadcast %cst_234 : f32 to vector<14x128xf32>
    %415 = arith.mulf %414, %413 : vector<14x128xf32>
    %cst_235 = arith.constant -1.45315206 : f32
    %416 = vector.broadcast %cst_235 : f32 to vector<14x128xf32>
    %417 = arith.addf %415, %416 : vector<14x128xf32>
    %418 = arith.mulf %417, %413 : vector<14x128xf32>
    %cst_236 = arith.constant 1.42141378 : f32
    %419 = vector.broadcast %cst_236 : f32 to vector<14x128xf32>
    %420 = arith.addf %418, %419 : vector<14x128xf32>
    %421 = arith.mulf %420, %413 : vector<14x128xf32>
    %cst_237 = arith.constant -0.284496725 : f32
    %422 = vector.broadcast %cst_237 : f32 to vector<14x128xf32>
    %423 = arith.addf %421, %422 : vector<14x128xf32>
    %424 = arith.mulf %423, %413 : vector<14x128xf32>
    %cst_238 = arith.constant 0.254829586 : f32
    %425 = vector.broadcast %cst_238 : f32 to vector<14x128xf32>
    %426 = arith.addf %424, %425 : vector<14x128xf32>
    %427 = arith.mulf %426, %413 : vector<14x128xf32>
    %cst_239 = arith.constant 0.000000e+00 : f32
    %428 = vector.broadcast %cst_239 : f32 to vector<14x128xf32>
    %429 = arith.subf %428, %407 : vector<14x128xf32>
    %430 = arith.mulf %429, %407 : vector<14x128xf32>
    %431 = math.exp %430 : vector<14x128xf32>
    %432 = arith.mulf %427, %431 : vector<14x128xf32>
    %cst_240 = arith.constant 1.000000e+00 : f32
    %433 = vector.broadcast %cst_240 : f32 to vector<14x128xf32>
    %434 = arith.subf %433, %432 : vector<14x128xf32>
    %435 = arith.mulf %406, %434 : vector<14x128xf32>
    %cst_241 = arith.constant 1.000000e+00 : f32
    %436 = vector.broadcast %cst_241 : f32 to vector<14x128xf32>
    %437 = arith.addf %436, %435 : vector<14x128xf32>
    %438 = arith.mulf %399, %437 : vector<14x128xf32>
    %c64_242 = arith.constant 64 : index
    %c0_243 = arith.constant 0 : index
    %439 = vector.load %arg8[%c64_242, %c0_243] : memref<128x128xf32, #tpu.memory_space<vmem>>, vector<14x128xf32>
    tpu.vector_store %arg8[%c64_242, %c0_243], %438 {strides = array<i32>} : memref<128x128xf32, #tpu.memory_space<vmem>>, vector<14x128xf32>,
    %c3_i32_244 = arith.constant 3 : i32
    %440 = tpu.memref_slice %arg15[%c3_i32_244] : memref<5x!tpu.dma_semaphore, #tpu.memory_space<semaphore_mem>> -> memref<1x!tpu.dma_semaphore, #tpu.memory_space<semaphore_mem>>
    %441 = tpu.memref_squeeze %440 : memref<1x!tpu.dma_semaphore, #tpu.memory_space<semaphore_mem>> -> memref<!tpu.dma_semaphore, #tpu.memory_space<semaphore_mem>>
    tpu.wait_dma2 semaphore(%441 : memref<!tpu.dma_semaphore, #tpu.memory_space<semaphore_mem>>) src(%arg5 : memref<3x128x128xbf16, #tpu.memory_space<any>>) dst(%arg13 : memref<3x128x128xbf16, #tpu.memory_space<vmem>>)
    %c3_245 = arith.constant 3 : index
    %c0_246 = arith.constant 0 : index
    %442 = vector.load %arg1[%c3_245, %c0_246] : memref<8x128xf32, #tpu.memory_space<vmem>>, vector<1x128xf32>
    %cst_247 = arith.constant 0.000000e+00 : f32
    %443 = vector.broadcast %cst_247 : f32 to vector<1x128xf32>
    %c0_248 = arith.constant 0 : index
    %c0_249 = arith.constant 0 : index
    %444 = tpu.strided_load %arg8[%c0_248, %c0_249] {strides = array<i32: 2, 1>} : memref<128x128xf32, #tpu.memory_space<vmem>>, vector<6x128xf32>
    %445 = arith.truncf %444 : vector<6x128xf32> to vector<6x128xbf16>
    %c0_250 = arith.constant 0 : index
    %c0_251 = arith.constant 0 : index
    %c0_252 = arith.constant 0 : index
    %446 = vector.load %arg13[%c0_250, %c0_251, %c0_252] : memref<3x128x128xbf16, #tpu.memory_space<vmem>>, vector<1x128x128xbf16>
    %447 = vector.shape_cast %446 : vector<1x128x128xbf16> to vector<128x128xbf16>
    %cst_253 = arith.constant dense<0.000000e+00> : vector<6x128xf32>
    %448 = tpu.matmul %445, %447, %cst_253 {dimension_numbers = #tpu.dot_dimension_numbers<[1], [0], [0], [1], [0, 0, 1, 1], [], []>} : vector<6x128xbf16>, vector<128x128xbf16>, vector<6x128xf32> -> vector<6x128xf32>
    %c1_254 = arith.constant 1 : index
    %c0_255 = arith.constant 0 : index
    %449 = tpu.strided_load %arg8[%c1_254, %c0_255] {strides = array<i32: 2, 1>} : memref<128x128xf32, #tpu.memory_space<vmem>>, vector<6x128xf32>
    %450 = arith.truncf %449 : vector<6x128xf32> to vector<6x128xbf16>
    %c1_256 = arith.constant 1 : index
    %c0_257 = arith.constant 0 : index
    %c0_258 = arith.constant 0 : index
    %451 = vector.load %arg13[%c1_256, %c0_257, %c0_258] : memref<3x128x128xbf16, #tpu.memory_space<vmem>>, vector<1x128x128xbf16>
    %452 = vector.shape_cast %451 : vector<1x128x128xbf16> to vector<128x128xbf16>
    %cst_259 = arith.constant dense<0.000000e+00> : vector<6x128xf32>
    %453 = tpu.matmul %450, %452, %cst_259 {dimension_numbers = #tpu.dot_dimension_numbers<[1], [0], [0], [1], [0, 0, 1, 1], [], []>} : vector<6x128xbf16>, vector<128x128xbf16>, vector<6x128xf32> -> vector<6x128xf32>
    %454 = arith.addf %448, %453 : vector<6x128xf32>
    %c2_260 = arith.constant 2 : index
    %c0_261 = arith.constant 0 : index
    %455 = tpu.strided_load %arg8[%c2_260, %c0_261] {strides = array<i32: 2, 1>} : memref<128x128xf32, #tpu.memory_space<vmem>>, vector<6x128xf32>
    %456 = arith.truncf %455 : vector<6x128xf32> to vector<6x128xbf16>
    %c2_262 = arith.constant 2 : index
    %c0_263 = arith.constant 0 : index
    %c0_264 = arith.constant 0 : index
    %457 = vector.load %arg13[%c2_262, %c0_263, %c0_264] : memref<3x128x128xbf16, #tpu.memory_space<vmem>>, vector<1x128x128xbf16>
    %458 = vector.shape_cast %457 : vector<1x128x128xbf16> to vector<128x128xbf16>
    %cst_265 = arith.constant dense<0.000000e+00> : vector<6x128xf32>
    %459 = tpu.matmul %456, %458, %cst_265 {dimension_numbers = #tpu.dot_dimension_numbers<[1], [0], [0], [1], [0, 0, 1, 1], [], []>} : vector<6x128xbf16>, vector<128x128xbf16>, vector<6x128xf32> -> vector<6x128xf32>
    %460 = arith.addf %454, %459 : vector<6x128xf32>
    %461 = vector.broadcast %442 : vector<1x128xf32> to vector<6x128xf32>
    %462 = arith.addf %460, %461 : vector<6x128xf32>
    %cst_266 = arith.constant dense<0.000000e+00> : vector<128xf32>
    %463 = vector.multi_reduction <add>, %462, %cst_266 [0] : vector<6x128xf32> to vector<128xf32>
    %464 = vector.shape_cast %463 : vector<128xf32> to vector<1x128xf32>
    %465 = arith.addf %443, %464 : vector<1x128xf32>
    %c64_267 = arith.constant 64 : index
    %c0_268 = arith.constant 0 : index
    %466 = tpu.strided_load %arg8[%c64_267, %c0_268] {strides = array<i32: 2, 1>} : memref<128x128xf32, #tpu.memory_space<vmem>>, vector<6x128xf32>
    %467 = arith.truncf %466 : vector<6x128xf32> to vector<6x128xbf16>
    %c0_269 = arith.constant 0 : index
    %c0_270 = arith.constant 0 : index
    %c0_271 = arith.constant 0 : index
    %468 = vector.load %arg13[%c0_269, %c0_270, %c0_271] : memref<3x128x128xbf16, #tpu.memory_space<vmem>>, vector<1x128x128xbf16>
    %469 = vector.shape_cast %468 : vector<1x128x128xbf16> to vector<128x128xbf16>
    %cst_272 = arith.constant dense<0.000000e+00> : vector<6x128xf32>
    %470 = tpu.matmul %467, %469, %cst_272 {dimension_numbers = #tpu.dot_dimension_numbers<[1], [0], [0], [1], [0, 0, 1, 1], [], []>} : vector<6x128xbf16>, vector<128x128xbf16>, vector<6x128xf32> -> vector<6x128xf32>
    %c65_273 = arith.constant 65 : index
    %c0_274 = arith.constant 0 : index
    %471 = tpu.strided_load %arg8[%c65_273, %c0_274] {strides = array<i32: 2, 1>} : memref<128x128xf32, #tpu.memory_space<vmem>>, vector<6x128xf32>
    %472 = arith.truncf %471 : vector<6x128xf32> to vector<6x128xbf16>
    %c1_275 = arith.constant 1 : index
    %c0_276 = arith.constant 0 : index
    %c0_277 = arith.constant 0 : index
    %473 = vector.load %arg13[%c1_275, %c0_276, %c0_277] : memref<3x128x128xbf16, #tpu.memory_space<vmem>>, vector<1x128x128xbf16>
    %474 = vector.shape_cast %473 : vector<1x128x128xbf16> to vector<128x128xbf16>
    %cst_278 = arith.constant dense<0.000000e+00> : vector<6x128xf32>
    %475 = tpu.matmul %472, %474, %cst_278 {dimension_numbers = #tpu.dot_dimension_numbers<[1], [0], [0], [1], [0, 0, 1, 1], [], []>} : vector<6x128xbf16>, vector<128x128xbf16>, vector<6x128xf32> -> vector<6x128xf32>
    %476 = arith.addf %470, %475 : vector<6x128xf32>
    %c66_279 = arith.constant 66 : index
    %c0_280 = arith.constant 0 : index
    %477 = tpu.strided_load %arg8[%c66_279, %c0_280] {strides = array<i32: 2, 1>} : memref<128x128xf32, #tpu.memory_space<vmem>>, vector<6x128xf32>
    %478 = arith.truncf %477 : vector<6x128xf32> to vector<6x128xbf16>
    %c2_281 = arith.constant 2 : index
    %c0_282 = arith.constant 0 : index
    %c0_283 = arith.constant 0 : index
    %479 = vector.load %arg13[%c2_281, %c0_282, %c0_283] : memref<3x128x128xbf16, #tpu.memory_space<vmem>>, vector<1x128x128xbf16>
    %480 = vector.shape_cast %479 : vector<1x128x128xbf16> to vector<128x128xbf16>
    %cst_284 = arith.constant dense<0.000000e+00> : vector<6x128xf32>
    %481 = tpu.matmul %478, %480, %cst_284 {dimension_numbers = #tpu.dot_dimension_numbers<[1], [0], [0], [1], [0, 0, 1, 1], [], []>} : vector<6x128xbf16>, vector<128x128xbf16>, vector<6x128xf32> -> vector<6x128xf32>
    %482 = arith.addf %476, %481 : vector<6x128xf32>
    %483 = vector.broadcast %442 : vector<1x128xf32> to vector<6x128xf32>
    %484 = arith.addf %482, %483 : vector<6x128xf32>
    %cst_285 = arith.constant dense<0.000000e+00> : vector<128xf32>
    %485 = vector.multi_reduction <add>, %484, %cst_285 [0] : vector<6x128xf32> to vector<128xf32>
    %486 = vector.shape_cast %485 : vector<128xf32> to vector<1x128xf32>
    %487 = arith.addf %465, %486 : vector<1x128xf32>
    %cst_286 = arith.constant 0.0833333358 : f32
    %488 = vector.broadcast %cst_286 : f32 to vector<1x128xf32>
    %489 = arith.mulf %487, %488 : vector<1x128xf32>
    %490 = vector.broadcast %489 : vector<1x128xf32> to vector<6x128xf32>
    %491 = arith.subf %462, %490 : vector<6x128xf32>
    %492 = vector.broadcast %489 : vector<1x128xf32> to vector<6x128xf32>
    %493 = arith.subf %484, %492 : vector<6x128xf32>
    %cst_287 = arith.constant 0.000000e+00 : f32
    %494 = vector.broadcast %cst_287 : f32 to vector<1x128xf32>
    %495 = arith.mulf %491, %491 : vector<6x128xf32>
    %cst_288 = arith.constant dense<0.000000e+00> : vector<128xf32>
    %496 = vector.multi_reduction <add>, %495, %cst_288 [0] : vector<6x128xf32> to vector<128xf32>
    %497 = vector.shape_cast %496 : vector<128xf32> to vector<1x128xf32>
    %498 = arith.addf %494, %497 : vector<1x128xf32>
    %499 = arith.mulf %493, %493 : vector<6x128xf32>
    %cst_289 = arith.constant dense<0.000000e+00> : vector<128xf32>
    %500 = vector.multi_reduction <add>, %499, %cst_289 [0] : vector<6x128xf32> to vector<128xf32>
    %501 = vector.shape_cast %500 : vector<128xf32> to vector<1x128xf32>
    %502 = arith.addf %498, %501 : vector<1x128xf32>
    %cst_290 = arith.constant 0.0833333358 : f32
    %503 = vector.broadcast %cst_290 : f32 to vector<1x128xf32>
    %504 = arith.mulf %502, %503 : vector<1x128xf32>
    %cst_291 = arith.constant 9.99999974E-6 : f32
    %505 = vector.broadcast %cst_291 : f32 to vector<1x128xf32>
    %506 = arith.addf %504, %505 : vector<1x128xf32>
    %507 = math.rsqrt %506 : vector<1x128xf32>
    %508 = vector.broadcast %507 : vector<1x128xf32> to vector<6x128xf32>
    %509 = arith.mulf %491, %508 : vector<6x128xf32>
    %cst_292 = arith.constant 5.000000e-01 : f32
    %510 = vector.broadcast %cst_292 : f32 to vector<6x128xf32>
    %511 = arith.mulf %510, %509 : vector<6x128xf32>
    %cst_293 = arith.constant 0.707106769 : f32
    %512 = vector.broadcast %cst_293 : f32 to vector<6x128xf32>
    %513 = arith.mulf %509, %512 : vector<6x128xf32>
    %cst_294 = arith.constant 0.000000e+00 : f32
    %514 = vector.broadcast %cst_294 : f32 to vector<6x128xf32>
    %515 = arith.cmpf oge, %513, %514 : vector<6x128xf32>
    %cst_295 = arith.constant 1.000000e+00 : f32
    %cst_296 = arith.constant -1.000000e+00 : f32
    %516 = vector.broadcast %cst_295 : f32 to vector<6x128xf32>
    %517 = vector.broadcast %cst_296 : f32 to vector<6x128xf32>
    %518 = arith.select %515, %516, %517 : vector<6x128xi1>, vector<6x128xf32>
    %519 = math.absf %513 : vector<6x128xf32>
    %cst_297 = arith.constant 0.327591091 : f32
    %520 = vector.broadcast %cst_297 : f32 to vector<6x128xf32>
    %521 = arith.mulf %520, %519 : vector<6x128xf32>
    %cst_298 = arith.constant 1.000000e+00 : f32
    %522 = vector.broadcast %cst_298 : f32 to vector<6x128xf32>
    %523 = arith.addf %522, %521 : vector<6x128xf32>
    %cst_299 = arith.constant 1.000000e+00 : f32
    %524 = vector.broadcast %cst_299 : f32 to vector<6x128xf32>
    %525 = arith.divf %524, %523 : vector<6x128xf32>
    %cst_300 = arith.constant 1.06140542 : f32
    %526 = vector.broadcast %cst_300 : f32 to vector<6x128xf32>
    %527 = arith.mulf %526, %525 : vector<6x128xf32>
    %cst_301 = arith.constant -1.45315206 : f32
    %528 = vector.broadcast %cst_301 : f32 to vector<6x128xf32>
    %529 = arith.addf %527, %528 : vector<6x128xf32>
    %530 = arith.mulf %529, %525 : vector<6x128xf32>
    %cst_302 = arith.constant 1.42141378 : f32
    %531 = vector.broadcast %cst_302 : f32 to vector<6x128xf32>
    %532 = arith.addf %530, %531 : vector<6x128xf32>
    %533 = arith.mulf %532, %525 : vector<6x128xf32>
    %cst_303 = arith.constant -0.284496725 : f32
    %534 = vector.broadcast %cst_303 : f32 to vector<6x128xf32>
    %535 = arith.addf %533, %534 : vector<6x128xf32>
    %536 = arith.mulf %535, %525 : vector<6x128xf32>
    %cst_304 = arith.constant 0.254829586 : f32
    %537 = vector.broadcast %cst_304 : f32 to vector<6x128xf32>
    %538 = arith.addf %536, %537 : vector<6x128xf32>
    %539 = arith.mulf %538, %525 : vector<6x128xf32>
    %cst_305 = arith.constant 0.000000e+00 : f32
    %540 = vector.broadcast %cst_305 : f32 to vector<6x128xf32>
    %541 = arith.subf %540, %519 : vector<6x128xf32>
    %542 = arith.mulf %541, %519 : vector<6x128xf32>
    %543 = math.exp %542 : vector<6x128xf32>
    %544 = arith.mulf %539, %543 : vector<6x128xf32>
    %cst_306 = arith.constant 1.000000e+00 : f32
    %545 = vector.broadcast %cst_306 : f32 to vector<6x128xf32>
    %546 = arith.subf %545, %544 : vector<6x128xf32>
    %547 = arith.mulf %518, %546 : vector<6x128xf32>
    %cst_307 = arith.constant 1.000000e+00 : f32
    %548 = vector.broadcast %cst_307 : f32 to vector<6x128xf32>
    %549 = arith.addf %548, %547 : vector<6x128xf32>
    %550 = arith.mulf %511, %549 : vector<6x128xf32>
    %c0_308 = arith.constant 0 : index
    %c0_309 = arith.constant 0 : index
    %551 = vector.load %arg9[%c0_308, %c0_309] : memref<128x128xf32, #tpu.memory_space<vmem>>, vector<6x128xf32>
    tpu.vector_store %arg9[%c0_308, %c0_309], %550 {strides = array<i32>} : memref<128x128xf32, #tpu.memory_space<vmem>>, vector<6x128xf32>,
    %552 = vector.broadcast %507 : vector<1x128xf32> to vector<6x128xf32>
    %553 = arith.mulf %493, %552 : vector<6x128xf32>
    %cst_310 = arith.constant 5.000000e-01 : f32
    %554 = vector.broadcast %cst_310 : f32 to vector<6x128xf32>
    %555 = arith.mulf %554, %553 : vector<6x128xf32>
    %cst_311 = arith.constant 0.707106769 : f32
    %556 = vector.broadcast %cst_311 : f32 to vector<6x128xf32>
    %557 = arith.mulf %553, %556 : vector<6x128xf32>
    %cst_312 = arith.constant 0.000000e+00 : f32
    %558 = vector.broadcast %cst_312 : f32 to vector<6x128xf32>
    %559 = arith.cmpf oge, %557, %558 : vector<6x128xf32>
    %cst_313 = arith.constant 1.000000e+00 : f32
    %cst_314 = arith.constant -1.000000e+00 : f32
    %560 = vector.broadcast %cst_313 : f32 to vector<6x128xf32>
    %561 = vector.broadcast %cst_314 : f32 to vector<6x128xf32>
    %562 = arith.select %559, %560, %561 : vector<6x128xi1>, vector<6x128xf32>
    %563 = math.absf %557 : vector<6x128xf32>
    %cst_315 = arith.constant 0.327591091 : f32
    %564 = vector.broadcast %cst_315 : f32 to vector<6x128xf32>
    %565 = arith.mulf %564, %563 : vector<6x128xf32>
    %cst_316 = arith.constant 1.000000e+00 : f32
    %566 = vector.broadcast %cst_316 : f32 to vector<6x128xf32>
    %567 = arith.addf %566, %565 : vector<6x128xf32>
    %cst_317 = arith.constant 1.000000e+00 : f32
    %568 = vector.broadcast %cst_317 : f32 to vector<6x128xf32>
    %569 = arith.divf %568, %567 : vector<6x128xf32>
    %cst_318 = arith.constant 1.06140542 : f32
    %570 = vector.broadcast %cst_318 : f32 to vector<6x128xf32>
    %571 = arith.mulf %570, %569 : vector<6x128xf32>
    %cst_319 = arith.constant -1.45315206 : f32
    %572 = vector.broadcast %cst_319 : f32 to vector<6x128xf32>
    %573 = arith.addf %571, %572 : vector<6x128xf32>
    %574 = arith.mulf %573, %569 : vector<6x128xf32>
    %cst_320 = arith.constant 1.42141378 : f32
    %575 = vector.broadcast %cst_320 : f32 to vector<6x128xf32>
    %576 = arith.addf %574, %575 : vector<6x128xf32>
    %577 = arith.mulf %576, %569 : vector<6x128xf32>
    %cst_321 = arith.constant -0.284496725 : f32
    %578 = vector.broadcast %cst_321 : f32 to vector<6x128xf32>
    %579 = arith.addf %577, %578 : vector<6x128xf32>
    %580 = arith.mulf %579, %569 : vector<6x128xf32>
    %cst_322 = arith.constant 0.254829586 : f32
    %581 = vector.broadcast %cst_322 : f32 to vector<6x128xf32>
    %582 = arith.addf %580, %581 : vector<6x128xf32>
    %583 = arith.mulf %582, %569 : vector<6x128xf32>
    %cst_323 = arith.constant 0.000000e+00 : f32
    %584 = vector.broadcast %cst_323 : f32 to vector<6x128xf32>
    %585 = arith.subf %584, %563 : vector<6x128xf32>
    %586 = arith.mulf %585, %563 : vector<6x128xf32>
    %587 = math.exp %586 : vector<6x128xf32>
    %588 = arith.mulf %583, %587 : vector<6x128xf32>
    %cst_324 = arith.constant 1.000000e+00 : f32
    %589 = vector.broadcast %cst_324 : f32 to vector<6x128xf32>
    %590 = arith.subf %589, %588 : vector<6x128xf32>
    %591 = arith.mulf %562, %590 : vector<6x128xf32>
    %cst_325 = arith.constant 1.000000e+00 : f32
    %592 = vector.broadcast %cst_325 : f32 to vector<6x128xf32>
    %593 = arith.addf %592, %591 : vector<6x128xf32>
    %594 = arith.mulf %555, %593 : vector<6x128xf32>
    %c64_326 = arith.constant 64 : index
    %c0_327 = arith.constant 0 : index
    %595 = vector.load %arg9[%c64_326, %c0_327] : memref<128x128xf32, #tpu.memory_space<vmem>>, vector<6x128xf32>
    tpu.vector_store %arg9[%c64_326, %c0_327], %594 {strides = array<i32>} : memref<128x128xf32, #tpu.memory_space<vmem>>, vector<6x128xf32>,
    %c4_i32_328 = arith.constant 4 : i32
    %596 = tpu.memref_slice %arg15[%c4_i32_328] : memref<5x!tpu.dma_semaphore, #tpu.memory_space<semaphore_mem>> -> memref<1x!tpu.dma_semaphore, #tpu.memory_space<semaphore_mem>>
    %597 = tpu.memref_squeeze %596 : memref<1x!tpu.dma_semaphore, #tpu.memory_space<semaphore_mem>> -> memref<!tpu.dma_semaphore, #tpu.memory_space<semaphore_mem>>
    tpu.wait_dma2 semaphore(%597 : memref<!tpu.dma_semaphore, #tpu.memory_space<semaphore_mem>>) src(%arg6 : memref<6x128x128xbf16, #tpu.memory_space<any>>) dst(%arg14 : memref<6x128x128xbf16, #tpu.memory_space<vmem>>)
    %c4_329 = arith.constant 4 : index
    %c0_330 = arith.constant 0 : index
    %598 = vector.load %arg1[%c4_329, %c0_330] : memref<8x128xf32, #tpu.memory_space<vmem>>, vector<1x128xf32>
    %cst_331 = arith.constant 0.000000e+00 : f32
    %599 = vector.broadcast %cst_331 : f32 to vector<8x128xf32>
    %c0_332 = arith.constant 0 : index
    %c0_333 = arith.constant 0 : index
    %600 = vector.load %arg7[%c0_332, %c0_333] : memref<8x128xf32, #tpu.memory_space<vmem>>, vector<8x128xf32>
    tpu.vector_store %arg7[%c0_332, %c0_333], %599 {strides = array<i32>} : memref<8x128xf32, #tpu.memory_space<vmem>>, vector<8x128xf32>,
    %c0_334 = arith.constant 0 : index
    %c0_335 = arith.constant 0 : index
    %601 = vector.load %arg9[%c0_334, %c0_335] : memref<128x128xf32, #tpu.memory_space<vmem>>, vector<1x128xf32>
    %602 = arith.truncf %601 : vector<1x128xf32> to vector<1x128xbf16>
    %c0_336 = arith.constant 0 : index
    %c0_337 = arith.constant 0 : index
    %c0_338 = arith.constant 0 : index
    %603 = vector.load %arg14[%c0_336, %c0_337, %c0_338] : memref<6x128x128xbf16, #tpu.memory_space<vmem>>, vector<1x128x128xbf16>
    %604 = vector.shape_cast %603 : vector<1x128x128xbf16> to vector<128x128xbf16>
    %cst_339 = arith.constant dense<0.000000e+00> : vector<1x128xf32>
    %605 = tpu.matmul %602, %604, %cst_339 {dimension_numbers = #tpu.dot_dimension_numbers<[1], [0], [0], [1], [0, 0, 1, 1], [], []>} : vector<1x128xbf16>, vector<128x128xbf16>, vector<1x128xf32> -> vector<1x128xf32>
    %c1_340 = arith.constant 1 : index
    %c0_341 = arith.constant 0 : index
    %606 = vector.load %arg9[%c1_340, %c0_341] : memref<128x128xf32, #tpu.memory_space<vmem>>, vector<1x128xf32>
    %607 = arith.truncf %606 : vector<1x128xf32> to vector<1x128xbf16>
    %c1_342 = arith.constant 1 : index
    %c0_343 = arith.constant 0 : index
    %c0_344 = arith.constant 0 : index
    %608 = vector.load %arg14[%c1_342, %c0_343, %c0_344] : memref<6x128x128xbf16, #tpu.memory_space<vmem>>, vector<1x128x128xbf16>
    %609 = vector.shape_cast %608 : vector<1x128x128xbf16> to vector<128x128xbf16>
    %cst_345 = arith.constant dense<0.000000e+00> : vector<1x128xf32>
    %610 = tpu.matmul %607, %609, %cst_345 {dimension_numbers = #tpu.dot_dimension_numbers<[1], [0], [0], [1], [0, 0, 1, 1], [], []>} : vector<1x128xbf16>, vector<128x128xbf16>, vector<1x128xf32> -> vector<1x128xf32>
    %611 = arith.addf %605, %610 : vector<1x128xf32>
    %c2_346 = arith.constant 2 : index
    %c0_347 = arith.constant 0 : index
    %612 = vector.load %arg9[%c2_346, %c0_347] : memref<128x128xf32, #tpu.memory_space<vmem>>, vector<1x128xf32>
    %613 = arith.truncf %612 : vector<1x128xf32> to vector<1x128xbf16>
    %c2_348 = arith.constant 2 : index
    %c0_349 = arith.constant 0 : index
    %c0_350 = arith.constant 0 : index
    %614 = vector.load %arg14[%c2_348, %c0_349, %c0_350] : memref<6x128x128xbf16, #tpu.memory_space<vmem>>, vector<1x128x128xbf16>
    %615 = vector.shape_cast %614 : vector<1x128x128xbf16> to vector<128x128xbf16>
    %cst_351 = arith.constant dense<0.000000e+00> : vector<1x128xf32>
    %616 = tpu.matmul %613, %615, %cst_351 {dimension_numbers = #tpu.dot_dimension_numbers<[1], [0], [0], [1], [0, 0, 1, 1], [], []>} : vector<1x128xbf16>, vector<128x128xbf16>, vector<1x128xf32> -> vector<1x128xf32>
    %617 = arith.addf %611, %616 : vector<1x128xf32>
    %c3_352 = arith.constant 3 : index
    %c0_353 = arith.constant 0 : index
    %618 = vector.load %arg9[%c3_352, %c0_353] : memref<128x128xf32, #tpu.memory_space<vmem>>, vector<1x128xf32>
    %619 = arith.truncf %618 : vector<1x128xf32> to vector<1x128xbf16>
    %c3_354 = arith.constant 3 : index
    %c0_355 = arith.constant 0 : index
    %c0_356 = arith.constant 0 : index
    %620 = vector.load %arg14[%c3_354, %c0_355, %c0_356] : memref<6x128x128xbf16, #tpu.memory_space<vmem>>, vector<1x128x128xbf16>
    %621 = vector.shape_cast %620 : vector<1x128x128xbf16> to vector<128x128xbf16>
    %cst_357 = arith.constant dense<0.000000e+00> : vector<1x128xf32>
    %622 = tpu.matmul %619, %621, %cst_357 {dimension_numbers = #tpu.dot_dimension_numbers<[1], [0], [0], [1], [0, 0, 1, 1], [], []>} : vector<1x128xbf16>, vector<128x128xbf16>, vector<1x128xf32> -> vector<1x128xf32>
    %623 = arith.addf %617, %622 : vector<1x128xf32>
    %c4_358 = arith.constant 4 : index
    %c0_359 = arith.constant 0 : index
    %624 = vector.load %arg9[%c4_358, %c0_359] : memref<128x128xf32, #tpu.memory_space<vmem>>, vector<1x128xf32>
    %625 = arith.truncf %624 : vector<1x128xf32> to vector<1x128xbf16>
    %c4_360 = arith.constant 4 : index
    %c0_361 = arith.constant 0 : index
    %c0_362 = arith.constant 0 : index
    %626 = vector.load %arg14[%c4_360, %c0_361, %c0_362] : memref<6x128x128xbf16, #tpu.memory_space<vmem>>, vector<1x128x128xbf16>
    %627 = vector.shape_cast %626 : vector<1x128x128xbf16> to vector<128x128xbf16>
    %cst_363 = arith.constant dense<0.000000e+00> : vector<1x128xf32>
    %628 = tpu.matmul %625, %627, %cst_363 {dimension_numbers = #tpu.dot_dimension_numbers<[1], [0], [0], [1], [0, 0, 1, 1], [], []>} : vector<1x128xbf16>, vector<128x128xbf16>, vector<1x128xf32> -> vector<1x128xf32>
    %629 = arith.addf %623, %628 : vector<1x128xf32>
    %c5 = arith.constant 5 : index
    %c0_364 = arith.constant 0 : index
    %630 = vector.load %arg9[%c5, %c0_364] : memref<128x128xf32, #tpu.memory_space<vmem>>, vector<1x128xf32>
    %631 = arith.truncf %630 : vector<1x128xf32> to vector<1x128xbf16>
    %c5_365 = arith.constant 5 : index
    %c0_366 = arith.constant 0 : index
    %c0_367 = arith.constant 0 : index
    %632 = vector.load %arg14[%c5_365, %c0_366, %c0_367] : memref<6x128x128xbf16, #tpu.memory_space<vmem>>, vector<1x128x128xbf16>
    %633 = vector.shape_cast %632 : vector<1x128x128xbf16> to vector<128x128xbf16>
    %cst_368 = arith.constant dense<0.000000e+00> : vector<1x128xf32>
    %634 = tpu.matmul %631, %633, %cst_368 {dimension_numbers = #tpu.dot_dimension_numbers<[1], [0], [0], [1], [0, 0, 1, 1], [], []>} : vector<1x128xbf16>, vector<128x128xbf16>, vector<1x128xf32> -> vector<1x128xf32>
    %635 = arith.addf %629, %634 : vector<1x128xf32>
    %636 = arith.addf %635, %598 : vector<1x128xf32>
    %c0_369 = arith.constant 0 : index
    %c0_370 = arith.constant 0 : index
    %637 = vector.load %arg7[%c0_369, %c0_370] : memref<8x128xf32, #tpu.memory_space<vmem>>, vector<1x128xf32>
    tpu.vector_store %arg7[%c0_369, %c0_370], %636 {strides = array<i32>} : memref<8x128xf32, #tpu.memory_space<vmem>>, vector<1x128xf32>,
    %c64_371 = arith.constant 64 : index
    %c0_372 = arith.constant 0 : index
    %638 = vector.load %arg9[%c64_371, %c0_372] : memref<128x128xf32, #tpu.memory_space<vmem>>, vector<1x128xf32>
    %639 = arith.truncf %638 : vector<1x128xf32> to vector<1x128xbf16>
    %c0_373 = arith.constant 0 : index
    %c0_374 = arith.constant 0 : index
    %c0_375 = arith.constant 0 : index
    %640 = vector.load %arg14[%c0_373, %c0_374, %c0_375] : memref<6x128x128xbf16, #tpu.memory_space<vmem>>, vector<1x128x128xbf16>
    %641 = vector.shape_cast %640 : vector<1x128x128xbf16> to vector<128x128xbf16>
    %cst_376 = arith.constant dense<0.000000e+00> : vector<1x128xf32>
    %642 = tpu.matmul %639, %641, %cst_376 {dimension_numbers = #tpu.dot_dimension_numbers<[1], [0], [0], [1], [0, 0, 1, 1], [], []>} : vector<1x128xbf16>, vector<128x128xbf16>, vector<1x128xf32> -> vector<1x128xf32>
    %c65_377 = arith.constant 65 : index
    %c0_378 = arith.constant 0 : index
    %643 = vector.load %arg9[%c65_377, %c0_378] : memref<128x128xf32, #tpu.memory_space<vmem>>, vector<1x128xf32>
    %644 = arith.truncf %643 : vector<1x128xf32> to vector<1x128xbf16>
    %c1_379 = arith.constant 1 : index
    %c0_380 = arith.constant 0 : index
    %c0_381 = arith.constant 0 : index
    %645 = vector.load %arg14[%c1_379, %c0_380, %c0_381] : memref<6x128x128xbf16, #tpu.memory_space<vmem>>, vector<1x128x128xbf16>
    %646 = vector.shape_cast %645 : vector<1x128x128xbf16> to vector<128x128xbf16>
    %cst_382 = arith.constant dense<0.000000e+00> : vector<1x128xf32>
    %647 = tpu.matmul %644, %646, %cst_382 {dimension_numbers = #tpu.dot_dimension_numbers<[1], [0], [0], [1], [0, 0, 1, 1], [], []>} : vector<1x128xbf16>, vector<128x128xbf16>, vector<1x128xf32> -> vector<1x128xf32>
    %648 = arith.addf %642, %647 : vector<1x128xf32>
    %c66_383 = arith.constant 66 : index
    %c0_384 = arith.constant 0 : index
    %649 = vector.load %arg9[%c66_383, %c0_384] : memref<128x128xf32, #tpu.memory_space<vmem>>, vector<1x128xf32>
    %650 = arith.truncf %649 : vector<1x128xf32> to vector<1x128xbf16>
    %c2_385 = arith.constant 2 : index
    %c0_386 = arith.constant 0 : index
    %c0_387 = arith.constant 0 : index
    %651 = vector.load %arg14[%c2_385, %c0_386, %c0_387] : memref<6x128x128xbf16, #tpu.memory_space<vmem>>, vector<1x128x128xbf16>
    %652 = vector.shape_cast %651 : vector<1x128x128xbf16> to vector<128x128xbf16>
    %cst_388 = arith.constant dense<0.000000e+00> : vector<1x128xf32>
    %653 = tpu.matmul %650, %652, %cst_388 {dimension_numbers = #tpu.dot_dimension_numbers<[1], [0], [0], [1], [0, 0, 1, 1], [], []>} : vector<1x128xbf16>, vector<128x128xbf16>, vector<1x128xf32> -> vector<1x128xf32>
    %654 = arith.addf %648, %653 : vector<1x128xf32>
    %c67 = arith.constant 67 : index
    %c0_389 = arith.constant 0 : index
    %655 = vector.load %arg9[%c67, %c0_389] : memref<128x128xf32, #tpu.memory_space<vmem>>, vector<1x128xf32>
    %656 = arith.truncf %655 : vector<1x128xf32> to vector<1x128xbf16>
    %c3_390 = arith.constant 3 : index
    %c0_391 = arith.constant 0 : index
    %c0_392 = arith.constant 0 : index
    %657 = vector.load %arg14[%c3_390, %c0_391, %c0_392] : memref<6x128x128xbf16, #tpu.memory_space<vmem>>, vector<1x128x128xbf16>
    %658 = vector.shape_cast %657 : vector<1x128x128xbf16> to vector<128x128xbf16>
    %cst_393 = arith.constant dense<0.000000e+00> : vector<1x128xf32>
    %659 = tpu.matmul %656, %658, %cst_393 {dimension_numbers = #tpu.dot_dimension_numbers<[1], [0], [0], [1], [0, 0, 1, 1], [], []>} : vector<1x128xbf16>, vector<128x128xbf16>, vector<1x128xf32> -> vector<1x128xf32>
    %660 = arith.addf %654, %659 : vector<1x128xf32>
    %c68 = arith.constant 68 : index
    %c0_394 = arith.constant 0 : index
    %661 = vector.load %arg9[%c68, %c0_394] : memref<128x128xf32, #tpu.memory_space<vmem>>, vector<1x128xf32>
    %662 = arith.truncf %661 : vector<1x128xf32> to vector<1x128xbf16>
    %c4_395 = arith.constant 4 : index
    %c0_396 = arith.constant 0 : index
    %c0_397 = arith.constant 0 : index
    %663 = vector.load %arg14[%c4_395, %c0_396, %c0_397] : memref<6x128x128xbf16, #tpu.memory_space<vmem>>, vector<1x128x128xbf16>
    %664 = vector.shape_cast %663 : vector<1x128x128xbf16> to vector<128x128xbf16>
    %cst_398 = arith.constant dense<0.000000e+00> : vector<1x128xf32>
    %665 = tpu.matmul %662, %664, %cst_398 {dimension_numbers = #tpu.dot_dimension_numbers<[1], [0], [0], [1], [0, 0, 1, 1], [], []>} : vector<1x128xbf16>, vector<128x128xbf16>, vector<1x128xf32> -> vector<1x128xf32>
    %666 = arith.addf %660, %665 : vector<1x128xf32>
    %c69 = arith.constant 69 : index
    %c0_399 = arith.constant 0 : index
    %667 = vector.load %arg9[%c69, %c0_399] : memref<128x128xf32, #tpu.memory_space<vmem>>, vector<1x128xf32>
    %668 = arith.truncf %667 : vector<1x128xf32> to vector<1x128xbf16>
    %c5_400 = arith.constant 5 : index
    %c0_401 = arith.constant 0 : index
    %c0_402 = arith.constant 0 : index
    %669 = vector.load %arg14[%c5_400, %c0_401, %c0_402] : memref<6x128x128xbf16, #tpu.memory_space<vmem>>, vector<1x128x128xbf16>
    %670 = vector.shape_cast %669 : vector<1x128x128xbf16> to vector<128x128xbf16>
    %cst_403 = arith.constant dense<0.000000e+00> : vector<1x128xf32>
    %671 = tpu.matmul %668, %670, %cst_403 {dimension_numbers = #tpu.dot_dimension_numbers<[1], [0], [0], [1], [0, 0, 1, 1], [], []>} : vector<1x128xbf16>, vector<128x128xbf16>, vector<1x128xf32> -> vector<1x128xf32>
    %672 = arith.addf %666, %671 : vector<1x128xf32>
    %673 = arith.addf %672, %598 : vector<1x128xf32>
    %c1_404 = arith.constant 1 : index
    %c0_405 = arith.constant 0 : index
    %674 = vector.load %arg7[%c1_404, %c0_405] : memref<8x128xf32, #tpu.memory_space<vmem>>, vector<1x128xf32>
    tpu.vector_store %arg7[%c1_404, %c0_405], %673 {strides = array<i32>} : memref<8x128xf32, #tpu.memory_space<vmem>>, vector<1x128xf32>,
    return
  }
}

</mosaic_0001>

<bundles_post_ra>
// kernel: convnet_forward.1
= control target key start
LH: loop header
LB: loop body
LE: loop exit
PB: predicated region body
PF: predicated region fallthrough
CT: control target
= control target key end

     0   :  { %s9399_s0 = inlined_call_operand.vmem [shape: f32[256,128], index: 0, kind: input, shape index: {}]   ;;  %s9400_s1 = inlined_call_operand.vmem [shape: f32[8,128], index: 1, kind: input, shape index: {}]   ;;  %s9401_s2 = inlined_call_operand.vmem [shape: bf16[5,128,128], index: 2, kind: input, shape index: {}]   ;;  %s9402_s3 = inlined_call_operand.hbm [shape: bf16[3,128,128], index: 3, kind: input, shape index: {}]   ;;  %s9403_s4 = inlined_call_operand.hbm [shape: bf16[3,128,128], index: 4, kind: input, shape index: {}]   ;;  %s9404_s5 = inlined_call_operand.hbm [shape: bf16[3,128,128], index: 5, kind: input, shape index: {}]   ;;  %s9405_s6 = inlined_call_operand.vmem [shape: bf16[6,128,128], index: 6, kind: input, shape index: {}]   ;;  %s9406_s7 = inlined_call_operand.vmem [shape: f32[8,128], index: 7, kind: output, shape index: {}]  }
   0x1   :  { %v50_v0 = vld [vmem:[%s9401_s2] sm:$0xff]  ;;  %v52_v1 = vld [vmem:[%s9401_s2 + $0x8] sm:$0xff]  ;;  %v54_v2 = vld [vmem:[%s9401_s2 + $0x10] sm:$0xff] }
   0x2   :  { %51 = vst [vmem:[#allocation4] sm:$0xff] %v50_v0  ;;  %53 = vst [vmem:[#allocation4 + $0x8] sm:$0xff] %v52_v1  ;;  %v56_v3 = vld [vmem:[%s9401_s2 + $0x18] sm:$0xff]  ;;  %v58_v4 = vld [vmem:[%s9401_s2 + $0x20] sm:$0xff] }
   0x3   :  { %55 = vst [vmem:[#allocation4 + $0x10] sm:$0xff] %v54_v2  ;;  %v60_v5 = vld [vmem:[%s9401_s2 + $0x28] sm:$0xff]  ;;  %57 = vst [vmem:[#allocation4 + $0x18] sm:$0xff] %v56_v3  ;;  %v62_v6 = vld [vmem:[%s9401_s2 + $0x30] sm:$0xff] }
   0x4   :  { %59 = vst [vmem:[#allocation4 + $0x20] sm:$0xff] %v58_v4  ;;  %61 = vst [vmem:[#allocation4 + $0x28] sm:$0xff] %v60_v5  ;;  %v64_v7 = vld [vmem:[%s9401_s2 + $0x38] sm:$0xff]  ;;  %v66_v8 = vld [vmem:[%s9401_s2 + $0x40] sm:$0xff] }
   0x5   :  { %63 = vst [vmem:[#allocation4 + $0x30] sm:$0xff] %v62_v6  ;;  %65 = vst [vmem:[#allocation4 + $0x38] sm:$0xff] %v64_v7  ;;  %v68_v9 = vld [vmem:[%s9401_s2 + $0x48] sm:$0xff]  ;;  %v70_v10 = vld [vmem:[%s9401_s2 + $0x50] sm:$0xff] }
   0x6   :  { %67 = vst [vmem:[#allocation4 + $0x40] sm:$0xff] %v66_v8  ;;  %v72_v11 = vld [vmem:[%s9401_s2 + $0x58] sm:$0xff]  ;;  %69 = vst [vmem:[#allocation4 + $0x48] sm:$0xff] %v68_v9  ;;  %v74_v12 = vld [vmem:[%s9401_s2 + $0x60] sm:$0xff] }
   0x7   :  { %71 = vst [vmem:[#allocation4 + $0x50] sm:$0xff] %v70_v10  ;;  %73 = vst [vmem:[#allocation4 + $0x58] sm:$0xff] %v72_v11  ;;  %v76_v13 = vld [vmem:[%s9401_s2 + $0x68] sm:$0xff]  ;;  %v78_v14 = vld [vmem:[%s9401_s2 + $0x70] sm:$0xff] }
   0x8   :  { %75 = vst [vmem:[#allocation4 + $0x60] sm:$0xff] %v74_v12  ;;  %77 = vst [vmem:[#allocation4 + $0x68] sm:$0xff] %v76_v13  ;;  %v80_v15 = vld [vmem:[%s9401_s2 + $0x78] sm:$0xff]  ;;  %v82_v16 = vld [vmem:[%s9401_s2 + $0x80] sm:$0xff] }
   0x9   :  { %79 = vst [vmem:[#allocation4 + $0x70] sm:$0xff] %v78_v14  ;;  %v84_v17 = vld [vmem:[%s9401_s2 + $0x88] sm:$0xff]  ;;  %81 = vst [vmem:[#allocation4 + $0x78] sm:$0xff] %v80_v15  ;;  %v86_v18 = vld [vmem:[%s9401_s2 + $0x90] sm:$0xff] }
   0xa   :  { %83 = vst [vmem:[#allocation4 + $0x80] sm:$0xff] %v82_v16  ;;  %85 = vst [vmem:[#allocation4 + $0x88] sm:$0xff] %v84_v17  ;;  %v88_v19 = vld [vmem:[%s9401_s2 + $0x98] sm:$0xff]  ;;  %v90_v20 = vld [vmem:[%s9401_s2 + $0xa0] sm:$0xff] }
   0xb   :  { %87 = vst [vmem:[#allocation4 + $0x90] sm:$0xff] %v86_v18  ;;  %89 = vst [vmem:[#allocation4 + $0x98] sm:$0xff] %v88_v19  ;;  %v92_v21 = vld [vmem:[%s9401_s2 + $0xa8] sm:$0xff]  ;;  %v94_v22 = vld [vmem:[%s9401_s2 + $0xb0] sm:$0xff] }
   0xc   :  { %91 = vst [vmem:[#allocation4 + $0xa0] sm:$0xff] %v90_v20  ;;  %v96_v23 = vld [vmem:[%s9401_s2 + $0xb8] sm:$0xff]  ;;  %93 = vst [vmem:[#allocation4 + $0xa8] sm:$0xff] %v92_v21  ;;  %v98_v24 = vld [vmem:[%s9401_s2 + $0xc0] sm:$0xff] }
   0xd   :  { %95 = vst [vmem:[#allocation4 + $0xb0] sm:$0xff] %v94_v22  ;;  %97 = vst [vmem:[#allocation4 + $0xb8] sm:$0xff] %v96_v23  ;;  %v100_v25 = vld [vmem:[%s9401_s2 + $0xc8] sm:$0xff]  ;;  %v102_v26 = vld [vmem:[%s9401_s2 + $0xd0] sm:$0xff] }
   0xe   :  { %99 = vst [vmem:[#allocation4 + $0xc0] sm:$0xff] %v98_v24  ;;  %101 = vst [vmem:[#allocation4 + $0xc8] sm:$0xff] %v100_v25  ;;  %v104_v27 = vld [vmem:[%s9401_s2 + $0xd8] sm:$0xff]  ;;  %v106_v28 = vld [vmem:[%s9401_s2 + $0xe0] sm:$0xff] }
   0xf   :  { %103 = vst [vmem:[#allocation4 + $0xd0] sm:$0xff] %v102_v26  ;;  %v108_v29 = vld [vmem:[%s9401_s2 + $0xe8] sm:$0xff]  ;;  %105 = vst [vmem:[#allocation4 + $0xd8] sm:$0xff] %v104_v27  ;;  %v110_v30 = vld [vmem:[%s9401_s2 + $0xf0] sm:$0xff] }
  0x10   :  { %107 = vst [vmem:[#allocation4 + $0xe0] sm:$0xff] %v106_v28  ;;  %109 = vst [vmem:[#allocation4 + $0xe8] sm:$0xff] %v108_v29  ;;  %v112_v31 = vld [vmem:[%s9401_s2 + $0xf8] sm:$0xff]  ;;  %v114_v32 = vld [vmem:[%s9401_s2 + $0x100] sm:$0xff] }
  0x11   :  { %111 = vst [vmem:[#allocation4 + $0xf0] sm:$0xff] %v110_v30  ;;  %113 = vst [vmem:[#allocation4 + $0xf8] sm:$0xff] %v112_v31  ;;  %v116_v33 = vld [vmem:[%s9401_s2 + $0x108] sm:$0xff]  ;;  %v118_v34 = vld [vmem:[%s9401_s2 + $0x110] sm:$0xff] }
  0x12   :  { %115 = vst [vmem:[#allocation4 + $0x100] sm:$0xff] %v114_v32  ;;  %v120_v35 = vld [vmem:[%s9401_s2 + $0x118] sm:$0xff]  ;;  %117 = vst [vmem:[#allocation4 + $0x108] sm:$0xff] %v116_v33  ;;  %v122_v36 = vld [vmem:[%s9401_s2 + $0x120] sm:$0xff] }
  0x13   :  { %119 = vst [vmem:[#allocation4 + $0x110] sm:$0xff] %v118_v34  ;;  %121 = vst [vmem:[#allocation4 + $0x118] sm:$0xff] %v120_v35  ;;  %v124_v37 = vld [vmem:[%s9401_s2 + $0x128] sm:$0xff]  ;;  %v126_v38 = vld [vmem:[%s9401_s2 + $0x130] sm:$0xff] }
  0x14   :  { %123 = vst [vmem:[#allocation4 + $0x120] sm:$0xff] %v122_v36  ;;  %125 = vst [vmem:[#allocation4 + $0x128] sm:$0xff] %v124_v37  ;;  %v128_v39 = vld [vmem:[%s9401_s2 + $0x138] sm:$0xff] }
  0x15   :  { %127 = vst [vmem:[#allocation4 + $0x130] sm:$0xff] %v126_v38  ;;  %129 = vst [vmem:[#allocation4 + $0x138] sm:$0xff] %v128_v39 }
  0x16   :  { %137 = vsyncadd [#allocation9], 5120  ;;  %v208_v40 = vld [vmem:[%s9405_s6] sm:$0xff]  ;;  %v210_v41 = vld [vmem:[%s9405_s6 + $0x8] sm:$0xff]  ;;  %s7939_s16 = smov [#allocation5]   ;;  %s7940_s18 = smov [#allocation6]  }
  0x17   :  { %s146_s17 = sshll.u32 %s7939_s16, 4  ;;  %s158_s19 = sshll.u32 %s7940_s18, 4  ;;  %209 = vst [vmem:[#allocation8] sm:$0xff] %v208_v40  ;;  %211 = vst [vmem:[#allocation8 + $0x8] sm:$0xff] %v210_v41  ;;  %v212_v42 = vld [vmem:[%s9405_s6 + $0x10] sm:$0xff]  ;;  %v214_v43 = vld [vmem:[%s9405_s6 + $0x18] sm:$0xff]  ;;  %s147_s17 = int_to_ptr.vmem [resolvable:$true] %s146_s17  ;;  %s159_s19 = int_to_ptr.vmem [resolvable:$true] %s158_s19 }
  0x18   :  { %v216_v44 = vld [vmem:[%s9405_s6 + $0x20] sm:$0xff]  ;;  %213 = vst [vmem:[#allocation8 + $0x10] sm:$0xff] %v212_v42  ;;  %215 = vst [vmem:[#allocation8 + $0x18] sm:$0xff] %v214_v43  ;;  %v218_v45 = vld [vmem:[%s9405_s6 + $0x28] sm:$0xff]  ;;  %s7877_s8 = scalar_lea.vmem %s147_s17, 3072  ;;  %p7882_p1 = scmp.lt.s32.totalorder %s147_s17, %s147_s17 }
  0x19   :  { %217 = vst [vmem:[#allocation8 + $0x20] sm:$0xff] %v216_v44  ;;  %v220_v46 = vld [vmem:[%s9405_s6 + $0x30] sm:$0xff]  ;;  %v222_v47 = vld [vmem:[%s9405_s6 + $0x38] sm:$0xff]  ;;  %p7878_p0 = scmp.ne.s32.totalorder %s147_s17, %s7877_s8  ;;  %p7883_p2 = scmp.lt.s32.totalorder %s7877_s8, %s7877_s8 }
  0x1b   :  { %p7884_p3 = por %p7883_p2, %p7882_p1 }
  0x1d   :  { %p7885_p4 = pnand %p7884_p3, %p7878_p0 }
  0x1f   :  { %7888 = shalt.err (!%p7885_p4)  }
  0x20   :  { %149 = dma.hbm_to_vmem [thread:$0]  %s9402_s3, 3072, %s147_s17, [#allocation9 + $0x1]  ;;  %219 = vst [vmem:[#allocation8 + $0x28] sm:$0xff] %v218_v45  ;;  %221 = vst [vmem:[#allocation8 + $0x30] sm:$0xff] %v220_v46  ;;  %v224_v48 = vld [vmem:[%s9405_s6 + $0x40] sm:$0xff]  ;;  %v226_v49 = vld [vmem:[%s9405_s6 + $0x48] sm:$0xff] }
  0x21   :  { %223 = vst [vmem:[#allocation8 + $0x38] sm:$0xff] %v222_v47  ;;  %v228_v50 = vld [vmem:[%s9405_s6 + $0x50] sm:$0xff]  ;;  %s7897_s18 = scalar_lea.vmem %s159_s19, 3072  ;;  %p7902_p6 = scmp.lt.s32.totalorder %s159_s19, %s159_s19 }
  0x22   :  { %p7898_p5 = scmp.ne.s32.totalorder %s159_s19, %s7897_s18  ;;  %p7903_p7 = scmp.lt.s32.totalorder %s7897_s18, %s7897_s18 }
  0x24   :  { %p7904_p8 = por %p7903_p7, %p7902_p6 }
  0x26   :  { %p7905_p9 = pnand %p7904_p8, %p7898_p5 }
  0x28   :  { %7908 = shalt.err (!%p7905_p9)  }
  0x29   :  { %161 = dma.hbm_to_vmem [thread:$0]  %s9403_s4, 3072, %s159_s19, [#allocation9 + $0x2]  ;;  %225 = vst [vmem:[#allocation8 + $0x40] sm:$0xff] %v224_v48  ;;  %227 = vst [vmem:[#allocation8 + $0x48] sm:$0xff] %v226_v49  ;;  %v230_v51 = vld [vmem:[%s9405_s6 + $0x58] sm:$0xff]  ;;  %v232_v52 = vld [vmem:[%s9405_s6 + $0x60] sm:$0xff] }
  0x2a   :  { %229 = vst [vmem:[#allocation8 + $0x50] sm:$0xff] %v228_v50  ;;  %v234_v53 = vld [vmem:[%s9405_s6 + $0x68] sm:$0xff]  ;;  %231 = vst [vmem:[#allocation8 + $0x58] sm:$0xff] %v230_v51  ;;  %v236_v54 = vld [vmem:[%s9405_s6 + $0x70] sm:$0xff]  ;;  %s7941_s29 = smov [#allocation7]  }
  0x2b   :  { %233 = vst [vmem:[#allocation8 + $0x60] sm:$0xff] %v232_v52  ;;  %235 = vst [vmem:[#allocation8 + $0x68] sm:$0xff] %v234_v53  ;;  %v238_v55 = vld [vmem:[%s9405_s6 + $0x78] sm:$0xff]  ;;  %v240_v56 = vld [vmem:[%s9405_s6 + $0x80] sm:$0xff]  ;;  %s170_s30 = sshll.u32 %s7941_s29, 4  ;;  %s171_s30 = int_to_ptr.vmem [resolvable:$true] %s170_s30 }
  0x2c   :  { %237 = vst [vmem:[#allocation8 + $0x70] sm:$0xff] %v236_v54  ;;  %239 = vst [vmem:[#allocation8 + $0x78] sm:$0xff] %v238_v55  ;;  %v242_v57 = vld [vmem:[%s9405_s6 + $0x88] sm:$0xff]  ;;  %v244_v58 = vld [vmem:[%s9405_s6 + $0x90] sm:$0xff]  ;;  %s7917_s20 = scalar_lea.vmem %s171_s30, 3072  ;;  %p7922_p11 = scmp.lt.s32.totalorder %s171_s30, %s171_s30 }
  0x2d   :  { %241 = vst [vmem:[#allocation8 + $0x80] sm:$0xff] %v240_v56  ;;  %v246_v59 = vld [vmem:[%s9405_s6 + $0x98] sm:$0xff]  ;;  %243 = vst [vmem:[#allocation8 + $0x88] sm:$0xff] %v242_v57  ;;  %v248_v60 = vld [vmem:[%s9405_s6 + $0xa0] sm:$0xff]  ;;  %p7918_p10 = scmp.ne.s32.totalorder %s171_s30, %s7917_s20  ;;  %p7923_p12 = scmp.lt.s32.totalorder %s7917_s20, %s7917_s20 }
  0x2e   :  { %245 = vst [vmem:[#allocation8 + $0x90] sm:$0xff] %v244_v58  ;;  %247 = vst [vmem:[#allocation8 + $0x98] sm:$0xff] %v246_v59  ;;  %v250_v61 = vld [vmem:[%s9405_s6 + $0xa8] sm:$0xff]  ;;  %v252_v62 = vld [vmem:[%s9405_s6 + $0xb0] sm:$0xff] }
  0x2f   :  { %p7924_p13 = por %p7923_p12, %p7922_p11 }
  0x31   :  { %p7925_p0 = pnand %p7924_p13, %p7918_p10 }
  0x33   :  { %7928 = shalt.err (!%p7925_p0)  }
  0x34   :  { %173 = dma.hbm_to_vmem [thread:$0]  %s9404_s5, 3072, %s171_s30, [#allocation9 + $0x3]  ;;  %249 = vst [vmem:[#allocation8 + $0xa0] sm:$0xff] %v248_v60  ;;  %251 = vst [vmem:[#allocation8 + $0xa8] sm:$0xff] %v250_v61  ;;  %v254_v63 = vld [vmem:[%s9405_s6 + $0xb8] sm:$0xff]  ;;  %v256_v0 = vld [vmem:[%s9405_s6 + $0xc0] sm:$0xff] }
  0x35   :  { %253 = vst [vmem:[#allocation8 + $0xb0] sm:$0xff] %v252_v62  ;;  %v258_v1 = vld [vmem:[%s9405_s6 + $0xc8] sm:$0xff]  ;;  %255 = vst [vmem:[#allocation8 + $0xb8] sm:$0xff] %v254_v63  ;;  %v260_v2 = vld [vmem:[%s9405_s6 + $0xd0] sm:$0xff] }
  0x36   :  { %257 = vst [vmem:[#allocation8 + $0xc0] sm:$0xff] %v256_v0  ;;  %259 = vst [vmem:[#allocation8 + $0xc8] sm:$0xff] %v258_v1  ;;  %v262_v3 = vld [vmem:[%s9405_s6 + $0xd8] sm:$0xff]  ;;  %v264_v4 = vld [vmem:[%s9405_s6 + $0xe0] sm:$0xff] }
  0x37   :  { %261 = vst [vmem:[#allocation8 + $0xd0] sm:$0xff] %v260_v2  ;;  %263 = vst [vmem:[#allocation8 + $0xd8] sm:$0xff] %v262_v3  ;;  %v266_v5 = vld [vmem:[%s9405_s6 + $0xe8] sm:$0xff]  ;;  %v268_v6 = vld [vmem:[%s9405_s6 + $0xf0] sm:$0xff] }
  0x38   :  { %265 = vst [vmem:[#allocation8 + $0xe0] sm:$0xff] %v264_v4  ;;  %v270_v7 = vld [vmem:[%s9405_s6 + $0xf8] sm:$0xff]  ;;  %267 = vst [vmem:[#allocation8 + $0xe8] sm:$0xff] %v266_v5  ;;  %v272_v8 = vld [vmem:[%s9405_s6 + $0x100] sm:$0xff] }
  0x39   :  { %269 = vst [vmem:[#allocation8 + $0xf0] sm:$0xff] %v268_v6  ;;  %271 = vst [vmem:[#allocation8 + $0xf8] sm:$0xff] %v270_v7  ;;  %v274_v9 = vld [vmem:[%s9405_s6 + $0x108] sm:$0xff]  ;;  %v276_v10 = vld [vmem:[%s9405_s6 + $0x110] sm:$0xff] }
  0x3a   :  { %273 = vst [vmem:[#allocation8 + $0x100] sm:$0xff] %v272_v8  ;;  %275 = vst [vmem:[#allocation8 + $0x108] sm:$0xff] %v274_v9  ;;  %v278_v11 = vld [vmem:[%s9405_s6 + $0x118] sm:$0xff]  ;;  %v280_v12 = vld [vmem:[%s9405_s6 + $0x120] sm:$0xff] }
  0x3b   :  { %277 = vst [vmem:[#allocation8 + $0x110] sm:$0xff] %v276_v10  ;;  %v282_v13 = vld [vmem:[%s9405_s6 + $0x128] sm:$0xff]  ;;  %279 = vst [vmem:[#allocation8 + $0x118] sm:$0xff] %v278_v11  ;;  %v284_v14 = vld [vmem:[%s9405_s6 + $0x130] sm:$0xff] }
  0x3c   :  { %281 = vst [vmem:[#allocation8 + $0x120] sm:$0xff] %v280_v12  ;;  %283 = vst [vmem:[#allocation8 + $0x128] sm:$0xff] %v282_v13  ;;  %v286_v15 = vld [vmem:[%s9405_s6 + $0x138] sm:$0xff]  ;;  %v288_v16 = vld [vmem:[%s9405_s6 + $0x140] sm:$0xff] }
  0x3d   :  { %285 = vst [vmem:[#allocation8 + $0x130] sm:$0xff] %v284_v14  ;;  %287 = vst [vmem:[#allocation8 + $0x138] sm:$0xff] %v286_v15  ;;  %v290_v17 = vld [vmem:[%s9405_s6 + $0x148] sm:$0xff]  ;;  %v292_v18 = vld [vmem:[%s9405_s6 + $0x150] sm:$0xff] }
  0x3e   :  { %289 = vst [vmem:[#allocation8 + $0x140] sm:$0xff] %v288_v16  ;;  %v294_v19 = vld [vmem:[%s9405_s6 + $0x158] sm:$0xff]  ;;  %291 = vst [vmem:[#allocation8 + $0x148] sm:$0xff] %v290_v17  ;;  %v296_v20 = vld [vmem:[%s9405_s6 + $0x160] sm:$0xff] }
  0x3f   :  { %293 = vst [vmem:[#allocation8 + $0x150] sm:$0xff] %v292_v18  ;;  %295 = vst [vmem:[#allocation8 + $0x158] sm:$0xff] %v294_v19  ;;  %v298_v21 = vld [vmem:[%s9405_s6 + $0x168] sm:$0xff]  ;;  %v300_v22 = vld [vmem:[%s9405_s6 + $0x170] sm:$0xff] }
  0x40   :  { %297 = vst [vmem:[#allocation8 + $0x160] sm:$0xff] %v296_v20  ;;  %299 = vst [vmem:[#allocation8 + $0x168] sm:$0xff] %v298_v21  ;;  %v302_v23 = vld [vmem:[%s9405_s6 + $0x178] sm:$0xff] }
  0x41   :  { %301 = vst [vmem:[#allocation8 + $0x170] sm:$0xff] %v300_v22  ;;  %303 = vst [vmem:[#allocation8 + $0x178] sm:$0xff] %v302_v23 }
  0x42   :  { %311 = vsyncadd [#allocation9 + $0x4], 6144 }
  0x43   :  { %7929 = dma.done.wait [#allocation9], 5120 }
  0x44   :  { %7930 = vsyncadd [#allocation9], 4294962176  ;;  %v7472_v24 = vld [vmem:[#allocation4 + $0x78] sm:$0xff]   ;;  %v7474_v26 = vld [vmem:[#allocation4 + $0x70] sm:$0xff]  }
  0x45   :  { %v7473_v25 = vld [vmem:[#allocation4 + $0x38] sm:$0xff]   ;;  %6626 = vmatprep.subr.bf16.mxu0 %v7472_v24  ;;  %v7475_v27 = vld [vmem:[#allocation4 + $0x30] sm:$0xff]   ;;  %v7476_v28 = vld [vmem:[#allocation4 + $0x68] sm:$0xff]  }
  0x46   :  { %6650 = vmatprep.subr.bf16.mxu1 %v7473_v25  ;;  %6627 = vmatpush3.bf16.msra.mxu0 %v7472_v24  ;;  %v7477_v29 = vld [vmem:[#allocation4 + $0x28] sm:$0xff]   ;;  %v7478_v30 = vld [vmem:[#allocation4 + $0x60] sm:$0xff]   ;;  %v7480_v32 = vld [vmem:[#allocation4 + $0x58] sm:$0xff]  }
  0x47   :  { %6651 = vmatpush3.bf16.msra.mxu1 %v7473_v25  ;;  %6628 = vmatprep.subr.bf16.mxu0 %v7474_v26  ;;  %v7479_v31 = vld [vmem:[#allocation4 + $0x20] sm:$0xff]   ;;  %v7481_v33 = vld [vmem:[#allocation4 + $0x18] sm:$0xff]   ;;  %v7482_v34 = vld [vmem:[#allocation4 + $0x50] sm:$0xff]  }
  0x48   :  { %6652 = vmatprep.subr.bf16.mxu1 %v7475_v27  ;;  %v5877_v35 = vld [vmem:[%s9399_s0 + $0x1] ss:$2 sm:$0xff]  ;;  %v5878_v36 = vld [vmem:[%s9399_s0 + $0x11] ss:$2 sm:$0xff]  ;;  %v318_v37 = vld [vmem:[%s9399_s0] ss:$2 sm:$0xff] }
  0x49   :  { %v7483_v38 = vld [vmem:[#allocation4 + $0x10] sm:$0xff]   ;;  %v369_v39 = vpack.c.bf16 %v5878_v36, %v5877_v35  ;;  %v7484_v42 = vld [vmem:[#allocation4 + $0x48] sm:$0xff]   ;;  %v7486_v44 = vld [vmem:[#allocation4 + $0x40] sm:$0xff]  }
  0x4a   :  { %6629 = vmatpush3.bf16.msra.mxu0 %v7474_v26  ;;  %v5870_v40 = vld [vmem:[%s9399_s0 + $0x10] ss:$2 sm:$0xff]  ;;  %v7485_v43 = vld [vmem:[#allocation4 + $0x8] sm:$0xff]   ;;  %v7487_v45 = vld [vmem:[#allocation4] sm:$0xff]  }
  0x4b   :  { %6653 = vmatpush3.bf16.msra.mxu1 %v7475_v27  ;;  %6630 = vmatprep.subr.bf16.mxu0 %v7476_v28  ;;  %v333_v41 = vpack.c.bf16 %v5870_v40, %v318_v37  ;;  %v5879_v46 = vld [vmem:[%s9399_s0 + $0x21] ss:$2 sm:$0xff]  ;;  %v5880_v47 = vld [vmem:[%s9399_s0 + $0x31] ss:$2 sm:$0xff]  ;;  %v5871_v48 = vld [vmem:[%s9399_s0 + $0x20] ss:$2 sm:$0xff] }
  0x4c   :  { %6654 = vmatprep.subr.bf16.mxu1 %v7477_v29  ;;  %6642 = vmatprep.mubr.bf16.mxu0 %v369_v39  ;;  %v5872_v49 = vld [vmem:[%s9399_s0 + $0x30] ss:$2 sm:$0xff]  ;;  %v370_v52 = vpack.c.bf16 %v5880_v47, %v5879_v46  ;;  %v5881_v54 = vld [vmem:[%s9399_s0 + $0x41] ss:$2 sm:$0xff]  ;;  %v5882_v55 = vld [vmem:[%s9399_s0 + $0x51] ss:$2 sm:$0xff] }
  0x4d   :  { %6666 = vmatprep.mubr.bf16.mxu1 %v333_v41  ;;  %v7488_v50 = vld [vmem:[#allocation4 + $0xb8] sm:$0xff]   ;;  %v7490_v53 = vld [vmem:[#allocation4 + $0xb0] sm:$0xff]   ;;  %v334_v56 = vpack.c.bf16 %v5872_v49, %v5871_v48  ;;  %v5873_v58 = vld [vmem:[%s9399_s0 + $0x40] ss:$2 sm:$0xff]  ;;  %v371_v60 = vpack.c.bf16 %v5882_v55, %v5881_v54 }
  0x4e   :  { %6631 = vmatpush3.bf16.msra.mxu0 %v7476_v28  ;;  %v7489_v51 = vld [vmem:[#allocation4 + $0xf8] sm:$0xff]   ;;  %v7491_v57 = vld [vmem:[#allocation4 + $0xf0] sm:$0xff]   ;;  %v7492_v62 = vld [vmem:[#allocation4 + $0xa8] sm:$0xff]  }
  0x4f   :  { %6655 = vmatpush3.bf16.msra.mxu1 %v7477_v29  ;;  %6632 = vmatprep.subr.bf16.mxu0 %v7478_v30  ;;  %v5874_v59 = vld [vmem:[%s9399_s0 + $0x50] ss:$2 sm:$0xff]  ;;  %v5884_v61 = vld [vmem:[%s9399_s0 + $0x71] ss:$2 sm:$0x3f]  ;;  %v7493_v3 = vld [vmem:[#allocation4 + $0xe8] sm:$0xff]  }
  0x50   :  { %6656 = vmatprep.subr.bf16.mxu1 %v7479_v31  ;;  %v335_v63 = vpack.c.bf16 %v5874_v59, %v5873_v58  ;;  %v5876_v0 = vld [vmem:[%s9399_s0 + $0x70] ss:$2 sm:$0x3f]  ;;  %v5883_v1 = vld [vmem:[%s9399_s0 + $0x61] ss:$2 sm:$0xff] }
  0x51   :  { %v5875_v2 = vld [vmem:[%s9399_s0 + $0x60] ss:$2 sm:$0xff]  ;;  %v372_v4 = vpack.c.bf16 %v5884_v61, %v5883_v1  ;;  %v5917_v8 = vld [vmem:[%s9399_s0 + $0x3] ss:$2 sm:$0xff]  ;;  %v5918_v9 = vld [vmem:[%s9399_s0 + $0x13] ss:$2 sm:$0xff] }
  0x52   :  { %6633 = vmatpush3.bf16.msra.mxu0 %v7478_v30  ;;  %v5901_v5 = vld [vmem:[%s9399_s0 + $0x2] ss:$2 sm:$0xff]  ;;  %v5902_v6 = vld [vmem:[%s9399_s0 + $0x12] ss:$2 sm:$0xff]  ;;  %v336_v7 = vpack.c.bf16 %v5876_v0, %v5875_v2  ;;  %v790_v13 = vpack.c.bf16 %v5918_v9, %v5917_v8  ;;  %v5919_v24 = vld [vmem:[%s9399_s0 + $0x23] ss:$2 sm:$0xff] }
  0x53   :  { %6657 = vmatpush3.bf16.msra.mxu1 %v7479_v31  ;;  %6634 = vmatprep.subr.bf16.mxu0 %v7480_v32  ;;  %v7494_v10 = vld [vmem:[#allocation4 + $0xa0] sm:$0xff]   ;;  %v632_v12 = vpack.c.bf16 %v5902_v6, %v5901_v5  ;;  %v7496_v14 = vld [vmem:[#allocation4 + $0x98] sm:$0xff]   ;;  %v7498_v16 = vld [vmem:[#allocation4 + $0x90] sm:$0xff]  }
  0x54   :  { %6658 = vmatprep.subr.bf16.mxu1 %v7481_v33  ;;  %v7495_v11 = vld [vmem:[#allocation4 + $0xe0] sm:$0xff]   ;;  %v7497_v15 = vld [vmem:[#allocation4 + $0xd8] sm:$0xff]   ;;  %v7499_v17 = vld [vmem:[#allocation4 + $0xd0] sm:$0xff]  }
  0x55   :  { %v7500_v18 = vld [vmem:[#allocation4 + $0x88] sm:$0xff]   ;;  %v7502_v20 = vld [vmem:[#allocation4 + $0x80] sm:$0xff]   ;;  %v7504_v26 = vld [vmem:[#allocation4 + $0x138] sm:$0xff]  }
  0x56   :  { %6635 = vmatpush3.bf16.msra.mxu0 %v7480_v32  ;;  %v7501_v19 = vld [vmem:[#allocation4 + $0xc8] sm:$0xff]   ;;  %v7503_v21 = vld [vmem:[#allocation4 + $0xc0] sm:$0xff]   ;;  %v7505_v27 = vld [vmem:[#allocation4 + $0x78] sm:$0xff]  }
  0x57   :  { %6659 = vmatpush3.bf16.msra.mxu1 %v7481_v33  ;;  %6636 = vmatprep.subr.bf16.mxu0 %v7482_v34  ;;  %v5903_v22 = vld [vmem:[%s9399_s0 + $0x22] ss:$2 sm:$0xff]  ;;  %v5904_v23 = vld [vmem:[%s9399_s0 + $0x32] ss:$2 sm:$0xff]  ;;  %v5920_v25 = vld [vmem:[%s9399_s0 + $0x33] ss:$2 sm:$0xff] }
  0x58   :  { %6660 = vmatprep.subr.bf16.mxu1 %v7483_v38  ;;  %v5905_v28 = vld [vmem:[%s9399_s0 + $0x42] ss:$2 sm:$0xff]  ;;  %v5906_v29 = vld [vmem:[%s9399_s0 + $0x52] ss:$2 sm:$0xff]  ;;  %v633_v30 = vpack.c.bf16 %v5904_v23, %v5903_v22  ;;  %v5921_v31 = vld [vmem:[%s9399_s0 + $0x43] ss:$2 sm:$0xff]  ;;  %v791_v32 = vpack.c.bf16 %v5920_v25, %v5919_v24 }
  0x59   :  { %v5922_v33 = vld [vmem:[%s9399_s0 + $0x53] ss:$2 sm:$0xff]  ;;  %v634_v36 = vpack.c.bf16 %v5906_v29, %v5905_v28  ;;  %v5907_v37 = vld [vmem:[%s9399_s0 + $0x62] ss:$2 sm:$0xff]  ;;  %v5923_v41 = vld [vmem:[%s9399_s0 + $0x63] ss:$2 sm:$0xff] }
  0x5a   :  { %6637 = vmatpush3.bf16.msra.mxu0 %v7482_v34  ;;  %v7506_v34 = vld [vmem:[#allocation4 + $0x130] sm:$0xff]   ;;  %v7508_v39 = vld [vmem:[#allocation4 + $0x128] sm:$0xff]   ;;  %v792_v40 = vpack.c.bf16 %v5922_v33, %v5921_v31  ;;  %v7512_v54 = vld [vmem:[#allocation4 + $0x118] sm:$0xff]  }
  0x5b   :  { %6661 = vmatpush3.bf16.msra.mxu1 %v7483_v38  ;;  %6638 = vmatprep.subr.bf16.mxu0 %v7484_v42  ;;  %v7507_v35 = vld [vmem:[#allocation4 + $0x70] sm:$0xff]   ;;  %v5958_v47 = vld [vmem:[%s9399_s0 + $0x81] ss:$2 sm:$0xff]  ;;  %v7513_v55 = vld [vmem:[#allocation4 + $0x58] sm:$0xff]  }
  0x5c   :  { %6662 = vmatprep.subr.bf16.mxu1 %v7485_v43  ;;  %v5908_v38 = vld [vmem:[%s9399_s0 + $0x72] ss:$2 sm:$0x3f]  ;;  %v5959_v49 = vld [vmem:[%s9399_s0 + $0x91] ss:$2 sm:$0xff]  ;;  %v7516_v58 = vld [vmem:[#allocation4 + $0x108] sm:$0xff]  }
  0x5d   :  { %v635_v46 = vpack.c.bf16 %v5908_v38, %v5907_v37  ;;  %v7517_v59 = vld [vmem:[#allocation4 + $0x48] sm:$0xff]   ;;  %v7519_v61 = vld [vmem:[#allocation4 + $0x40] sm:$0xff]   ;;  %v5961_v1 = vld [vmem:[%s9399_s0 + $0xb1] ss:$2 sm:$0xff] }
  0x5e   :  { %6639 = vmatpush3.bf16.msra.mxu0 %v7484_v42  ;;  %v5924_v42 = vld [vmem:[%s9399_s0 + $0x73] ss:$2 sm:$0x3f]  ;;  %v5960_v0 = vld [vmem:[%s9399_s0 + $0xa1] ss:$2 sm:$0xff] }
  0x5f   :  { %6663 = vmatpush3.bf16.msra.mxu1 %v7485_v43  ;;  %6640 = vmatprep.subr.bf16.mxu0 %v7486_v44  ;;  %v7509_v43 = vld [vmem:[#allocation4 + $0x68] sm:$0xff]   ;;  %v793_v48 = vpack.c.bf16 %v5924_v42, %v5923_v41  ;;  %v7520_v2 = vld [vmem:[#allocation4 + $0x38] sm:$0xff]   ;;  %v1379_v8 = vpack.c.bf16 %v5961_v1, %v5960_v0  ;;  %v7531_v33 = vld [vmem:[#allocation4 + $0x90] sm:$0xff]  }
  0x60   :  { %6664 = vmatprep.subr.bf16.mxu1 %v7487_v45  ;;  %v5938_v5 = vld [vmem:[%s9399_s0 + $0x54] ss:$2 sm:$0xff]  ;;  %v5963_v9 = vld [vmem:[%s9399_s0 + $0xd1] ss:$2 sm:$0xff]  ;;  %v6014_v0 = vld [vmem:[%s9399_s0 + $0x84] ss:$2 sm:$0xff] }
  0x61   :  { %v5951_v22 = vld [vmem:[%s9399_s0 + $0x90] ss:$2 sm:$0xff]  ;;  %v7535_v37 = vld [vmem:[#allocation4 + $0x80] sm:$0xff]  }
  0x62   :  { %6641 = vmatpush3.bf16.msra.mxu0 %v7486_v44  ;;  %v5933_v44 = vld [vmem:[%s9399_s0 + $0x4] ss:$2 sm:$0xff]  ;;  %v7529_v31 = vld [vmem:[#allocation4 + $0x98] sm:$0xff]  }
  0x63   :  { %6665 = vmatpush3.bf16.msra.mxu1 %v7487_v45  ;;  %6674 = vmatprep.subr.bf16.mxu0 %v7488_v50  ;;  %v5934_v45 = vld [vmem:[%s9399_s0 + $0x14] ss:$2 sm:$0xff] }
  0x64   :  { %6698 = vmatprep.subr.bf16.mxu1 %v7489_v51  ;;  %v5982_v24 = vld [vmem:[%s9399_s0 + $0x82] ss:$2 sm:$0xff]  ;;  %v5983_v25 = vld [vmem:[%s9399_s0 + $0x92] ss:$2 sm:$0xff] }
  0x65   :  { %6643 = vmatmul.mubr.bf16.vlgmr.msra.gmra.mxu0 %v370_v52  ;;  %v948_v52 = vpack.c.bf16 %v5934_v45, %v5933_v44  ;;  %v1640_v29 = vpack.c.bf16 %v5983_v25, %v5982_v24  ;;  %v5952_v38 = vld [vmem:[%s9399_s0 + $0xa0] ss:$2 sm:$0xff]  ;;  %v7536_v42 = vld [vmem:[#allocation4 + $0xf8] sm:$0xff]  }
  0x66   :  { %6667 = vmatmul.mubr.bf16.vlgmr.msra.gmra.mxu1 %v334_v56  ;;  %6675 = vmatpush3.bf16.msra.mxu0 %v7488_v50  ;;  %v7510_v50 = vld [vmem:[#allocation4 + $0x120] sm:$0xff]   ;;  %v7514_v56 = vld [vmem:[#allocation4 + $0x110] sm:$0xff]  }
  0x67   :  { %6699 = vmatpush3.bf16.msra.mxu1 %v7489_v51  ;;  %6676 = vmatprep.subr.bf16.mxu0 %v7490_v53  ;;  %v7511_v51 = vld [vmem:[#allocation4 + $0x60] sm:$0xff]  }
  0x68   :  { %6700 = vmatprep.subr.bf16.mxu1 %v7491_v57  ;;  %6646 = vmatprep.mubr.bf16.mxu0 %v371_v60  ;;  %v7518_v60 = vld [vmem:[#allocation4 + $0x100] sm:$0xff]  }
  0x69   :  { %6670 = vmatprep.mubr.bf16.mxu1 %v335_v63  ;;  %v5936_v63 = vld [vmem:[%s9399_s0 + $0x34] ss:$2 sm:$0xff] }
  0x6a   :  { %6677 = vmatpush3.bf16.msra.mxu0 %v7490_v53  ;;  %v1378_v53 = vpack.c.bf16 %v5959_v49, %v5958_v47  ;;  %v5985_v41 = vld [vmem:[%s9399_s0 + $0xb2] ss:$2 sm:$0xff] }
  0x6b   :  { %6701 = vmatpush3.bf16.msra.mxu1 %v7491_v57  ;;  %6678 = vmatprep.subr.bf16.mxu0 %v7492_v62  ;;  %v7515_v57 = vld [vmem:[#allocation4 + $0x50] sm:$0xff]   ;;  %v5954_v45 = vld [vmem:[%s9399_s0 + $0xc0] ss:$2 sm:$0xff] }
  0x6c   :  { %6702 = vmatprep.subr.bf16.mxu1 %v7493_v3  ;;  %v5987_v49 = vld [vmem:[%s9399_s0 + $0xd2] ss:$2 sm:$0xff] }
  0x6d   :  { %6647 = vmatmul.mubr.bf16.gmra.mxu0 %v372_v4  ;;  %v5937_v4 = vld [vmem:[%s9399_s0 + $0x44] ss:$2 sm:$0xff]  ;;  %v6015_v1 = vld [vmem:[%s9399_s0 + $0x94] ss:$2 sm:$0xff] }
  0x6e   :  { %6679 = vmatpush3.bf16.msra.mxu0 %v7492_v62  ;;  %6671 = vmatmul.mubr.bf16.gmra.mxu1 %v336_v7  ;;  %v5935_v62 = vld [vmem:[%s9399_s0 + $0x24] ss:$2 sm:$0xff]  ;;  %v5962_v7 = vld [vmem:[%s9399_s0 + $0xc1] ss:$2 sm:$0xff] }
  0x6f   :  { %6703 = vmatpush3.bf16.msra.mxu1 %v7493_v3  ;;  %6680 = vmatprep.subr.bf16.mxu0 %v7494_v10  ;;  %v7521_v3 = vld [vmem:[#allocation4 + $0xb8] sm:$0xff]   ;;  %v949_v6 = vpack.c.bf16 %v5936_v63, %v5935_v62 }
  0x70   :  { %6704 = vmatprep.subr.bf16.mxu1 %v7495_v11  ;;  %6690 = vmatprep.mubr.bf16.mxu0 %v632_v12  ;;  %v950_v12 = vpack.c.bf16 %v5938_v5, %v5937_v4  ;;  %v5999_v62 = vld [vmem:[%s9399_s0 + $0x93] ss:$2 sm:$0xff]  ;;  %v1954_v5 = vpack.c.bf16 %v6015_v1, %v6014_v0 }
  0x71   :  { %6714 = vmatprep.mubr.bf16.mxu1 %v790_v13  ;;  %v5940_v13 = vld [vmem:[%s9399_s0 + $0x74] ss:$2 sm:$0x3f] }
  0x72   :  { %6681 = vmatpush3.bf16.msra.mxu0 %v7494_v10  ;;  %v7522_v10 = vld [vmem:[#allocation4 + $0x30] sm:$0xff]  }
  0x73   :  { %6705 = vmatpush3.bf16.msra.mxu1 %v7495_v11  ;;  %6682 = vmatprep.subr.bf16.mxu0 %v7496_v14  ;;  %v7523_v11 = vld [vmem:[#allocation4 + $0xb0] sm:$0xff]  }
  0x74   :  { %6706 = vmatprep.subr.bf16.mxu1 %v7497_v15 }
  0x76   :  { %6683 = vmatpush3.bf16.msra.mxu0 %v7496_v14  ;;  %v5939_v14 = vld [vmem:[%s9399_s0 + $0x64] ss:$2 sm:$0xff] }
  0x77   :  { %6707 = vmatpush3.bf16.msra.mxu1 %v7497_v15  ;;  %6684 = vmatprep.subr.bf16.mxu0 %v7498_v16  ;;  %v1380_v15 = vpack.c.bf16 %v5963_v9, %v5962_v7  ;;  %v7545_v7 = vld [vmem:[#allocation4 + $0x118] sm:$0xff]   ;;  %v7547_v9 = vld [vmem:[#allocation4 + $0x110] sm:$0xff]  }
  0x78   :  { %6708 = vmatprep.subr.bf16.mxu1 %v7499_v17 }
  0x7a   :  { %6685 = vmatpush3.bf16.msra.mxu0 %v7498_v16  ;;  %v5965_v16 = vld [vmem:[%s9399_s0 + $0xf1] ss:$2 sm:$0x3f] }
  0x7b   :  { %6709 = vmatpush3.bf16.msra.mxu1 %v7499_v17  ;;  %6686 = vmatprep.subr.bf16.mxu0 %v7500_v18  ;;  %v7524_v17 = vld [vmem:[#allocation4 + $0x28] sm:$0xff]  }
  0x7c   :  { %6710 = vmatprep.subr.bf16.mxu1 %v7501_v19 }
  0x7e   :  { %6687 = vmatpush3.bf16.msra.mxu0 %v7500_v18  ;;  %v5964_v18 = vld [vmem:[%s9399_s0 + $0xe1] ss:$2 sm:$0xff] }
  0x7f   :  { %6711 = vmatpush3.bf16.msra.mxu1 %v7501_v19  ;;  %6688 = vmatprep.subr.bf16.mxu0 %v7502_v20  ;;  %v7525_v19 = vld [vmem:[#allocation4 + $0xa8] sm:$0xff]   ;;  %v1381_v23 = vpack.c.bf16 %v5965_v16, %v5964_v18 }
  0x80   :  { %6712 = vmatprep.subr.bf16.mxu1 %v7503_v21  ;;  %v6016_v16 = vld [vmem:[%s9399_s0 + $0xa4] ss:$2 sm:$0xff]  ;;  %v6002_v18 = vld [vmem:[%s9399_s0 + $0xc3] ss:$2 sm:$0xff] }
  0x82   :  { %6689 = vmatpush3.bf16.msra.mxu0 %v7502_v20  ;;  %v951_v20 = vpack.c.bf16 %v5940_v13, %v5939_v14  ;;  %v7551_v13 = vld [vmem:[#allocation4 + $0x100] sm:$0xff]  }
  0x83   :  { %6713 = vmatpush3.bf16.msra.mxu1 %v7503_v21  ;;  %6722 = vmatprep.subr.bf16.mxu0 %v7504_v26  ;;  %v5950_v21 = vld [vmem:[%s9399_s0 + $0x80] ss:$2 sm:$0xff]  ;;  %v6000_v14 = vld [vmem:[%s9399_s0 + $0xa3] ss:$2 sm:$0xff] }
  0x84   :  { %6746 = vmatprep.subr.bf16.mxu1 %v7505_v27  ;;  %v1342_v28 = vpack.c.bf16 %v5951_v22, %v5950_v21  ;;  %v6019_v21 = vld [vmem:[%s9399_s0 + $0xd4] ss:$2 sm:$0xff] }
  0x85   :  { %6691 = vmatmul.mubr.bf16.vlgmr.msra.gmra.mxu0 %v633_v30  ;;  %v7528_v30 = vld [vmem:[#allocation4 + $0x18] sm:$0xff]  }
  0x86   :  { %6715 = vmatmul.mubr.bf16.vlgmr.msra.gmra.mxu1 %v791_v32  ;;  %6723 = vmatpush3.bf16.msra.mxu0 %v7504_v26  ;;  %v7526_v26 = vld [vmem:[#allocation4 + $0x20] sm:$0xff]   ;;  %v7530_v32 = vld [vmem:[#allocation4 + $0x10] sm:$0xff]  }
  0x87   :  { %6747 = vmatpush3.bf16.msra.mxu1 %v7505_v27  ;;  %6724 = vmatprep.subr.bf16.mxu0 %v7506_v34  ;;  %v7527_v27 = vld [vmem:[#allocation4 + $0xa0] sm:$0xff]  }
  0x88   :  { %6748 = vmatprep.subr.bf16.mxu1 %v7507_v35  ;;  %6694 = vmatprep.mubr.bf16.mxu0 %v634_v36  ;;  %v7534_v36 = vld [vmem:[#allocation4] sm:$0xff]  }
  0x89   :  { %6718 = vmatprep.mubr.bf16.mxu1 %v792_v40  ;;  %v5984_v40 = vld [vmem:[%s9399_s0 + $0xa2] ss:$2 sm:$0xff] }
  0x8a   :  { %6725 = vmatpush3.bf16.msra.mxu0 %v7506_v34  ;;  %v7532_v34 = vld [vmem:[#allocation4 + $0x8] sm:$0xff]   ;;  %v1641_v47 = vpack.c.bf16 %v5985_v41, %v5984_v40 }
  0x8b   :  { %6749 = vmatpush3.bf16.msra.mxu1 %v7507_v35  ;;  %6726 = vmatprep.subr.bf16.mxu0 %v7508_v39  ;;  %v7533_v35 = vld [vmem:[#allocation4 + $0x88] sm:$0xff]  }
  0x8c   :  { %6750 = vmatprep.subr.bf16.mxu1 %v7509_v43 }
  0x8d   :  { %6695 = vmatmul.mubr.bf16.gmra.mxu0 %v635_v46  ;;  %v5955_v46 = vld [vmem:[%s9399_s0 + $0xd0] ss:$2 sm:$0xff] }
  0x8e   :  { %6727 = vmatpush3.bf16.msra.mxu0 %v7508_v39  ;;  %6719 = vmatmul.mubr.bf16.gmra.mxu1 %v793_v48  ;;  %v5953_v39 = vld [vmem:[%s9399_s0 + $0xb0] ss:$2 sm:$0xff] }
  0x8f   :  { %6751 = vmatpush3.bf16.msra.mxu1 %v7509_v43  ;;  %6728 = vmatprep.subr.bf16.mxu0 %v7510_v50  ;;  %v7537_v43 = vld [vmem:[#allocation4 + $0x138] sm:$0xff]   ;;  %v1343_v44 = vpack.c.bf16 %v5953_v39, %v5952_v38  ;;  %v5986_v48 = vld [vmem:[%s9399_s0 + $0xc2] ss:$2 sm:$0xff] }
  0x90   :  { %6752 = vmatprep.subr.bf16.mxu1 %v7511_v51  ;;  %6738 = vmatprep.mubr.bf16.mxu0 %v948_v52  ;;  %v1344_v52 = vpack.c.bf16 %v5955_v46, %v5954_v45 }
  0x91   :  { %6762 = vmatprep.mubr.bf16.mxu1 %v1378_v53  ;;  %v1642_v53 = vpack.c.bf16 %v5987_v49, %v5986_v48 }
  0x92   :  { %6729 = vmatpush3.bf16.msra.mxu0 %v7510_v50  ;;  %v7538_v50 = vld [vmem:[#allocation4 + $0xf0] sm:$0xff]  }
  0x93   :  { %6753 = vmatpush3.bf16.msra.mxu1 %v7511_v51  ;;  %6730 = vmatprep.subr.bf16.mxu0 %v7512_v54  ;;  %v7539_v51 = vld [vmem:[#allocation4 + $0x130] sm:$0xff]  }
  0x94   :  { %6754 = vmatprep.subr.bf16.mxu1 %v7513_v55 }
  0x96   :  { %6731 = vmatpush3.bf16.msra.mxu0 %v7512_v54  ;;  %v5956_v54 = vld [vmem:[%s9399_s0 + $0xe0] ss:$2 sm:$0xff] }
  0x97   :  { %6755 = vmatpush3.bf16.msra.mxu1 %v7513_v55  ;;  %6732 = vmatprep.subr.bf16.mxu0 %v7514_v56  ;;  %v5957_v55 = vld [vmem:[%s9399_s0 + $0xf0] ss:$2 sm:$0x3f] }
  0x98   :  { %6756 = vmatprep.subr.bf16.mxu1 %v7515_v57 }
  0x9a   :  { %6733 = vmatpush3.bf16.msra.mxu0 %v7514_v56  ;;  %v7540_v56 = vld [vmem:[#allocation4 + $0xe8] sm:$0xff]  }
  0x9b   :  { %6757 = vmatpush3.bf16.msra.mxu1 %v7515_v57  ;;  %6734 = vmatprep.subr.bf16.mxu0 %v7516_v58  ;;  %v5988_v57 = vld [vmem:[%s9399_s0 + $0xe2] ss:$2 sm:$0xff] }
  0x9c   :  { %6758 = vmatprep.subr.bf16.mxu1 %v7517_v59 }
  0x9e   :  { %6735 = vmatpush3.bf16.msra.mxu0 %v7516_v58  ;;  %v5989_v58 = vld [vmem:[%s9399_s0 + $0xf2] ss:$2 sm:$0x3f] }
  0x9f   :  { %6759 = vmatpush3.bf16.msra.mxu1 %v7517_v59  ;;  %6736 = vmatprep.subr.bf16.mxu0 %v7518_v60  ;;  %v7541_v59 = vld [vmem:[#allocation4 + $0x128] sm:$0xff]   ;;  %v1643_v63 = vpack.c.bf16 %v5989_v58, %v5988_v57 }
  0xa0   :  { %6760 = vmatprep.subr.bf16.mxu1 %v7519_v61 }
  0xa2   :  { %6737 = vmatpush3.bf16.msra.mxu0 %v7518_v60  ;;  %v1345_v60 = vpack.c.bf16 %v5957_v55, %v5956_v54 }
  0xa3   :  { %6761 = vmatpush3.bf16.msra.mxu1 %v7519_v61  ;;  %6770 = vmatprep.subr.bf16.mxu0 %v7520_v2  ;;  %v5998_v61 = vld [vmem:[%s9399_s0 + $0x83] ss:$2 sm:$0xff] }
  0xa4   :  { %6794 = vmatprep.subr.bf16.mxu1 %v7521_v3  ;;  %v1797_v4 = vpack.c.bf16 %v5999_v62, %v5998_v61 }
  0xa5   :  { %6739 = vmatmul.mubr.bf16.vlgmr.msra.gmra.mxu0 %v949_v6  ;;  %v7544_v6 = vld [vmem:[#allocation4 + $0xd8] sm:$0xff]  }
  0xa6   :  { %6763 = vmatmul.mubr.bf16.vlgmr.msra.gmra.mxu1 %v1379_v8  ;;  %6771 = vmatpush3.bf16.msra.mxu0 %v7520_v2  ;;  %v7542_v2 = vld [vmem:[#allocation4 + $0xe0] sm:$0xff]   ;;  %v7546_v8 = vld [vmem:[#allocation4 + $0xd0] sm:$0xff]  }
  0xa7   :  { %6795 = vmatpush3.bf16.msra.mxu1 %v7521_v3  ;;  %6772 = vmatprep.subr.bf16.mxu0 %v7522_v10  ;;  %v7543_v3 = vld [vmem:[#allocation4 + $0x120] sm:$0xff]  }
  0xa8   :  { %6796 = vmatprep.subr.bf16.mxu1 %v7523_v11  ;;  %6742 = vmatprep.mubr.bf16.mxu0 %v950_v12  ;;  %v7550_v12 = vld [vmem:[#allocation4 + $0xc0] sm:$0xff]  }
  0xa9   :  { %6766 = vmatprep.mubr.bf16.mxu1 %v1380_v15  ;;  %v6001_v15 = vld [vmem:[%s9399_s0 + $0xb3] ss:$2 sm:$0xff] }
  0xaa   :  { %6773 = vmatpush3.bf16.msra.mxu0 %v7522_v10  ;;  %v7548_v10 = vld [vmem:[#allocation4 + $0xc8] sm:$0xff]   ;;  %v1798_v22 = vpack.c.bf16 %v6001_v15, %v6000_v14 }
  0xab   :  { %6797 = vmatpush3.bf16.msra.mxu1 %v7523_v11  ;;  %6774 = vmatprep.subr.bf16.mxu0 %v7524_v17  ;;  %v7549_v11 = vld [vmem:[#allocation4 + $0x108] sm:$0xff]  }
  0xac   :  { %6798 = vmatprep.subr.bf16.mxu1 %v7525_v19 }
  0xad   :  { %6743 = vmatmul.mubr.bf16.gmra.mxu0 %v951_v20  ;;  %v6018_v20 = vld [vmem:[%s9399_s0 + $0xc4] ss:$2 sm:$0xff] }
  0xae   :  { %6775 = vmatpush3.bf16.msra.mxu0 %v7524_v17  ;;  %6767 = vmatmul.mubr.bf16.gmra.mxu1 %v1381_v23  ;;  %v6017_v17 = vld [vmem:[%s9399_s0 + $0xb4] ss:$2 sm:$0xff]  ;;  %v1956_v25 = vpack.c.bf16 %v6019_v21, %v6018_v20 }
  0xaf   :  { %6799 = vmatpush3.bf16.msra.mxu1 %v7525_v19  ;;  %6776 = vmatprep.subr.bf16.mxu0 %v7526_v26  ;;  %v6003_v19 = vld [vmem:[%s9399_s0 + $0xd3] ss:$2 sm:$0xff]  ;;  %v1955_v23 = vpack.c.bf16 %v6017_v17, %v6016_v16 }
  0xb0   :  { %6800 = vmatprep.subr.bf16.mxu1 %v7527_v27  ;;  %6786 = vmatprep.mubr.bf16.mxu0 %v1342_v28  ;;  %v1799_v24 = vpack.c.bf16 %v6003_v19, %v6002_v18  ;;  %v6020_v28 = vld [vmem:[%s9399_s0 + $0xe4] ss:$2 sm:$0xff] }
  0xb1   :  { %6810 = vmatprep.mubr.bf16.mxu1 %v1640_v29  ;;  %v6021_v29 = vld [vmem:[%s9399_s0 + $0xf4] ss:$2 sm:$0x3f] }
  0xb2   :  { %6777 = vmatpush3.bf16.msra.mxu0 %v7526_v26  ;;  %v6004_v26 = vld [vmem:[%s9399_s0 + $0xe3] ss:$2 sm:$0xff] }
  0xb3   :  { %6801 = vmatpush3.bf16.msra.mxu1 %v7527_v27  ;;  %6778 = vmatprep.subr.bf16.mxu0 %v7528_v30  ;;  %v6005_v27 = vld [vmem:[%s9399_s0 + $0xf3] ss:$2 sm:$0x3f] }
  0xb4   :  { %6802 = vmatprep.subr.bf16.mxu1 %v7529_v31 }
  0xb6   :  { %6779 = vmatpush3.bf16.msra.mxu0 %v7528_v30  ;;  %v1800_v30 = vpack.c.bf16 %v6005_v27, %v6004_v26 }
  0xb7   :  { %6803 = vmatpush3.bf16.msra.mxu1 %v7529_v31  ;;  %6780 = vmatprep.subr.bf16.mxu0 %v7530_v32  ;;  %v1957_v31 = vpack.c.bf16 %v6021_v29, %v6020_v28 }
  0xb8   :  { %6804 = vmatprep.subr.bf16.mxu1 %v7531_v33 }
  0xba   :  { %6781 = vmatpush3.bf16.msra.mxu0 %v7530_v32 }
  0xbb   :  { %6805 = vmatpush3.bf16.msra.mxu1 %v7531_v33  ;;  %6782 = vmatprep.subr.bf16.mxu0 %v7532_v34 }
  0xbc   :  { %6806 = vmatprep.subr.bf16.mxu1 %v7533_v35 }
  0xbe   :  { %6783 = vmatpush3.bf16.msra.mxu0 %v7532_v34 }
  0xbf   :  { %6807 = vmatpush3.bf16.msra.mxu1 %v7533_v35  ;;  %6784 = vmatprep.subr.bf16.mxu0 %v7534_v36 }
  0xc0   :  { %6808 = vmatprep.subr.bf16.mxu1 %v7535_v37 }
  0xc2   :  { %6785 = vmatpush3.bf16.msra.mxu0 %v7534_v36 }
  0xc3   :  { %6809 = vmatpush3.bf16.msra.mxu1 %v7535_v37  ;;  %6818 = vmatprep.subr.bf16.mxu0 %v7536_v42 }
  0xc4   :  { %6842 = vmatprep.subr.bf16.mxu1 %v7537_v43 }
  0xc5   :  { %6787 = vmatmul.mubr.bf16.vlgmr.msra.gmra.mxu0 %v1343_v44 }
  0xc6   :  { %6811 = vmatmul.mubr.bf16.vlgmr.msra.gmra.mxu1 %v1641_v47  ;;  %6819 = vmatpush3.bf16.msra.mxu0 %v7536_v42 }
  0xc7   :  { %6843 = vmatpush3.bf16.msra.mxu1 %v7537_v43  ;;  %6820 = vmatprep.subr.bf16.mxu0 %v7538_v50 }
  0xc8   :  { %6844 = vmatprep.subr.bf16.mxu1 %v7539_v51  ;;  %6790 = vmatprep.mubr.bf16.mxu0 %v1344_v52 }
  0xc9   :  { %6814 = vmatprep.mubr.bf16.mxu1 %v1642_v53 }
  0xca   :  { %6821 = vmatpush3.bf16.msra.mxu0 %v7538_v50 }
  0xcb   :  { %6845 = vmatpush3.bf16.msra.mxu1 %v7539_v51  ;;  %6822 = vmatprep.subr.bf16.mxu0 %v7540_v56 }
  0xcc   :  { %6846 = vmatprep.subr.bf16.mxu1 %v7541_v59 }
  0xcd   :  { %6791 = vmatmul.mubr.bf16.gmra.mxu0 %v1345_v60 }
  0xce   :  { %6823 = vmatpush3.bf16.msra.mxu0 %v7540_v56  ;;  %6815 = vmatmul.mubr.bf16.gmra.mxu1 %v1643_v63 }
  0xcf   :  { %6847 = vmatpush3.bf16.msra.mxu1 %v7541_v59  ;;  %6824 = vmatprep.subr.bf16.mxu0 %v7542_v2 }
  0xd0   :  { %6848 = vmatprep.subr.bf16.mxu1 %v7543_v3  ;;  %6834 = vmatprep.mubr.bf16.mxu0 %v1797_v4 }
  0xd1   :  { %6858 = vmatprep.mubr.bf16.mxu1 %v1954_v5 }
  0xd2   :  { %6825 = vmatpush3.bf16.msra.mxu0 %v7542_v2 }
  0xd3   :  { %6849 = vmatpush3.bf16.msra.mxu1 %v7543_v3  ;;  %6826 = vmatprep.subr.bf16.mxu0 %v7544_v6 }
  0xd4   :  { %6850 = vmatprep.subr.bf16.mxu1 %v7545_v7 }
  0xd6   :  { %6827 = vmatpush3.bf16.msra.mxu0 %v7544_v6  ;;  %v8503_v6 = vld [vmem:[%s9400_s1] ss:$0 sm:$0xff] }
  0xd7   :  { %6851 = vmatpush3.bf16.msra.mxu1 %v7545_v7  ;;  %6828 = vmatprep.subr.bf16.mxu0 %v7546_v8 }
  0xd8   :  { %6852 = vmatprep.subr.bf16.mxu1 %v7547_v9 }
  0xda   :  { %6829 = vmatpush3.bf16.msra.mxu0 %v7546_v8 }
  0xdb   :  { %6853 = vmatpush3.bf16.msra.mxu1 %v7547_v9  ;;  %6830 = vmatprep.subr.bf16.mxu0 %v7548_v10 }
  0xdc   :  { %6854 = vmatprep.subr.bf16.mxu1 %v7549_v11 }
  0xde   :  { %6831 = vmatpush3.bf16.msra.mxu0 %v7548_v10 }
  0xdf   :  { %6855 = vmatpush3.bf16.msra.mxu1 %v7549_v11  ;;  %6832 = vmatprep.subr.bf16.mxu0 %v7550_v12 }
  0xe0   :  { %6856 = vmatprep.subr.bf16.mxu1 %v7551_v13 }
  0xe2   :  { %6833 = vmatpush3.bf16.msra.mxu0 %v7550_v12 }
  0xe3   :  { %6857 = vmatpush3.bf16.msra.mxu1 %v7551_v13 }
  0xe5   :  { %6835 = vmatmul.mubr.bf16.vlgmr.msra.gmra.mxu0 %v1798_v22 }
  0xe6   :  { %6859 = vmatmul.mubr.bf16.vlgmr.msra.gmra.mxu1 %v1955_v23  ;;  %6838 = vmatprep.mubr.bf16.mxu0 %v1799_v24 }
  0xe7   :  { %6862 = vmatprep.mubr.bf16.mxu1 %v1956_v25 }
  0xed   :  { %6839 = vmatmul.mubr.bf16.gmra.mxu0 %v1800_v30 }
  0xee   :  { %6863 = vmatmul.mubr.bf16.gmra.mxu1 %v1957_v31 }
 0x125   :  { %v6644_v32 = vpop.f32.mrf.mxu0 }
 0x126   :  { %v6668_v35 = vpop.f32.mrf.mxu1 }
 0x127   :  { %v472_v33 = vpop.f32.mrf.mxu0  ;;  %v594_v57 = vadd.f32 %v6668_v35, %v6644_v32 }
 0x128   :  { %v585_v38 = vpop.f32.mrf.mxu1 }
 0x129   :  { %v6645_v34 = vpop.f32.mrf.mxu0  ;;  %v586_v60 = vadd.f32 %v585_v38, %v472_v33 }
 0x12a   :  { %v6669_v40 = vpop.f32.mrf.mxu1 }
 0x12b   :  { %v475_v36 = vpop.f32.mrf.mxu0  ;;  %v597_v63 = vadd.f32 %v6669_v40, %v6645_v34 }
 0x12c   :  { %v588_v42 = vpop.f32.mrf.mxu1 }
 0x12d   :  { %v6648_v37 = vpop.f32.mrf.mxu0  ;;  %v589_v5 = vadd.f32 %v588_v42, %v475_v36 }
 0x12e   :  { %v6672_v43 = vpop.f32.mrf.mxu1 }
 0x12f   :  { %v488_v39 = vpop.f32.mrf.mxu0  ;;  %v610_v25 = vadd.f32 %v6672_v43, %v6648_v37 }
 0x130   :  { %v601_v46 = vpop.f32.mrf.mxu1 }
 0x131   :  { %v6649_v41 = vpop.f32.mrf.mxu0  ;;  %v602_v29 = vadd.f32 %v601_v46, %v488_v39 }
 0x132   :  { %v6673_v48 = vpop.f32.mrf.mxu1 }
 0x133   :  { %v8498_v44 = vpop.f32.mrf.mxu0  ;;  %v613_v33 = vadd.f32 %v6673_v48, %v6649_v41 }
 0x134   :  { %v604_v50 = vpop.f32.mrf.mxu1 }
 0x135   :  { %v605_v46 = vadd.f32 %v604_v50, %v8498_v44 }
 0x145   :  { %v6692_v45 = vpop.f32.mrf.mxu0 }
 0x146   :  { %v6716_v51 = vpop.f32.mrf.mxu1  ;;  %v768_v61 = vadd.f32 %v6692_v45, %v594_v57 }
 0x147   :  { %v735_v47 = vpop.f32.mrf.mxu0 }
 0x148   :  { %v893_v53 = vpop.f32.mrf.mxu1  ;;  %v766_v0 = vadd.f32 %v735_v47, %v586_v60  ;;  %v926_v2 = vadd.f32 %v6716_v51, %v768_v61 }
 0x149   :  { %v6693_v49 = vpop.f32.mrf.mxu0 }
 0x14a   :  { %v6717_v55 = vpop.f32.mrf.mxu1  ;;  %v769_v3 = vadd.f32 %v6693_v49, %v597_v63  ;;  %v924_v8 = vadd.f32 %v893_v53, %v766_v0 }
 0x14b   :  { %v738_v52 = vpop.f32.mrf.mxu0 }
 0x14c   :  { %v896_v58 = vpop.f32.mrf.mxu1  ;;  %v767_v10 = vadd.f32 %v738_v52, %v589_v5  ;;  %v927_v12 = vadd.f32 %v6717_v55, %v769_v3 }
 0x14d   :  { %v6696_v54 = vpop.f32.mrf.mxu0 }
 0x14e   :  { %v6720_v62 = vpop.f32.mrf.mxu1  ;;  %v925_v20 = vadd.f32 %v896_v58, %v767_v10  ;;  %v772_v34 = vadd.f32 %v6696_v54, %v610_v25 }
 0x14f   :  { %v751_v56 = vpop.f32.mrf.mxu0 }
 0x150   :  { %v909_v4 = vpop.f32.mrf.mxu1  ;;  %v770_v37 = vadd.f32 %v751_v56, %v602_v29  ;;  %v930_v48 = vadd.f32 %v6720_v62, %v772_v34 }
 0x151   :  { %v6697_v59 = vpop.f32.mrf.mxu0 }
 0x152   :  { %v6721_v13 = vpop.f32.mrf.mxu1  ;;  %v773_v43 = vadd.f32 %v6697_v59, %v613_v33  ;;  %v928_v51 = vadd.f32 %v909_v4, %v770_v37 }
 0x153   :  { %v754_v1 = vpop.f32.mrf.mxu0 }
 0x154   :  { %v912_v22 = vpop.f32.mrf.mxu1  ;;  %v771_v52 = vadd.f32 %v754_v1, %v605_v46  ;;  %v931_v55 = vadd.f32 %v6721_v13, %v773_v43 }
 0x156   :  { %v929_v1 = vadd.f32 %v912_v22, %v771_v52 }
 0x165   :  { %v6740_v7 = vpop.f32.mrf.mxu0 }
 0x166   :  { %v1084_v9 = vadd.f32 %v6740_v7, %v926_v2  ;;  %v8521_v31 = vpop.f32.mrf.mxu1 }
 0x167   :  { %v1051_v11 = vpop.f32.mrf.mxu0 }
 0x168   :  { %v8506_v14 = vadd.f32 %v8503_v6, %v1084_v9  ;;  %v1082_v15 = vadd.f32 %v1051_v11, %v924_v8  ;;  %v8535_v47 = vpop.f32.mrf.mxu1 }
 0x169   :  { %v6741_v16 = vpop.f32.mrf.mxu0 }
 0x16a   :  { %v8509_v17 = vmul.f32 0.70710677, %v8506_v14  ;;  %v8512_v18 = vadd.f32 %v8503_v6, %v1082_v15  ;;  %v1085_v19 = vadd.f32 %v6741_v16, %v927_v12  ;;  %v8538_v58 = vpop.f32.mrf.mxu1 }
 0x16b   :  { %v1054_v21 = vpop.f32.mrf.mxu0 }
 0x16c   :  { %v1136_v23 = vand.u32 2147483647, %v8509_v17  ;;  %v8516_v24 = vmul.f32 0.70710677, %v8512_v18  ;;  %v8519_v26 = vadd.f32 %v8503_v6, %v1085_v19  ;;  %v1083_v27 = vadd.f32 %v1054_v21, %v925_v20  ;;  %v8552_v5 = vpop.f32.mrf.mxu1 }
 0x16d   :  { %v6744_v28 = vpop.f32.mrf.mxu0  ;;  %v8565_v19 = vmul.f32 0.5, %v8506_v14  ;;  %vm1120_vm0 = vcmp.ge.f32.partialorder %v8509_v17, 0.0 }
 0x16e   :  { %v1144_v30 = vmul.f32 0.3275911, %v1136_v23  ;;  %v1134_v32 = vand.u32 2147483647, %v8516_v24  ;;  %v8525_v35 = vmul.f32 0.70710677, %v8519_v26  ;;  %v8528_v36 = vadd.f32 %v8503_v6, %v1083_v27  ;;  %v8562_v15 = vpop.f32.mrf.mxu1 }
 0x16f   :  { %v1067_v42 = vpop.f32.mrf.mxu0  ;;  %v1088_v57 = vadd.f32 %v6744_v28, %v930_v48  ;;  %v1248_v44 = vsub.f32 0.0, %v1136_v23  ;;  %vm1118_vm1 = vcmp.ge.f32.partialorder %v8516_v24, 0.0 }
 0x170   :  { %v1152_v38 = vadd.f32 1.0, %v1144_v30  ;;  %v1142_v40 = vmul.f32 0.3275911, %v1134_v32  ;;  %v1137_v39 = vand.u32 2147483647, %v8525_v35  ;;  %v1086_v60 = vadd.f32 %v1067_v42, %v928_v51  ;;  %v8577_v37 = vpop.f32.mrf.mxu1 }
 0x171   :  { %v8532_v45 = vmul.f32 0.70710677, %v8528_v36  ;;  %v6745_v54 = vpop.f32.mrf.mxu0  ;;  %v8541_v50 = vadd.f32 %v8503_v6, %v1088_v57  ;;  %v1246_v4 = vsub.f32 0.0, %v1134_v32  ;;  %v1256_v8 = vmul.f32 %v1248_v44, %v1136_v23 }
 0x172   :  { %7552 = vrcp.f32 %v1152_v38  ;;  %v1150_v41 = vadd.f32 1.0, %v1142_v40  ;;  %v1145_v49 = vmul.f32 0.3275911, %v1137_v39  ;;  %v1089_v61 = vadd.f32 %v6745_v54, %v931_v55  ;;  %v8596_v54 = vpop.f32.mrf.mxu1 }
 0x173   :  { %v1135_v53 = vand.u32 2147483647, %v8532_v45  ;;  %v8544_v63 = vadd.f32 %v8503_v6, %v1086_v60  ;;  %v1070_v0 = vpop.f32.mrf.mxu0  ;;  %v8547_v2 = vmul.f32 0.70710677, %v8541_v50  ;;  %v1249_v12 = vsub.f32 0.0, %v1137_v39 }
 0x174   :  { %7554 = vrcp.f32 %v1150_v41  ;;  %v1153_v56 = vadd.f32 1.0, %v1145_v49  ;;  %v8550_v3 = vadd.f32 %v8503_v6, %v1089_v61  ;;  %v1087_v11 = vadd.f32 %v1070_v0, %v929_v1 }
 0x175   :  { %v1143_v59 = vmul.f32 0.3275911, %v1135_v53  ;;  %v8555_v7 = vmul.f32 0.70710677, %v8544_v63  ;;  %v1140_v9 = vand.u32 2147483647, %v8547_v2  ;;  %v1254_v20 = vmul.f32 %v1246_v4, %v1134_v32 }
 0x176   :  { %7556 = vrcp.f32 %v1153_v56  ;;  %v8559_v10 = vmul.f32 0.70710677, %v8550_v3  ;;  %v1266_v25 = vmul.f32 1.442695, %v1256_v8  ;;  %v1247_v27 = vsub.f32 0.0, %v1135_v53 }
 0x177   :  { %v1151_v62 = vadd.f32 1.0, %v1143_v59  ;;  %v1138_v13 = vand.u32 2147483647, %v8555_v7  ;;  %v1148_v16 = vmul.f32 0.3275911, %v1140_v9  ;;  %v8573_v29 = vadd.f32 %v8503_v6, %v1087_v11 }
 0x178   :  { %v8568_v22 = vand.u32 2147483647, %v8559_v10  ;;  %v1257_v33 = vmul.f32 %v1249_v12, %v1137_v39  ;;  %v8581_v32 = vmul.f32 0.5, %v8512_v18  ;;  %v1262_v42 = vmul.f32 1.442695, %v1254_v20  ;;  %v8616_v12 = vpop.f32.mrf.mxu1 }
 0x179   :  { %7558 = vrcp.f32 %v1151_v62  ;;  %v1146_v21 = vmul.f32 0.3275911, %v1138_v13  ;;  %v1156_v28 = vadd.f32 1.0, %v1148_v16  ;;  %v1255_v46 = vmul.f32 %v1247_v27, %v1135_v53 }
 0x17a   :  { %v1149_v14 = vmul.f32 0.3275911, %v8568_v22  ;;  %v1252_v41 = vsub.f32 0.0, %v1140_v9  ;;  %v8588_v48 = vmul.f32 0.70710677, %v8573_v29  ;;  %v7942_v18 = vmov -1.0  }
 0x17b   :  { %v1154_v34 = vadd.f32 1.0, %v1146_v21  ;;  %7560 = vrcp.f32 %v1156_v28  ;;  %v8593_v49 = vsel %vm1120_vm0, 1.0, %v7942_v18  ;;  %v1268_v52 = vmul.f32 1.442695, %v1257_v33 }
 0x17c   :  { %v1157_v43 = vadd.f32 1.0, %v1149_v14  ;;  %v1250_v53 = vsub.f32 0.0, %v1138_v13  ;;  %v8602_v59 = vsel %vm1118_vm1, 1.0, %v7942_v18  ;;  %v8605_v60 = vand.u32 2147483647, %v8588_v48 }
 0x17d   :  { %7562 = vrcp.f32 %v1154_v34  ;;  %v1264_v0 = vmul.f32 1.442695, %v1255_v46  ;;  %v1260_v1 = vmul.f32 %v1252_v41, %v1140_v9  ;;  %vm1121_vm2 = vcmp.ge.f32.partialorder %v8525_v35, 0.0 }
 0x17e   :  { %7564 = vpow2.f32 %v1266_v25  ;;  %v1147_v11 = vmul.f32 0.3275911, %v8605_v60  ;;  %v1258_v21 = vmul.f32 %v1250_v53, %v1138_v13  ;;  %v1253_v9 = vsub.f32 0.0, %v8568_v22 }
 0x17f   :  { %v8570_v23 = vpop.eup %7552  ;;  %7566 = vrcp.f32 %v1157_v43  ;;  %v1274_v14 = vmul.f32 1.442695, %v1260_v1  ;;  %v8627_v43 = vmul.f32 0.5, %v8519_v26  ;;  %v8632_v41 = vmul.f32 0.5, %v8528_v36 }
 0x180   :  { %v1176_v30 = vmul.f32 1.0614054, %v8570_v23  ;;  %7568 = vpow2.f32 %v1262_v42  ;;  %v1155_v28 = vadd.f32 1.0, %v1147_v11  ;;  %v1261_v53 = vmul.f32 %v1253_v9, %v8568_v22 }
 0x181   :  { %v8584_v38 = vpop.eup %7554  ;;  %7570 = vpow2.f32 %v1268_v52  ;;  %v1251_v22 = vsub.f32 0.0, %v8605_v60  ;;  %vm1119_vm3 = vcmp.ge.f32.partialorder %v8532_v45, 0.0  ;;  %vm1124_vm4 = vcmp.ge.f32.partialorder %v8547_v2, 0.0 }
 0x182   :  { %v1184_v40 = vadd.f32 -1.4531521, %v1176_v30  ;;  %v1174_v39 = vmul.f32 1.0614054, %v8584_v38  ;;  %7572 = vpow2.f32 %v1264_v0  ;;  %vm1122_vm5 = vcmp.ge.f32.partialorder %v8555_v7, 0.0 }
 0x183   :  { %v8590_v17 = vpop.eup %7556  ;;  %7574 = vrcp.f32 %v1155_v28  ;;  %vm1125_vm6 = vcmp.ge.f32.partialorder %v8559_v10, 0.0  ;;  %v1130_v2 = vsel %vm1122_vm5, 1.0, %v7942_v18  ;;  %vm1123_vm7 = vcmp.ge.f32.partialorder %v8588_v48, 0.0 }
 0x184   :  { %v1192_v51 = vmul.f32 %v8570_v23, %v1184_v40  ;;  %v1182_v55 = vadd.f32 -1.4531521, %v1174_v39  ;;  %v1177_v56 = vmul.f32 1.0614054, %v8590_v17  ;;  %7576 = vpow2.f32 %v1274_v14 }
 0x185   :  { %v8610_v4 = vpop.f32.mrf.mxu0 }
 0x186   :  { %v1200_v57 = vadd.f32 1.4214138, %v1192_v51  ;;  %v8607_v44 = vpop.eup %7558  ;;  %v1190_v61 = vmul.f32 %v8584_v38, %v1182_v55  ;;  %v1185_v62 = vadd.f32 -1.4531521, %v1177_v56  ;;  %v8620_v30 = vpop.f32.mrf.mxu1  ;;  %v1270_v51 = vmul.f32 1.442695, %v1258_v21 }
 0x187   :  { %v1175_v24 = vmul.f32 1.0614054, %v8607_v44  ;;  %v8623_v40 = vpop.f32.mrf.mxu0  ;;  %v8639_v56 = vsel %vm1121_vm2, 1.0, %v7942_v18 }
 0x188   :  { %v1208_v8 = vmul.f32 %v8570_v23, %v1200_v57  ;;  %v1198_v16 = vadd.f32 1.4214138, %v1190_v61  ;;  %v1193_v20 = vmul.f32 %v8590_v17, %v1185_v62  ;;  %v8634_v52 = vpop.eup %7560  ;;  %v8642_v57 = vpop.f32.mrf.mxu1  ;;  %7578 = vpow2.f32 %v1270_v51 }
 0x189   :  { %v1183_v27 = vadd.f32 -1.4531521, %v1175_v24  ;;  %v1180_v0 = vmul.f32 1.0614054, %v8634_v52  ;;  %v8648_v1 = vpop.f32.mrf.mxu0 }
 0x18a   :  { %v1216_v25 = vadd.f32 -0.28449672, %v1208_v8  ;;  %v1206_v33 = vmul.f32 %v8584_v38, %v1198_v16  ;;  %v1201_v34 = vadd.f32 1.4214138, %v1193_v20  ;;  %v8644_v61 = vpop.eup %7562 }
 0x18b   :  { %v1191_v13 = vmul.f32 %v8607_v44, %v1183_v27  ;;  %v1178_v24 = vmul.f32 1.0614054, %v8644_v61  ;;  %v7565_v11 = vpop.eup %7564  ;;  %v1188_v21 = vadd.f32 -1.4531521, %v1180_v0 }
 0x18c   :  { %v1224_v42 = vmul.f32 %v8570_v23, %v1216_v25  ;;  %v1214_v39 = vadd.f32 -0.28449672, %v1206_v33  ;;  %v1209_v46 = vmul.f32 %v8590_v17, %v1201_v34  ;;  %v8656_v25 = vpop.eup %7566  ;;  %v8658_v33 = vpop.f32.mrf.mxu1 }
 0x18d   :  { %v1199_v26 = vadd.f32 1.4214138, %v1191_v13  ;;  %v1186_v28 = vadd.f32 -1.4531521, %v1178_v24  ;;  %v7569_v34 = vpop.eup %7568  ;;  %v1196_v13 = vmul.f32 %v8634_v52, %v1188_v21 }
 0x18e   :  { %v1232_v55 = vadd.f32 0.2548296, %v1224_v42  ;;  %v1222_v62 = vmul.f32 %v8584_v38, %v1214_v39  ;;  %v1217_v36 = vadd.f32 -0.28449672, %v1209_v46  ;;  %v1181_v39 = vmul.f32 1.0614054, %v8656_v25  ;;  %v8663_v46 = vpop.f32.mrf.mxu0 }
 0x18f   :  { %v1207_v35 = vmul.f32 %v8607_v44, %v1199_v26  ;;  %v1194_v26 = vmul.f32 %v8644_v61, %v1186_v28  ;;  %v1204_v0 = vadd.f32 1.4214138, %v1196_v13  ;;  %v1597_v7 = vadd.f32 %v8663_v46, %v8552_v5 }
 0x190   :  { %v1240_v8 = vmul.f32 %v8570_v23, %v1232_v55  ;;  %v1230_v16 = vadd.f32 0.2548296, %v1222_v62  ;;  %v1225_v20 = vmul.f32 %v8590_v17, %v1217_v36  ;;  %v1276_v23 = vmul.f32 1.442695, %v1261_v53 }
 0x191   :  { %v1215_v9 = vadd.f32 -0.28449672, %v1207_v35  ;;  %v1259_v62 = vmul.f32 %v1251_v22, %v8605_v60  ;;  %v8674_v60 = vpop.f32.mrf.mxu0 }
 0x192   :  { %v1280_v27 = vmul.f32 %v7565_v11, %v1240_v8  ;;  %v1238_v14 = vmul.f32 %v8584_v38, %v1230_v16  ;;  %v1233_v42 = vadd.f32 0.2548296, %v1225_v20  ;;  %v1189_v8 = vadd.f32 -1.4531521, %v1181_v39  ;;  %v7571_v38 = vpop.eup %7570  ;;  %v8670_v16 = vpop.f32.mrf.mxu1 }
 0x193   :  { %v1223_v51 = vmul.f32 %v8607_v44, %v1215_v9  ;;  %v1202_v11 = vadd.f32 1.4214138, %v1194_v26  ;;  %7580 = vpow2.f32 %v1276_v23  ;;  %v7573_v22 = vpop.eup %7572 }
 0x194   :  { %v1288_v55 = vsub.f32 1.0, %v1280_v27  ;;  %v1278_v53 = vmul.f32 %v7569_v34, %v1238_v14  ;;  %v1241_v36 = vmul.f32 %v8590_v17, %v1233_v42  ;;  %v1212_v27 = vmul.f32 %v8634_v52, %v1204_v0  ;;  %v8678_v14 = vpop.f32.mrf.mxu1  ;;  %v8680_v23 = vpop.eup %7574 }
 0x195   :  { %v1231_v24 = vadd.f32 0.2548296, %v1223_v51  ;;  %v1197_v9 = vmul.f32 %v8656_v25, %v1189_v8  ;;  %v1210_v34 = vmul.f32 %v8644_v61, %v1202_v11 }
 0x196   :  { %v1296_v35 = vmul.f32 %v1288_v55, %v8593_v49  ;;  %v1286_v20 = vsub.f32 1.0, %v1278_v53  ;;  %v1281_v21 = vmul.f32 %v7571_v38, %v1241_v36  ;;  %v1272_v49 = vmul.f32 1.442695, %v1259_v62  ;;  %v8688_v38 = vpop.f32.mrf.mxu0 }
 0x197   :  { %v1239_v28 = vmul.f32 %v8607_v44, %v1231_v24  ;;  %v1220_v39 = vadd.f32 -0.28449672, %v1212_v27  ;;  %v1205_v55 = vadd.f32 1.4214138, %v1197_v9  ;;  %v1218_v53 = vadd.f32 -0.28449672, %v1210_v34 }
 0x198   :  { %v1304_v17 = vadd.f32 1.0, %v1296_v35  ;;  %v1294_v42 = vmul.f32 %v1286_v20, %v8602_v59  ;;  %v1289_v13 = vsub.f32 1.0, %v1281_v21  ;;  %v1179_v36 = vmul.f32 1.0614054, %v8680_v23  ;;  %v7577_v35 = vpop.eup %7576  ;;  %v8694_v20 = vpop.f32.mrf.mxu1 }
 0x199   :  { %v1279_v26 = vmul.f32 %v7573_v22, %v1239_v28  ;;  %v1228_v62 = vmul.f32 %v8634_v52, %v1220_v39  ;;  %v1213_v8 = vmul.f32 %v8656_v25, %v1205_v55  ;;  %v1127_v59 = vsel %vm1119_vm3, 1.0, %v7942_v18  ;;  %v7579_v22 = vpop.eup %7578  ;;  %v8702_v39 = vpop.f32.mrf.mxu0 }
 0x19a   :  { %v1312_v51 = vmul.f32 %v1304_v17, %v8565_v19  ;;  %v1302_v0 = vadd.f32 1.0, %v1294_v42  ;;  %v1297_v44 = vmul.f32 %v1289_v13, %v8639_v56  ;;  %v1226_v24 = vmul.f32 %v8644_v61, %v1218_v53  ;;  %v8707_v53 = vpop.f32.mrf.mxu1 }
 0x19b   :  { %v1287_v19 = vsub.f32 1.0, %v1279_v26  ;;  %v1187_v11 = vadd.f32 -1.4531521, %v1179_v36  ;;  %v1236_v27 = vadd.f32 0.2548296, %v1228_v62  ;;  %7582 = vpow2.f32 %v1272_v49 }
 0x19c   :  { %1320 = vst [vmem:[#allocation2 + $0x10] sm:$0xff] %v1312_v51  ;;  %v1310_v56 = vmul.f32 %v1302_v0, %v8581_v32  ;;  %v1305_v21 = vadd.f32 1.0, %v1297_v44  ;;  %v1221_v9 = vadd.f32 -0.28449672, %v1213_v8  ;;  %v1234_v28 = vadd.f32 0.2548296, %v1226_v24 }
 0x19d   :  { %v1295_v17 = vmul.f32 %v1287_v19, %v1127_v59  ;;  %v1195_v34 = vmul.f32 %v8680_v23, %v1187_v11  ;;  %v1244_v42 = vmul.f32 %v8634_v52, %v1236_v27  ;;  %v1602_v26 = vadd.f32 %v8610_v4, %v8521_v31 }
 0x19e   :  { %1318 = vst [vmem:[#allocation2] sm:$0xff] %v1310_v56  ;;  %v1313_v45 = vmul.f32 %v1305_v21, %v8627_v43  ;;  %v1229_v13 = vmul.f32 %v8656_v25, %v1221_v9  ;;  %v1242_v55 = vmul.f32 %v8644_v61, %v1234_v28  ;;  %v1108_v43 = vmul.f32 0.5, %v8541_v50 }
 0x19f   :  { %v1303_v32 = vadd.f32 1.0, %v1295_v17  ;;  %v1203_v51 = vadd.f32 1.4214138, %v1195_v34  ;;  %v1284_v49 = vmul.f32 %v7577_v35, %v1244_v42  ;;  %v1594_v61 = vadd.f32 %v8623_v40, %v8535_v47  ;;  %v8720_v35 = vpop.f32.mrf.mxu0  ;;  %v8724_v47 = vpop.f32.mrf.mxu1 }
 0x1a0   :  { %1321 = vst [vmem:[#allocation2 + $0x18] sm:$0xff] %v1313_v45  ;;  %v1237_v52 = vadd.f32 0.2548296, %v1229_v13  ;;  %v1282_v0 = vmul.f32 %v7579_v22, %v1242_v55  ;;  %v7581_v62 = vpop.eup %7580  ;;  %v1132_v31 = vsel %vm1124_vm4, 1.0, %v7942_v18  ;;  %v1106_v50 = vmul.f32 0.5, %v8544_v63 }
 0x1a1   :  { %v1311_v36 = vmul.f32 %v1303_v32, %v8632_v41  ;;  %v1211_v44 = vmul.f32 %v8680_v23, %v1203_v51  ;;  %v1292_v4 = vsub.f32 1.0, %v1284_v49  ;;  %v1775_v19 = vadd.f32 %v8620_v30, %v1602_v26 }
 0x1a2   :  { %v1245_v8 = vmul.f32 %v8656_v25, %v1237_v52  ;;  %v1290_v41 = vsub.f32 1.0, %v1282_v0  ;;  %v1605_v63 = vadd.f32 %v8648_v1, %v8538_v58  ;;  %v1773_v10 = vadd.f32 %v8642_v57, %v1594_v61 }
 0x1a3   :  { %1319 = vst [vmem:[#allocation2 + $0x8] sm:$0xff] %v1311_v36  ;;  %v1219_v59 = vadd.f32 -0.28449672, %v1211_v44  ;;  %v1300_v40 = vmul.f32 %v1292_v4, %v1132_v31  ;;  %v1133_v9 = vsel %vm1125_vm6, 1.0, %v7942_v18  ;;  %v1109_v13 = vmul.f32 0.5, %v8550_v3 }
 0x1a4   :  { %v1285_v24 = vmul.f32 %v7581_v62, %v1245_v8  ;;  %v1298_v11 = vmul.f32 %v1290_v41, %v1130_v2  ;;  %v1776_v57 = vadd.f32 %v8658_v33, %v1605_v63  ;;  %v1618_v3 = vadd.f32 %v8674_v60, %v8562_v15 }
 0x1a5   :  { %v6836_v25 = vpop.f32.mrf.mxu0  ;;  %v1227_v56 = vmul.f32 %v8680_v23, %v1219_v59  ;;  %v1308_v30 = vadd.f32 1.0, %v1300_v40  ;;  %v1774_v44 = vadd.f32 %v8670_v16, %v1597_v7  ;;  %v1131_v60 = vsel %vm1123_vm7, 1.0, %v7942_v18 }
 0x1a6   :  { %v1932_v21 = vadd.f32 %v6836_v25, %v1775_v19  ;;  %v6860_v27 = vpop.f32.mrf.mxu1  ;;  %v1293_v22 = vsub.f32 1.0, %v1285_v24  ;;  %v1306_v28 = vadd.f32 1.0, %v1298_v11  ;;  %v1610_v40 = vadd.f32 %v8688_v38, %v8577_v37 }
 0x1a7   :  { %v1899_v17 = vpop.f32.mrf.mxu0  ;;  %v1235_v34 = vadd.f32 0.2548296, %v1227_v56  ;;  %v1316_v42 = vmul.f32 %v1308_v30, %v1108_v43  ;;  %v1779_v2 = vadd.f32 %v8678_v14, %v1618_v3  ;;  %v1107_v25 = vmul.f32 0.5, %v8573_v29 }
 0x1a8   :  { %v2089_v45 = vadd.f32 %v6860_v27, %v1932_v21  ;;  %v1930_v58 = vadd.f32 %v1899_v17, %v1773_v10  ;;  %v2056_v1 = vpop.f32.mrf.mxu1  ;;  %v1301_v32 = vmul.f32 %v1293_v22, %v1133_v9  ;;  %v1314_v51 = vmul.f32 %v1306_v28, %v1106_v50  ;;  %v7583_v52 = vpop.eup %7582 }
 0x1a9   :  { %v6837_v55 = vpop.f32.mrf.mxu0  ;;  %v1243_v26 = vmul.f32 %v8680_v23, %v1235_v34  ;;  %1324 = vst [vmem:[#allocation2 + $0x30] sm:$0xff] %v1316_v42  ;;  %v1621_v9 = vadd.f32 %v8702_v39, %v8596_v54  ;;  %v1777_v22 = vadd.f32 %v8694_v20, %v1610_v40  ;;  %v1613_v7 = vadd.f32 %v8720_v35, %v8616_v12 }
 0x1aa   :  { %v8740_v49 = vadd.f32 %v8503_v6, %v2089_v45  ;;  %v2087_v5 = vadd.f32 %v2056_v1, %v1930_v58  ;;  %v6861_v46 = vpop.f32.mrf.mxu1  ;;  %v1309_v36 = vadd.f32 1.0, %v1301_v32  ;;  %v1933_v43 = vadd.f32 %v6837_v55, %v1776_v57  ;;  %1322 = vst [vmem:[#allocation2 + $0x20] sm:$0xff] %v1314_v51 }
 0x1ab   :  { %v1902_v0 = vpop.f32.mrf.mxu0  ;;  %v1283_v33 = vmul.f32 %v7583_v52, %v1243_v26  ;;  %v1780_v39 = vadd.f32 %v8707_v53, %v1621_v9 }
 0x1ac   :  { %v8747_v23 = vmul.f32 0.70710677, %v8740_v49  ;;  %v8750_v61 = vadd.f32 %v8503_v6, %v2087_v5  ;;  %v1317_v62 = vmul.f32 %v1309_v36, %v1109_v13  ;;  %v2090_v31 = vadd.f32 %v6861_v46, %v1933_v43  ;;  %v2059_v15 = vpop.f32.mrf.mxu1 }
 0x1ad   :  { %v6840_v4 = vpop.f32.mrf.mxu0  ;;  %v1291_v50 = vsub.f32 1.0, %v1283_v33  ;;  %v1931_v41 = vadd.f32 %v1902_v0, %v1774_v44  ;;  %v1778_v13 = vadd.f32 %v8724_v47, %v1613_v7 }
 0x1ae   :  { %v2137_v8 = vand.u32 2147483647, %v8747_v23  ;;  %1325 = vst [vmem:[#allocation2 + $0x38] sm:$0x3f] %v1317_v62  ;;  %v8757_v16 = vmul.f32 0.70710677, %v8750_v61  ;;  %v8760_v59 = vadd.f32 %v8503_v6, %v2090_v31  ;;  %v1936_v27 = vadd.f32 %v6840_v4, %v1779_v2  ;;  %v6864_v30 = vpop.f32.mrf.mxu1 }
 0x1af   :  { %v1299_v19 = vmul.f32 %v1291_v50, %v1131_v60  ;;  %v1915_v63 = vpop.f32.mrf.mxu0  ;;  %v2088_v21 = vadd.f32 %v2059_v15, %v1931_v41  ;;  %vm2121_vm8 = vcmp.ge.f32.partialorder %v8747_v23, 0.0 }
 0x1b0   :  { %v2145_v24 = vmul.f32 0.3275911, %v2137_v8  ;;  %v2135_v11 = vand.u32 2147483647, %v8757_v16  ;;  %v8768_v48 = vmul.f32 0.70710677, %v8760_v59  ;;  %v2093_v45 = vadd.f32 %v6864_v30, %v1936_v27  ;;  %v2072_v54 = vpop.f32.mrf.mxu1 }
 0x1b1   :  { %v1307_v56 = vadd.f32 1.0, %v1299_v19  ;;  %v6841_v29 = vpop.f32.mrf.mxu0  ;;  %v8777_v34 = vadd.f32 %v8503_v6, %v2088_v21  ;;  %v1934_v58 = vadd.f32 %v1915_v63, %v1777_v22  ;;  %v2249_v32 = vsub.f32 0.0, %v2137_v8 }
 0x1b2   :  { %v2153_v10 = vadd.f32 1.0, %v2145_v24  ;;  %v2143_v37 = vmul.f32 0.3275911, %v2135_v11  ;;  %v2138_v14 = vand.u32 2147483647, %v8768_v48  ;;  %v8784_v42 = vadd.f32 %v8503_v6, %v2093_v45  ;;  %v6865_v51 = vpop.f32.mrf.mxu1 }
 0x1b3   :  { %v1315_v38 = vmul.f32 %v1307_v56, %v1107_v25  ;;  %v8781_v20 = vmul.f32 0.70710677, %v8777_v34  ;;  %v2091_v12 = vadd.f32 %v2072_v54, %v1934_v58  ;;  %v1918_v35 = vpop.f32.mrf.mxu0  ;;  %v1937_v57 = vadd.f32 %v6841_v29, %v1780_v39 }
 0x1b4   :  { %7584 = vrcp.f32 %v2153_v10  ;;  %v2151_v17 = vadd.f32 1.0, %v2143_v37  ;;  %v2146_v28 = vmul.f32 0.3275911, %v2138_v14  ;;  %v8789_v53 = vmul.f32 0.70710677, %v8784_v42  ;;  %v2075_v44 = vpop.f32.mrf.mxu1 }
 0x1b5   :  { %1323 = vst [vmem:[#allocation2 + $0x28] sm:$0xff] %v1315_v38  ;;  %v2136_v55 = vand.u32 2147483647, %v8781_v20  ;;  %v8792_v26 = vadd.f32 %v8503_v6, %v2091_v12  ;;  %v1935_v5 = vadd.f32 %v1918_v35, %v1778_v13  ;;  %v2094_v52 = vadd.f32 %v6865_v51, %v1937_v57 }
 0x1b6   :  { %7586 = vrcp.f32 %v2151_v17  ;;  %v2154_v1 = vadd.f32 1.0, %v2146_v28  ;;  %v2257_v36 = vmul.f32 %v2249_v32, %v2137_v8  ;;  %v2247_v3 = vsub.f32 0.0, %v2135_v11 }
 0x1b7   :  { %v2144_v46 = vmul.f32 0.3275911, %v2136_v55  ;;  %v2141_v43 = vand.u32 2147483647, %v8789_v53  ;;  %v8796_v47 = vmul.f32 0.70710677, %v8792_v26  ;;  %v8799_v33 = vadd.f32 %v8503_v6, %v2094_v52 }
 0x1b8   :  { %7588 = vrcp.f32 %v2154_v1  ;;  %v2250_v62 = vsub.f32 0.0, %v2138_v14  ;;  %v2092_v50 = vadd.f32 %v2075_v44, %v1935_v5  ;;  %v2267_v8 = vmul.f32 1.442695, %v2257_v36 }
 0x1b9   :  { %v2152_v0 = vadd.f32 1.0, %v2144_v46  ;;  %v2149_v31 = vmul.f32 0.3275911, %v2141_v43  ;;  %v2139_v4 = vand.u32 2147483647, %v8796_v47  ;;  %v2255_v15 = vmul.f32 %v2247_v3, %v2135_v11 }
 0x1ba   :  { %v8806_v2 = vmul.f32 0.70710677, %v8799_v33  ;;  %v2258_v24 = vmul.f32 %v2250_v62, %v2138_v14  ;;  %v8809_v25 = vadd.f32 %v8503_v6, %v2092_v50  ;;  %v8814_v10 = vmul.f32 0.5, %v8740_v49 }
 0x1bb   :  { %7590 = vrcp.f32 %v2152_v0  ;;  %v2157_v60 = vadd.f32 1.0, %v2149_v31  ;;  %v2147_v19 = vmul.f32 0.3275911, %v2139_v4  ;;  %v2248_v11 = vsub.f32 0.0, %v2136_v55 }
 0x1bc   :  { %v2142_v27 = vand.u32 2147483647, %v8806_v2  ;;  %v2263_v9 = vmul.f32 1.442695, %v2255_v15  ;;  %v8821_v6 = vmul.f32 0.5, %v8750_v61  ;;  %v2253_v54 = vsub.f32 0.0, %v2141_v43 }
 0x1bd   :  { %7592 = vrcp.f32 %v2157_v60  ;;  %v2155_v63 = vadd.f32 1.0, %v2147_v19  ;;  %v2269_v22 = vmul.f32 1.442695, %v2258_v24  ;;  %v8826_v29 = vmul.f32 0.70710677, %v8809_v25 }
 0x1be   :  { %7594 = vpow2.f32 %v2267_v8  ;;  %v2150_v14 = vmul.f32 0.3275911, %v2142_v27  ;;  %v2256_v28 = vmul.f32 %v2248_v11, %v2136_v55  ;;  %v2251_v12 = vsub.f32 0.0, %v2139_v4 }
 0x1bf   :  { %7596 = vrcp.f32 %v2155_v63  ;;  %v2140_v61 = vand.u32 2147483647, %v8826_v29  ;;  %v2129_v35 = vsel %vm2121_vm8, 1.0, %v7942_v18  ;;  %vm2119_vm9 = vcmp.ge.f32.partialorder %v8757_v16, 0.0 }
 0x1c0   :  { %v2158_v45 = vadd.f32 1.0, %v2150_v14  ;;  %7598 = vpow2.f32 %v2263_v9  ;;  %v2265_v51 = vmul.f32 1.442695, %v2256_v28  ;;  %v2261_v52 = vmul.f32 %v2253_v54, %v2141_v43 }
 0x1c1   :  { %v8802_v41 = vpop.eup %7584  ;;  %v2148_v32 = vmul.f32 0.3275911, %v2140_v61  ;;  %v2254_v36 = vsub.f32 0.0, %v2142_v27  ;;  %v2259_v62 = vmul.f32 %v2251_v12, %v2139_v4  ;;  %v2127_v31 = vsel %vm2119_vm9, 1.0, %v7942_v18 }
 0x1c2   :  { %v2177_v40 = vmul.f32 1.0614054, %v8802_v41  ;;  %7600 = vrcp.f32 %v2158_v45  ;;  %vm2122_vm10 = vcmp.ge.f32.partialorder %v8768_v48, 0.0  ;;  %v2275_v4 = vmul.f32 1.442695, %v2261_v52 }
 0x1c3   :  { %v8811_v56 = vpop.eup %7586  ;;  %7602 = vpow2.f32 %v2269_v22  ;;  %v2156_v3 = vadd.f32 1.0, %v2148_v32  ;;  %v2262_v24 = vmul.f32 %v2254_v36, %v2142_v27  ;;  %v2130_v14 = vsel %vm2122_vm10, 1.0, %v7942_v18 }
 0x1c4   :  { %v2185_v21 = vadd.f32 -1.4531521, %v2177_v40  ;;  %v2175_v30 = vmul.f32 1.0614054, %v8811_v56  ;;  %v2252_v22 = vsub.f32 0.0, %v2140_v61  ;;  %vm2120_vm11 = vcmp.ge.f32.partialorder %v8781_v20, 0.0 }
 0x1c5   :  { %v8823_v38 = vpop.eup %7588  ;;  %7604 = vrcp.f32 %v2156_v3  ;;  %vm2125_vm12 = vcmp.ge.f32.partialorder %v8789_v53, 0.0  ;;  %vm2123_vm13 = vcmp.ge.f32.partialorder %v8796_v47, 0.0  ;;  %vm2126_vm14 = vcmp.ge.f32.partialorder %v8806_v2, 0.0 }
 0x1c6   :  { %v2193_v37 = vmul.f32 %v8802_v41, %v2185_v21  ;;  %v2183_v49 = vadd.f32 -1.4531521, %v2175_v30  ;;  %v2178_v17 = vmul.f32 1.0614054, %v8823_v38  ;;  %7606 = vpow2.f32 %v2265_v51 }
 0x1c7   :  { %v2271_v30 = vmul.f32 1.442695, %v2259_v62  ;;  %7608 = vpow2.f32 %v2275_v4  ;;  %vm2124_vm15 = vcmp.ge.f32.partialorder %v8826_v29, 0.0  ;;  %v2110_v2 = vmul.f32 0.5, %v8799_v33 }
 0x1c8   :  { %v2201_v7 = vadd.f32 1.4214138, %v2193_v37  ;;  %v2191_v58 = vmul.f32 %v8811_v56, %v2183_v49  ;;  %v2186_v1 = vadd.f32 -1.4531521, %v2178_v17  ;;  %v8837_v5 = vpop.eup %7590 }
 0x1c9   :  { %v2176_v44 = vmul.f32 1.0614054, %v8837_v5  ;;  %7610 = vpow2.f32 %v2271_v30 }
 0x1ca   :  { %v2209_v39 = vmul.f32 %v8802_v41, %v2201_v7  ;;  %v2199_v13 = vadd.f32 1.4214138, %v2191_v58  ;;  %v2194_v55 = vmul.f32 %v8823_v38, %v2186_v1  ;;  %v8846_v8 = vpop.eup %7592  ;;  %v2277_v58 = vmul.f32 1.442695, %v2262_v24 }
 0x1cb   :  { %v2184_v60 = vadd.f32 -1.4531521, %v2176_v44  ;;  %v2181_v40 = vmul.f32 1.0614054, %v8846_v8  ;;  %v7595_v63 = vpop.eup %7594 }
 0x1cc   :  { %v2217_v57 = vadd.f32 -0.28449672, %v2209_v39  ;;  %v2207_v46 = vmul.f32 %v8811_v56, %v2199_v13  ;;  %v2202_v23 = vadd.f32 1.4214138, %v2194_v55  ;;  %v8853_v9 = vpop.eup %7596  ;;  %v2260_v55 = vmul.f32 %v2252_v22, %v2140_v61 }
 0x1cd   :  { %v2192_v11 = vmul.f32 %v8837_v5, %v2184_v60  ;;  %v2189_v49 = vadd.f32 -1.4531521, %v2181_v40  ;;  %v2179_v28 = vmul.f32 1.0614054, %v8853_v9  ;;  %v7599_v54 = vpop.eup %7598  ;;  %7612 = vpow2.f32 %v2277_v58 }
 0x1ce   :  { %v2225_v0 = vmul.f32 %v8802_v41, %v2217_v57  ;;  %v2215_v50 = vadd.f32 -0.28449672, %v2207_v46  ;;  %v2210_v43 = vmul.f32 %v8823_v38, %v2202_v23  ;;  %v2273_v60 = vmul.f32 1.442695, %v2260_v55 }
 0x1cf   :  { %v2200_v27 = vadd.f32 1.4214138, %v2192_v11  ;;  %v2197_v45 = vmul.f32 %v8846_v8, %v2189_v49  ;;  %v2187_v12 = vadd.f32 -1.4531521, %v2179_v28  ;;  %v8863_v13 = vpop.eup %7600 }
 0x1d0   :  { %v2233_v15 = vadd.f32 0.2548296, %v2225_v0  ;;  %v2223_v19 = vmul.f32 %v8811_v56, %v2215_v50  ;;  %v2218_v21 = vadd.f32 -0.28449672, %v2210_v43  ;;  %v7603_v36 = vpop.eup %7602  ;;  %v2182_v23 = vmul.f32 1.0614054, %v8863_v13 }
 0x1d1   :  { %v2208_v48 = vmul.f32 %v8837_v5, %v2200_v27  ;;  %v2205_v57 = vadd.f32 1.4214138, %v2197_v45  ;;  %v2195_v52 = vmul.f32 %v8853_v9, %v2187_v12  ;;  %v2106_v27 = vmul.f32 0.5, %v8760_v59 }
 0x1d2   :  { %v2241_v16 = vmul.f32 %v8802_v41, %v2233_v15  ;;  %v2231_v37 = vadd.f32 0.2548296, %v2223_v19  ;;  %v2226_v17 = vmul.f32 %v8823_v38, %v2218_v21  ;;  %7614 = vpow2.f32 %v2273_v60 }
 0x1d3   :  { %v2213_v0 = vmul.f32 %v8846_v8, %v2205_v57  ;;  %v2203_v15 = vadd.f32 1.4214138, %v2195_v52 }
 0x1d4   :  { %v2281_v7 = vmul.f32 %v7595_v63, %v2241_v16  ;;  %v2239_v41 = vmul.f32 %v8811_v56, %v2231_v37  ;;  %v2234_v1 = vadd.f32 0.2548296, %v2226_v17  ;;  %v2216_v56 = vadd.f32 -0.28449672, %v2208_v48 }
 0x1d5   :  { %v2221_v61 = vadd.f32 -0.28449672, %v2213_v0  ;;  %v2211_v24 = vmul.f32 %v8853_v9, %v2203_v15  ;;  %v2131_v15 = vsel %vm2123_vm13, 1.0, %v7942_v18 }
 0x1d6   :  { %v2289_v39 = vsub.f32 1.0, %v2281_v7  ;;  %v2279_v32 = vmul.f32 %v7599_v54, %v2239_v41  ;;  %v2242_v46 = vmul.f32 %v8823_v38, %v2234_v1  ;;  %v2224_v50 = vmul.f32 %v8837_v5, %v2216_v56  ;;  %v8870_v38 = vpop.eup %7604 }
 0x1d7   :  { %v7607_v63 = vpop.eup %7606  ;;  %v2229_v21 = vmul.f32 %v8846_v8, %v2221_v61  ;;  %v2180_v30 = vmul.f32 1.0614054, %v8870_v38  ;;  %v2219_v49 = vadd.f32 -0.28449672, %v2211_v24 }
 0x1d8   :  { %v2297_v51 = vmul.f32 %v2289_v39, %v2129_v35  ;;  %v2287_v3 = vsub.f32 1.0, %v2279_v32  ;;  %v2282_v62 = vmul.f32 %v7603_v36, %v2242_v46  ;;  %v2190_v35 = vadd.f32 -1.4531521, %v2182_v23 }
 0x1d9   :  { %v2232_v4 = vadd.f32 0.2548296, %v2224_v50  ;;  %v2237_v22 = vadd.f32 0.2548296, %v2229_v21  ;;  %v2188_v17 = vadd.f32 -1.4531521, %v2180_v30  ;;  %v2227_v45 = vmul.f32 %v8853_v9, %v2219_v49 }
 0x1da   :  { %v2305_v44 = vadd.f32 1.0, %v2297_v51  ;;  %v2295_v43 = vmul.f32 %v2287_v3, %v2127_v31  ;;  %v2290_v40 = vsub.f32 1.0, %v2282_v62  ;;  %v2198_v11 = vmul.f32 %v8863_v13, %v2190_v35 }
 0x1db   :  { %v2240_v37 = vmul.f32 %v8837_v5, %v2232_v4  ;;  %v2245_v58 = vmul.f32 %v8846_v8, %v2237_v22  ;;  %v2196_v54 = vmul.f32 %v8870_v38, %v2188_v17  ;;  %v7609_v5 = vpop.eup %7608  ;;  %v2235_v59 = vadd.f32 0.2548296, %v2227_v45 }
 0x1dc   :  { %v2313_v19 = vmul.f32 %v2305_v44, %v8814_v10  ;;  %v2303_v16 = vadd.f32 1.0, %v2295_v43  ;;  %v2298_v31 = vmul.f32 %v2290_v40, %v2130_v14  ;;  %v2206_v7 = vadd.f32 1.4214138, %v2198_v11  ;;  %v7611_v57 = vpop.eup %7610 }
 0x1dd   :  { %v2280_v41 = vmul.f32 %v7607_v63, %v2240_v37  ;;  %v2285_v48 = vmul.f32 %v7609_v5, %v2245_v58  ;;  %v2204_v32 = vadd.f32 1.4214138, %v2196_v54  ;;  %v2243_v55 = vmul.f32 %v8853_v9, %v2235_v59  ;;  %v7613_v52 = vpop.eup %7612 }
 0x1de   :  { %2321 = vst [vmem:[#allocation2 + $0x50] sm:$0xff] %v2313_v19  ;;  %v2311_v10 = vmul.f32 %v2303_v16, %v8821_v6  ;;  %v2306_v28 = vadd.f32 1.0, %v2298_v31  ;;  %v2214_v14 = vmul.f32 %v8863_v13, %v2206_v7  ;;  %v2128_v6 = vsel %vm2120_vm11, 1.0, %v7942_v18 }
 0x1df   :  { %v2288_v1 = vsub.f32 1.0, %v2280_v41  ;;  %v2104_v51 = vmul.f32 0.5, %v8777_v34  ;;  %v2293_v46 = vsub.f32 1.0, %v2285_v48  ;;  %v2212_v20 = vmul.f32 %v8870_v38, %v2204_v32  ;;  %v7615_v63 = vpop.eup %7614 }
 0x1e0   :  { %2319 = vst [vmem:[#allocation2 + $0x40] sm:$0xff] %v2311_v10  ;;  %v2314_v39 = vmul.f32 %v2306_v28, %v2106_v27  ;;  %v2222_v12 = vadd.f32 -0.28449672, %v2214_v14  ;;  %v2133_v3 = vsel %vm2125_vm12, 1.0, %v7942_v18  ;;  %v2283_v53 = vmul.f32 %v7611_v57, %v2243_v55 }
 0x1e1   :  { %v2296_v8 = vmul.f32 %v2288_v1, %v2128_v6  ;;  %v2301_v0 = vmul.f32 %v2293_v46, %v2133_v3  ;;  %v2220_v44 = vadd.f32 -0.28449672, %v2212_v20  ;;  %v2109_v9 = vmul.f32 0.5, %v8784_v42 }
 0x1e2   :  { %2322 = vst [vmem:[#allocation2 + $0x58] sm:$0xff] %v2314_v39  ;;  %v2230_v56 = vmul.f32 %v8863_v13, %v2222_v12  ;;  %v2291_v50 = vsub.f32 1.0, %v2283_v53  ;;  %v2107_v40 = vmul.f32 0.5, %v8792_v26  ;;  %v2132_v26 = vsel %vm2124_vm15, 1.0, %v7942_v18 }
 0x1e3   :  { %v2304_v36 = vadd.f32 1.0, %v2296_v8  ;;  %v2309_v34 = vadd.f32 1.0, %v2301_v0  ;;  %v2228_v61 = vmul.f32 %v8870_v38, %v2220_v44 }
 0x1e4   :  { %v2238_v23 = vadd.f32 0.2548296, %v2230_v56  ;;  %v2299_v35 = vmul.f32 %v2291_v50, %v2131_v15 }
 0x1e5   :  { %v2312_v62 = vmul.f32 %v2304_v36, %v2104_v51  ;;  %v2317_v60 = vmul.f32 %v2309_v34, %v2109_v9  ;;  %v2236_v19 = vadd.f32 0.2548296, %v2228_v61 }
 0x1e6   :  { %v2246_v43 = vmul.f32 %v8863_v13, %v2238_v23  ;;  %v2307_v4 = vadd.f32 1.0, %v2299_v35  ;;  %v2134_v13 = vsel %vm2126_vm14, 1.0, %v7942_v18 }
 0x1e7   :  { %2320 = vst [vmem:[#allocation2 + $0x48] sm:$0xff] %v2312_v62  ;;  %2325 = vst [vmem:[#allocation2 + $0x70] sm:$0xff] %v2317_v60  ;;  %v2244_v24 = vmul.f32 %v8870_v38, %v2236_v19  ;;  %v2108_v38 = vmul.f32 0.5, %v8809_v25 }
 0x1e8   :  { %v2286_v47 = vmul.f32 %v7613_v52, %v2246_v43  ;;  %v2315_v16 = vmul.f32 %v2307_v4, %v2107_v40 }
 0x1e9   :  { %v2284_v11 = vmul.f32 %v7615_v63, %v2244_v24 }
 0x1ea   :  { %v2294_v42 = vsub.f32 1.0, %v2286_v47  ;;  %2323 = vst [vmem:[#allocation2 + $0x60] sm:$0xff] %v2315_v16 }
 0x1eb   :  { %v2292_v31 = vsub.f32 1.0, %v2284_v11 }
 0x1ec   :  { %v2302_v21 = vmul.f32 %v2294_v42, %v2134_v13 }
 0x1ed   :  { %v2300_v49 = vmul.f32 %v2292_v31, %v2132_v26 }
 0x1ee   :  { %v2310_v30 = vadd.f32 1.0, %v2302_v21 }
 0x1ef   :  { %v2308_v10 = vadd.f32 1.0, %v2300_v49 }
 0x1f0   :  { %v2318_v37 = vmul.f32 %v2310_v30, %v2110_v2 }
 0x1f1   :  { %v2316_v22 = vmul.f32 %v2308_v10, %v2108_v38 }
 0x1f2   :  { %2326 = vst [vmem:[#allocation2 + $0x78] sm:$0x3f] %v2318_v37 }
 0x1f3   :  { %2324 = vst [vmem:[#allocation2 + $0x68] sm:$0xff] %v2316_v22 }
 0x1f4   :  { %7931 = dma.done.wait [#allocation9 + $0x1], 3072 }
 0x1f5   :  { %7932 = vsyncadd [#allocation9 + $0x1], 4294964224  ;;  %v7616_v7 = vld [vmem:[#allocation5 + $0x78] sm:$0xff]   ;;  %v7618_v17 = vld [vmem:[#allocation5 + $0x70] sm:$0xff]  }
 0x1f6   :  { %v7617_v29 = vld [vmem:[#allocation5 + $0x38] sm:$0xff]   ;;  %6866 = vmatprep.subr.bf16.mxu0 %v7616_v7  ;;  %v7619_v33 = vld [vmem:[#allocation5 + $0x30] sm:$0xff]   ;;  %v7620_v27 = vld [vmem:[#allocation5 + $0x68] sm:$0xff]  }
 0x1f7   :  { %6886 = vmatprep.subr.bf16.mxu1 %v7617_v29  ;;  %6867 = vmatpush3.bf16.msra.mxu0 %v7616_v7  ;;  %v7621_v28 = vld [vmem:[#allocation5 + $0x28] sm:$0xff]   ;;  %v7622_v25 = vld [vmem:[#allocation5 + $0x60] sm:$0xff]   ;;  %v7624_v45 = vld [vmem:[#allocation5 + $0x58] sm:$0xff]  }
 0x1f8   :  { %6887 = vmatpush3.bf16.msra.mxu1 %v7617_v29  ;;  %6868 = vmatprep.subr.bf16.mxu0 %v7618_v17  ;;  %v7623_v41 = vld [vmem:[#allocation5 + $0x20] sm:$0xff]   ;;  %v7625_v58 = vld [vmem:[#allocation5 + $0x18] sm:$0xff]   ;;  %v7626_v14 = vld [vmem:[#allocation5 + $0x50] sm:$0xff]  }
 0x1f9   :  { %6888 = vmatprep.subr.bf16.mxu1 %v7619_v33  ;;  %v2359_v54 = vld [vmem:[#allocation2 + $0x1] ss:$2 sm:$0xff]  ;;  %v2361_v5 = vld [vmem:[#allocation2 + $0x11] ss:$2 sm:$0xff]  ;;  %v2333_v39 = vld [vmem:[#allocation2] ss:$2 sm:$0xff] }
 0x1fa   :  { %v7627_v6 = vld [vmem:[#allocation5 + $0x10] sm:$0xff]   ;;  %v2366_v1 = vpack.c.bf16 %v2361_v5, %v2359_v54  ;;  %v7628_v12 = vld [vmem:[#allocation5 + $0x48] sm:$0xff]   ;;  %v7630_v57 = vld [vmem:[#allocation5 + $0x40] sm:$0xff]  }
 0x1fb   :  { %6869 = vmatpush3.bf16.msra.mxu0 %v7618_v17  ;;  %v2335_v59 = vld [vmem:[#allocation2 + $0x10] ss:$2 sm:$0xff]  ;;  %v7629_v32 = vld [vmem:[#allocation5 + $0x8] sm:$0xff]   ;;  %v7631_v8 = vld [vmem:[#allocation5] sm:$0xff]  }
 0x1fc   :  { %6889 = vmatpush3.bf16.msra.mxu1 %v7619_v33  ;;  %6870 = vmatprep.subr.bf16.mxu0 %v7620_v27  ;;  %v2340_v48 = vpack.c.bf16 %v2335_v59, %v2333_v39  ;;  %v2365_v55 = vld [vmem:[#allocation2 + $0x31] ss:$2 sm:$0x3f]  ;;  %v2363_v51 = vld [vmem:[#allocation2 + $0x21] ss:$2 sm:$0xff] }
 0x1fd   :  { %6890 = vmatprep.subr.bf16.mxu1 %v7621_v28  ;;  %6882 = vmatprep.mubr.bf16.mxu0 %v2366_v1  ;;  %v2339_v46 = vld [vmem:[#allocation2 + $0x30] ss:$2 sm:$0x3f]  ;;  %v2337_v56 = vld [vmem:[#allocation2 + $0x20] ss:$2 sm:$0xff]  ;;  %v2367_v36 = vpack.c.bf16 %v2365_v55, %v2363_v51 }
 0x1fe   :  { %6902 = vmatprep.mubr.bf16.mxu1 %v2340_v48  ;;  %v7632_v20 = vld [vmem:[#allocation5 + $0xb8] sm:$0xff]   ;;  %v2341_v3 = vpack.c.bf16 %v2339_v46, %v2337_v56  ;;  %v7634_v53 = vld [vmem:[#allocation5 + $0xb0] sm:$0xff]   ;;  %v2854_v62 = vld [vmem:[#allocation2 + $0x41] ss:$2 sm:$0xff] }
 0x1ff   :  { %6871 = vmatpush3.bf16.msra.mxu0 %v7620_v27  ;;  %v7633_v52 = vld [vmem:[#allocation5 + $0x78] sm:$0xff]   ;;  %v7635_v0 = vld [vmem:[#allocation5 + $0x70] sm:$0xff]   ;;  %v7636_v9 = vld [vmem:[#allocation5 + $0xa8] sm:$0xff]  }
 0x200   :  { %6891 = vmatpush3.bf16.msra.mxu1 %v7621_v28  ;;  %6872 = vmatprep.subr.bf16.mxu0 %v7622_v25  ;;  %v2580_v23 = vld [vmem:[#allocation2 + $0x2] ss:$2 sm:$0xff]  ;;  %v2582_v44 = vld [vmem:[#allocation2 + $0x12] ss:$2 sm:$0xff]  ;;  %v2856_v34 = vld [vmem:[#allocation2 + $0x51] ss:$2 sm:$0xff] }
 0x201   :  { %6892 = vmatprep.subr.bf16.mxu1 %v7623_v41  ;;  %v2587_v50 = vpack.c.bf16 %v2582_v44, %v2580_v23  ;;  %v7637_v15 = vld [vmem:[#allocation5 + $0x68] sm:$0xff]   ;;  %v2861_v43 = vpack.c.bf16 %v2856_v34, %v2854_v62  ;;  %v7638_v61 = vld [vmem:[#allocation5 + $0xa0] sm:$0xff]   ;;  %v7640_v60 = vld [vmem:[#allocation5 + $0x98] sm:$0xff]  }
 0x202   :  { %v7639_v35 = vld [vmem:[#allocation5 + $0x60] sm:$0xff]   ;;  %v7641_v47 = vld [vmem:[#allocation5 + $0x58] sm:$0xff]   ;;  %v7642_v19 = vld [vmem:[#allocation5 + $0x90] sm:$0xff]  }
 0x203   :  { %6873 = vmatpush3.bf16.msra.mxu0 %v7622_v25  ;;  %v7643_v40 = vld [vmem:[#allocation5 + $0x50] sm:$0xff]   ;;  %v7644_v4 = vld [vmem:[#allocation5 + $0x88] sm:$0xff]   ;;  %v7646_v24 = vld [vmem:[#allocation5 + $0x80] sm:$0xff]  }
 0x204   :  { %6893 = vmatpush3.bf16.msra.mxu1 %v7623_v41  ;;  %6874 = vmatprep.subr.bf16.mxu0 %v7624_v45  ;;  %v7645_v42 = vld [vmem:[#allocation5 + $0x48] sm:$0xff]   ;;  %v7647_v63 = vld [vmem:[#allocation5 + $0x40] sm:$0xff]   ;;  %v2586_v13 = vld [vmem:[#allocation2 + $0x32] ss:$2 sm:$0x3f] }
 0x205   :  { %6894 = vmatprep.subr.bf16.mxu1 %v7625_v58  ;;  %v2584_v16 = vld [vmem:[#allocation2 + $0x22] ss:$2 sm:$0xff]  ;;  %v2858_v21 = vld [vmem:[#allocation2 + $0x61] ss:$2 sm:$0xff]  ;;  %v7648_v2 = vld [vmem:[#allocation5 + $0x38] sm:$0xff]  }
 0x206   :  { %v2860_v11 = vld [vmem:[#allocation2 + $0x71] ss:$2 sm:$0x3f]  ;;  %v2588_v31 = vpack.c.bf16 %v2586_v13, %v2584_v16  ;;  %v2828_v26 = vld [vmem:[#allocation2 + $0x40] ss:$2 sm:$0xff] }
 0x207   :  { %6875 = vmatpush3.bf16.msra.mxu0 %v7624_v45  ;;  %v7649_v30 = vld [vmem:[#allocation5 + $0xb8] sm:$0xff]   ;;  %v2862_v49 = vpack.c.bf16 %v2860_v11, %v2858_v21  ;;  %v3074_v38 = vld [vmem:[#allocation2 + $0x42] ss:$2 sm:$0xff] }
 0x208   :  { %6895 = vmatpush3.bf16.msra.mxu1 %v7625_v58  ;;  %6876 = vmatprep.subr.bf16.mxu0 %v7626_v14  ;;  %v2830_v37 = vld [vmem:[#allocation2 + $0x50] ss:$2 sm:$0xff]  ;;  %v7652_v33 = vld [vmem:[#allocation5 + $0x28] sm:$0xff]   ;;  %v7654_v28 = vld [vmem:[#allocation5 + $0x20] sm:$0xff]  }
 0x209   :  { %6896 = vmatprep.subr.bf16.mxu1 %v7627_v6  ;;  %v3076_v10 = vld [vmem:[#allocation2 + $0x52] ss:$2 sm:$0xff]  ;;  %v2835_v29 = vpack.c.bf16 %v2830_v37, %v2828_v26  ;;  %v7653_v27 = vld [vmem:[#allocation5 + $0xa8] sm:$0xff]  }
 0x20a   :  { %v7650_v22 = vld [vmem:[#allocation5 + $0x30] sm:$0xff]   ;;  %v3081_v17 = vpack.c.bf16 %v3076_v10, %v3074_v38  ;;  %v7655_v25 = vld [vmem:[#allocation5 + $0xa0] sm:$0xff]   ;;  %v7656_v41 = vld [vmem:[#allocation5 + $0x18] sm:$0xff]  }
 0x20b   :  { %6877 = vmatpush3.bf16.msra.mxu0 %v7626_v14  ;;  %v7651_v7 = vld [vmem:[#allocation5 + $0xb0] sm:$0xff]   ;;  %v7657_v45 = vld [vmem:[#allocation5 + $0x98] sm:$0xff]   ;;  %v7660_v54 = vld [vmem:[#allocation5 + $0x8] sm:$0xff]  }
 0x20c   :  { %6897 = vmatpush3.bf16.msra.mxu1 %v7627_v6  ;;  %6878 = vmatprep.subr.bf16.mxu0 %v7628_v12  ;;  %v7658_v58 = vld [vmem:[#allocation5 + $0x10] sm:$0xff]   ;;  %v7661_v5 = vld [vmem:[#allocation5 + $0x88] sm:$0xff]   ;;  %v7662_v39 = vld [vmem:[#allocation5] sm:$0xff]  }
 0x20d   :  { %6898 = vmatprep.subr.bf16.mxu1 %v7629_v32  ;;  %v7659_v14 = vld [vmem:[#allocation5 + $0x90] sm:$0xff]   ;;  %v7663_v6 = vld [vmem:[#allocation5 + $0x80] sm:$0xff]  }
 0x20e   :  { %v2832_v1 = vld [vmem:[#allocation2 + $0x60] ss:$2 sm:$0xff]  ;;  %v2834_v59 = vld [vmem:[#allocation2 + $0x70] ss:$2 sm:$0x3f] }
 0x20f   :  { %6879 = vmatpush3.bf16.msra.mxu0 %v7628_v12  ;;  %v3078_v48 = vld [vmem:[#allocation2 + $0x62] ss:$2 sm:$0xff]  ;;  %v3080_v12 = vld [vmem:[#allocation2 + $0x72] ss:$2 sm:$0x3f] }
 0x210   :  { %6899 = vmatpush3.bf16.msra.mxu1 %v7629_v32  ;;  %6880 = vmatprep.subr.bf16.mxu0 %v7630_v57  ;;  %v2836_v32 = vpack.c.bf16 %v2834_v59, %v2832_v1 }
 0x211   :  { %6900 = vmatprep.subr.bf16.mxu1 %v7631_v8 }
 0x213   :  { %6881 = vmatpush3.bf16.msra.mxu0 %v7630_v57  ;;  %v3082_v57 = vpack.c.bf16 %v3080_v12, %v3078_v48 }
 0x214   :  { %6901 = vmatpush3.bf16.msra.mxu1 %v7631_v8  ;;  %6906 = vmatprep.subr.bf16.mxu0 %v7632_v20 }
 0x215   :  { %6926 = vmatprep.subr.bf16.mxu1 %v7633_v52 }
 0x216   :  { %6883 = vmatmul.mubr.bf16.vlgmr.msra.gmra.mxu0 %v2367_v36 }
 0x217   :  { %6903 = vmatmul.mubr.bf16.vlgmr.msra.gmra.mxu1 %v2341_v3  ;;  %6907 = vmatpush3.bf16.msra.mxu0 %v7632_v20  ;;  %v8910_v3 = vld [vmem:[%s9400_s1 + $0x1] ss:$0 sm:$0xff] }
 0x218   :  { %6927 = vmatpush3.bf16.msra.mxu1 %v7633_v52  ;;  %6908 = vmatprep.subr.bf16.mxu0 %v7634_v53 }
 0x219   :  { %6928 = vmatprep.subr.bf16.mxu1 %v7635_v0  ;;  %6922 = vmatprep.mubr.bf16.mxu0 %v2587_v50 }
 0x21a   :  { %6942 = vmatprep.mubr.bf16.mxu1 %v2861_v43 }
 0x21b   :  { %6909 = vmatpush3.bf16.msra.mxu0 %v7634_v53 }
 0x21c   :  { %6929 = vmatpush3.bf16.msra.mxu1 %v7635_v0  ;;  %6910 = vmatprep.subr.bf16.mxu0 %v7636_v9 }
 0x21d   :  { %6930 = vmatprep.subr.bf16.mxu1 %v7637_v15 }
 0x21f   :  { %6911 = vmatpush3.bf16.msra.mxu0 %v7636_v9 }
 0x220   :  { %6931 = vmatpush3.bf16.msra.mxu1 %v7637_v15  ;;  %6912 = vmatprep.subr.bf16.mxu0 %v7638_v61 }
 0x221   :  { %6932 = vmatprep.subr.bf16.mxu1 %v7639_v35 }
 0x223   :  { %6913 = vmatpush3.bf16.msra.mxu0 %v7638_v61 }
 0x224   :  { %6933 = vmatpush3.bf16.msra.mxu1 %v7639_v35  ;;  %6914 = vmatprep.subr.bf16.mxu0 %v7640_v60 }
 0x225   :  { %6934 = vmatprep.subr.bf16.mxu1 %v7641_v47 }
 0x227   :  { %6915 = vmatpush3.bf16.msra.mxu0 %v7640_v60 }
 0x228   :  { %6935 = vmatpush3.bf16.msra.mxu1 %v7641_v47  ;;  %6916 = vmatprep.subr.bf16.mxu0 %v7642_v19 }
 0x229   :  { %6936 = vmatprep.subr.bf16.mxu1 %v7643_v40 }
 0x22b   :  { %6917 = vmatpush3.bf16.msra.mxu0 %v7642_v19 }
 0x22c   :  { %6937 = vmatpush3.bf16.msra.mxu1 %v7643_v40  ;;  %6918 = vmatprep.subr.bf16.mxu0 %v7644_v4 }
 0x22d   :  { %6938 = vmatprep.subr.bf16.mxu1 %v7645_v42 }
 0x22f   :  { %6919 = vmatpush3.bf16.msra.mxu0 %v7644_v4 }
 0x230   :  { %6939 = vmatpush3.bf16.msra.mxu1 %v7645_v42  ;;  %6920 = vmatprep.subr.bf16.mxu0 %v7646_v24 }
 0x231   :  { %6940 = vmatprep.subr.bf16.mxu1 %v7647_v63 }
 0x233   :  { %6921 = vmatpush3.bf16.msra.mxu0 %v7646_v24 }
 0x234   :  { %6941 = vmatpush3.bf16.msra.mxu1 %v7647_v63  ;;  %6946 = vmatprep.subr.bf16.mxu0 %v7648_v2 }
 0x235   :  { %6966 = vmatprep.subr.bf16.mxu1 %v7649_v30 }
 0x236   :  { %6923 = vmatmul.mubr.bf16.vlgmr.msra.gmra.mxu0 %v2588_v31 }
 0x237   :  { %6943 = vmatmul.mubr.bf16.vlgmr.msra.gmra.mxu1 %v2862_v49  ;;  %6947 = vmatpush3.bf16.msra.mxu0 %v7648_v2 }
 0x238   :  { %6967 = vmatpush3.bf16.msra.mxu1 %v7649_v30  ;;  %6948 = vmatprep.subr.bf16.mxu0 %v7650_v22 }
 0x239   :  { %6968 = vmatprep.subr.bf16.mxu1 %v7651_v7  ;;  %6962 = vmatprep.mubr.bf16.mxu0 %v2835_v29 }
 0x23a   :  { %6982 = vmatprep.mubr.bf16.mxu1 %v3081_v17 }
 0x23b   :  { %6949 = vmatpush3.bf16.msra.mxu0 %v7650_v22 }
 0x23c   :  { %6969 = vmatpush3.bf16.msra.mxu1 %v7651_v7  ;;  %6950 = vmatprep.subr.bf16.mxu0 %v7652_v33 }
 0x23d   :  { %6970 = vmatprep.subr.bf16.mxu1 %v7653_v27 }
 0x23f   :  { %6951 = vmatpush3.bf16.msra.mxu0 %v7652_v33 }
 0x240   :  { %6971 = vmatpush3.bf16.msra.mxu1 %v7653_v27  ;;  %6952 = vmatprep.subr.bf16.mxu0 %v7654_v28 }
 0x241   :  { %6972 = vmatprep.subr.bf16.mxu1 %v7655_v25 }
 0x243   :  { %6953 = vmatpush3.bf16.msra.mxu0 %v7654_v28 }
 0x244   :  { %6973 = vmatpush3.bf16.msra.mxu1 %v7655_v25  ;;  %6954 = vmatprep.subr.bf16.mxu0 %v7656_v41 }
 0x245   :  { %6974 = vmatprep.subr.bf16.mxu1 %v7657_v45 }
 0x247   :  { %6955 = vmatpush3.bf16.msra.mxu0 %v7656_v41 }
 0x248   :  { %6975 = vmatpush3.bf16.msra.mxu1 %v7657_v45  ;;  %6956 = vmatprep.subr.bf16.mxu0 %v7658_v58 }
 0x249   :  { %6976 = vmatprep.subr.bf16.mxu1 %v7659_v14 }
 0x24b   :  { %6957 = vmatpush3.bf16.msra.mxu0 %v7658_v58 }
 0x24c   :  { %6977 = vmatpush3.bf16.msra.mxu1 %v7659_v14  ;;  %6958 = vmatprep.subr.bf16.mxu0 %v7660_v54 }
 0x24d   :  { %6978 = vmatprep.subr.bf16.mxu1 %v7661_v5 }
 0x24f   :  { %6959 = vmatpush3.bf16.msra.mxu0 %v7660_v54 }
 0x250   :  { %6979 = vmatpush3.bf16.msra.mxu1 %v7661_v5  ;;  %6960 = vmatprep.subr.bf16.mxu0 %v7662_v39 }
 0x251   :  { %6980 = vmatprep.subr.bf16.mxu1 %v7663_v6 }
 0x253   :  { %6961 = vmatpush3.bf16.msra.mxu0 %v7662_v39 }
 0x254   :  { %6981 = vmatpush3.bf16.msra.mxu1 %v7663_v6 }
 0x256   :  { %6963 = vmatmul.mubr.bf16.vlgmr.msra.gmra.mxu0 %v2836_v32 }
 0x257   :  { %6983 = vmatmul.mubr.bf16.vlgmr.msra.gmra.mxu1 %v3082_v57 }
 0x2d6   :  { %v6884_v8 = vpop.f32.mrf.mxu0 }
 0x2d7   :  { %v6904_v51 = vpop.f32.mrf.mxu1 }
 0x2d8   :  { %v2467_v55 = vpop.f32.mrf.mxu0  ;;  %v2573_v52 = vadd.f32 %v6904_v51, %v6884_v8 }
 0x2d9   :  { %v2564_v56 = vpop.f32.mrf.mxu1 }
 0x2da   :  { %v6885_v46 = vpop.f32.mrf.mxu0  ;;  %v2565_v0 = vadd.f32 %v2564_v56, %v2467_v55 }
 0x2db   :  { %v6905_v36 = vpop.f32.mrf.mxu1 }
 0x2dc   :  { %v2470_v20 = vpop.f32.mrf.mxu0  ;;  %v2576_v62 = vadd.f32 %v6905_v36, %v6885_v46 }
 0x2dd   :  { %v2567_v9 = vpop.f32.mrf.mxu1 }
 0x2de   :  { %v2568_v60 = vadd.f32 %v2567_v9, %v2470_v20 }
 0x2f6   :  { %v6924_v53 = vpop.f32.mrf.mxu0 }
 0x2f7   :  { %v2705_v23 = vadd.f32 %v6924_v53, %v2573_v52  ;;  %v6944_v22 = vpop.f32.mrf.mxu1 }
 0x2f8   :  { %v2688_v44 = vpop.f32.mrf.mxu0 }
 0x2f9   :  { %v8913_v50 = vadd.f32 %v8910_v3, %v2705_v23  ;;  %v2703_v34 = vadd.f32 %v2688_v44, %v2565_v0  ;;  %v2961_v33 = vpop.f32.mrf.mxu1 }
 0x2fa   :  { %v6925_v15 = vpop.f32.mrf.mxu0 }
 0x2fb   :  { %v8916_v43 = vmul.f32 0.70710677, %v8913_v50  ;;  %v8919_v61 = vadd.f32 %v8910_v3, %v2703_v34  ;;  %v2706_v35 = vadd.f32 %v6925_v15, %v2576_v62  ;;  %v6945_v14 = vpop.f32.mrf.mxu1 }
 0x2fc   :  { %v2691_v47 = vpop.f32.mrf.mxu0 }
 0x2fd   :  { %v2733_v19 = vand.u32 2147483647, %v8916_v43  ;;  %v8923_v40 = vmul.f32 0.70710677, %v8919_v61  ;;  %v8926_v4 = vadd.f32 %v8910_v3, %v2706_v35  ;;  %v2704_v42 = vadd.f32 %v2691_v47, %v2568_v60  ;;  %v8945_v32 = vpop.f32.mrf.mxu1 }
 0x2fe   :  { %vm2725_vm0 = vcmp.ge.f32.partialorder %v8916_v43, 0.0 }
 0x2ff   :  { %v2737_v24 = vmul.f32 0.3275911, %v2733_v19  ;;  %v2731_v63 = vand.u32 2147483647, %v8923_v40  ;;  %v8930_v16 = vmul.f32 0.70710677, %v8926_v4  ;;  %v8933_v13 = vadd.f32 %v8910_v3, %v2704_v42 }
 0x300   :  { %v2789_v10 = vsub.f32 0.0, %v2733_v19  ;;  %vm2723_vm1 = vcmp.ge.f32.partialorder %v8923_v40, 0.0 }
 0x301   :  { %v2741_v21 = vadd.f32 1.0, %v2737_v24  ;;  %v2735_v11 = vmul.f32 0.3275911, %v2731_v63  ;;  %v2734_v2 = vand.u32 2147483647, %v8930_v16  ;;  %v2787_v29 = vsub.f32 0.0, %v2731_v63 }
 0x302   :  { %v8937_v30 = vmul.f32 0.70710677, %v8933_v13  ;;  %v2793_v17 = vmul.f32 %v2789_v10, %v2733_v19  ;;  %vm2726_vm2 = vcmp.ge.f32.partialorder %v8930_v16, 0.0  ;;  %v2718_v16 = vmul.f32 0.5, %v8926_v4 }
 0x303   :  { %7664 = vrcp.f32 %v2741_v21  ;;  %v2739_v31 = vadd.f32 1.0, %v2735_v11  ;;  %v2738_v26 = vmul.f32 0.3275911, %v2734_v2  ;;  %v2790_v27 = vsub.f32 0.0, %v2734_v2 }
 0x304   :  { %v2732_v37 = vand.u32 2147483647, %v8937_v30  ;;  %v2791_v25 = vmul.f32 %v2787_v29, %v2731_v63  ;;  %v2799_v58 = vmul.f32 1.442695, %v2793_v17  ;;  %vm2724_vm3 = vcmp.ge.f32.partialorder %v8937_v30, 0.0 }
 0x305   :  { %7666 = vrcp.f32 %v2739_v31  ;;  %v2742_v49 = vadd.f32 1.0, %v2738_v26  ;;  %v2794_v54 = vmul.f32 %v2790_v27, %v2734_v2 }
 0x306   :  { %v2736_v38 = vmul.f32 0.3275911, %v2732_v37  ;;  %v2788_v41 = vsub.f32 0.0, %v2732_v37  ;;  %v2795_v1 = vmul.f32 1.442695, %v2791_v25 }
 0x307   :  { %7668 = vrcp.f32 %v2742_v49  ;;  %v2801_v55 = vmul.f32 1.442695, %v2794_v54 }
 0x308   :  { %v2740_v7 = vadd.f32 1.0, %v2736_v38  ;;  %v2792_v59 = vmul.f32 %v2788_v41, %v2732_v37 }
 0x30a   :  { %7670 = vrcp.f32 %v2740_v7  ;;  %v2797_v0 = vmul.f32 1.442695, %v2792_v59 }
 0x30b   :  { %7672 = vpow2.f32 %v2799_v58  ;;  %v2717_v58 = vmul.f32 0.5, %v8913_v50 }
 0x30c   :  { %7674 = vpow2.f32 %v2795_v1 }
 0x30d   :  { %7676 = vpow2.f32 %v2801_v55 }
 0x30e   :  { %7678 = vpow2.f32 %v2797_v0 }
 0x310   :  { %v7665_v28 = vpop.eup %7664 }
 0x311   :  { %v2753_v45 = vmul.f32 1.0614054, %v7665_v28 }
 0x312   :  { %v8940_v5 = vpop.eup %7666 }
 0x313   :  { %v2757_v39 = vadd.f32 -1.4531521, %v2753_v45  ;;  %v2751_v6 = vmul.f32 1.0614054, %v8940_v5 }
 0x314   :  { %v8943_v48 = vpop.eup %7668 }
 0x315   :  { %v2761_v12 = vmul.f32 %v7665_v28, %v2757_v39  ;;  %v2755_v57 = vadd.f32 -1.4531521, %v2751_v6  ;;  %v2754_v8 = vmul.f32 1.0614054, %v8943_v48  ;;  %v2729_v6 = vsel %vm2725_vm0, 1.0, %v7942_v18 }
 0x316   :  { %v6964_v51 = vpop.f32.mrf.mxu0 }
 0x317   :  { %v2765_v46 = vadd.f32 1.4214138, %v2761_v12  ;;  %v3067_v56 = vadd.f32 %v6964_v51, %v6944_v22  ;;  %v6984_v20 = vpop.f32.mrf.mxu1  ;;  %v8948_v52 = vpop.eup %7670  ;;  %v2759_v36 = vmul.f32 %v8940_v5, %v2755_v57  ;;  %v2758_v53 = vadd.f32 -1.4531521, %v2754_v8 }
 0x318   :  { %v3058_v23 = vpop.f32.mrf.mxu0  ;;  %v2752_v62 = vmul.f32 1.0614054, %v8948_v52  ;;  %v7673_v45 = vpop.eup %7672 }
 0x319   :  { %v2769_v44 = vmul.f32 %v7665_v28, %v2765_v46  ;;  %v3198_v9 = vadd.f32 %v6984_v20, %v3067_v56  ;;  %v3059_v34 = vadd.f32 %v3058_v23, %v2961_v33  ;;  %v2763_v15 = vadd.f32 1.4214138, %v2759_v36  ;;  %v3181_v60 = vpop.f32.mrf.mxu1  ;;  %v7675_v50 = vpop.eup %7674 }
 0x31a   :  { %v2762_v35 = vmul.f32 %v8943_v48, %v2758_v53  ;;  %v2756_v19 = vadd.f32 -1.4531521, %v2752_v62  ;;  %v6965_v26 = vpop.f32.mrf.mxu0  ;;  %v7677_v0 = vpop.eup %7676 }
 0x31b   :  { %v2773_v47 = vadd.f32 -0.28449672, %v2769_v44  ;;  %v8954_v42 = vadd.f32 %v8910_v3, %v3198_v9  ;;  %v3196_v24 = vadd.f32 %v3181_v60, %v3059_v34  ;;  %v2767_v63 = vmul.f32 %v8940_v5, %v2763_v15 }
 0x31c   :  { %v2766_v21 = vadd.f32 1.4214138, %v2762_v35  ;;  %v2760_v2 = vmul.f32 %v8948_v52, %v2756_v19  ;;  %v3070_v33 = vadd.f32 %v6965_v26, %v6945_v14  ;;  %v3061_v51 = vpop.f32.mrf.mxu0  ;;  %v2715_v9 = vmul.f32 0.5, %v8919_v61  ;;  %v7679_v19 = vpop.eup %7678 }
 0x31d   :  { %v2777_v11 = vmul.f32 %v7665_v28, %v2773_v47  ;;  %v8959_v31 = vmul.f32 0.70710677, %v8954_v42  ;;  %v2771_v37 = vadd.f32 -0.28449672, %v2767_v63  ;;  %v8963_v38 = vadd.f32 %v8910_v3, %v3196_v24 }
 0x31e   :  { %v2770_v49 = vmul.f32 %v8943_v48, %v2766_v21  ;;  %v2764_v22 = vadd.f32 1.4214138, %v2760_v2  ;;  %v3062_v62 = vadd.f32 %v3061_v51, %v8945_v32  ;;  %v2727_v47 = vsel %vm2723_vm1, 1.0, %v7942_v18 }
 0x31f   :  { %v2781_v10 = vadd.f32 0.2548296, %v2777_v11  ;;  %v2775_v7 = vmul.f32 %v8940_v5, %v2771_v37  ;;  %v8968_v17 = vand.u32 2147483647, %v8959_v31  ;;  %v8972_v41 = vmul.f32 0.70710677, %v8963_v38 }
 0x320   :  { %v2774_v29 = vadd.f32 -0.28449672, %v2770_v49  ;;  %v2768_v25 = vmul.f32 %v8948_v52, %v2764_v22  ;;  %v2730_v32 = vsel %vm2726_vm2, 1.0, %v7942_v18  ;;  %vm3214_vm4 = vcmp.ge.f32.partialorder %v8959_v31, 0.0 }
 0x321   :  { %v2785_v27 = vmul.f32 %v7665_v28, %v2781_v10  ;;  %v2779_v54 = vadd.f32 0.2548296, %v2775_v7  ;;  %v3226_v39 = vmul.f32 0.3275911, %v8968_v17  ;;  %v8979_v14 = vand.u32 2147483647, %v8972_v41  ;;  %v6985_v28 = vpop.f32.mrf.mxu1 }
 0x322   :  { %v2778_v43 = vmul.f32 %v8943_v48, %v2774_v29  ;;  %v2772_v59 = vadd.f32 -0.28449672, %v2768_v25  ;;  %v3199_v55 = vadd.f32 %v6985_v28, %v3070_v33  ;;  %v2728_v33 = vsel %vm2724_vm3, 1.0, %v7942_v18 }
 0x323   :  { %v2805_v1 = vmul.f32 %v7673_v45, %v2785_v27  ;;  %v2783_v12 = vmul.f32 %v8940_v5, %v2779_v54  ;;  %v3230_v8 = vadd.f32 1.0, %v3226_v39  ;;  %v3224_v20 = vmul.f32 0.3275911, %v8979_v14  ;;  %v3184_v21 = vpop.f32.mrf.mxu1 }
 0x324   :  { %v2782_v57 = vadd.f32 0.2548296, %v2778_v43  ;;  %v2776_v56 = vmul.f32 %v8948_v52, %v2772_v59  ;;  %v8990_v35 = vadd.f32 %v8910_v3, %v3199_v55  ;;  %v3197_v40 = vadd.f32 %v3184_v21, %v3062_v62 }
 0x325   :  { %v2809_v46 = vsub.f32 1.0, %v2805_v1  ;;  %v2803_v36 = vmul.f32 %v7675_v50, %v2783_v12  ;;  %7680 = vrcp.f32 %v3230_v8  ;;  %v3228_v44 = vadd.f32 1.0, %v3224_v20 }
 0x326   :  { %v2786_v53 = vmul.f32 %v8943_v48, %v2782_v57  ;;  %v2780_v23 = vadd.f32 0.2548296, %v2776_v56  ;;  %v9000_v63 = vmul.f32 0.70710677, %v8990_v35  ;;  %v9007_v22 = vadd.f32 %v8910_v3, %v3197_v40 }
 0x327   :  { %v2813_v5 = vmul.f32 %v2809_v46, %v2729_v6  ;;  %v2807_v34 = vsub.f32 1.0, %v2803_v36  ;;  %7682 = vrcp.f32 %v3228_v44  ;;  %v3276_v25 = vsub.f32 0.0, %v8979_v14 }
 0x328   :  { %v2806_v15 = vmul.f32 %v7677_v0, %v2786_v53  ;;  %v2784_v48 = vmul.f32 %v8948_v52, %v2780_v23  ;;  %v3278_v52 = vsub.f32 0.0, %v8968_v17  ;;  %v3223_v49 = vand.u32 2147483647, %v9000_v63 }
 0x329   :  { %v2817_v60 = vadd.f32 1.0, %v2813_v5  ;;  %v2811_v24 = vmul.f32 %v2807_v34, %v2727_v47  ;;  %v9012_v45 = vmul.f32 0.70710677, %v9007_v22  ;;  %v2716_v43 = vmul.f32 0.5, %v8933_v13 }
 0x32a   :  { %v2810_v61 = vsub.f32 1.0, %v2806_v15  ;;  %v2804_v2 = vmul.f32 %v7679_v19, %v2784_v48  ;;  %v3227_v30 = vmul.f32 0.3275911, %v3223_v49  ;;  %v3282_v54 = vmul.f32 %v3278_v52, %v8968_v17 }
 0x32b   :  { %v2821_v11 = vmul.f32 %v2817_v60, %v2717_v58  ;;  %v2815_v26 = vadd.f32 1.0, %v2811_v24  ;;  %v3221_v39 = vand.u32 2147483647, %v9012_v45  ;;  %v3280_v59 = vmul.f32 %v3276_v25, %v8979_v14 }
 0x32c   :  { %v2814_v37 = vmul.f32 %v2810_v61, %v2730_v32  ;;  %v2808_v10 = vsub.f32 1.0, %v2804_v2  ;;  %v3231_v4 = vadd.f32 1.0, %v3227_v30  ;;  %v3288_v57 = vmul.f32 1.442695, %v3282_v54 }
 0x32d   :  { %2825 = vst [vmem:[#allocation3 + $0x10] sm:$0xff] %v2821_v11  ;;  %v2819_v7 = vmul.f32 %v2815_v26, %v2715_v9  ;;  %v3225_v28 = vmul.f32 0.3275911, %v3221_v39  ;;  %v3284_v50 = vmul.f32 1.442695, %v3280_v59  ;;  %v3279_v46 = vsub.f32 0.0, %v3223_v49 }
 0x32e   :  { %v2818_v29 = vadd.f32 1.0, %v2814_v37  ;;  %v2812_v27 = vmul.f32 %v2808_v10, %v2728_v33  ;;  %7684 = vrcp.f32 %v3231_v4  ;;  %v3277_v5 = vsub.f32 0.0, %v3221_v39 }
 0x32f   :  { %2823 = vst [vmem:[#allocation3] sm:$0xff] %v2819_v7  ;;  %v3229_v8 = vadd.f32 1.0, %v3225_v28  ;;  %v3283_v0 = vmul.f32 %v3279_v46, %v3223_v49  ;;  %v3218_v7 = vsel %vm3214_vm4, 1.0, %v7942_v18  ;;  %vm3212_vm5 = vcmp.ge.f32.partialorder %v8972_v41, 0.0 }
 0x330   :  { %v2822_v58 = vmul.f32 %v2818_v29, %v2718_v16  ;;  %v2816_v3 = vadd.f32 1.0, %v2812_v27  ;;  %v3281_v47 = vmul.f32 %v3277_v5, %v3221_v39  ;;  %v3206_v4 = vmul.f32 0.5, %v8954_v42 }
 0x331   :  { %7686 = vrcp.f32 %v3229_v8  ;;  %v3290_v15 = vmul.f32 1.442695, %v3283_v0  ;;  %vm3215_vm6 = vcmp.ge.f32.partialorder %v9000_v63, 0.0  ;;  %vm3213_vm7 = vcmp.ge.f32.partialorder %v9012_v45, 0.0 }
 0x332   :  { %2826 = vst [vmem:[#allocation3 + $0x18] sm:$0x3f] %v2822_v58  ;;  %v7681_v6 = vpop.eup %7680  ;;  %v2820_v1 = vmul.f32 %v2816_v3, %v2716_v43  ;;  %7688 = vpow2.f32 %v3288_v57  ;;  %v3286_v26 = vmul.f32 1.442695, %v3281_v47  ;;  %v3216_v3 = vsel %vm3212_vm5, 1.0, %v7942_v18 }
 0x333   :  { %v3242_v12 = vmul.f32 1.0614054, %v7681_v6  ;;  %7690 = vpow2.f32 %v3284_v50  ;;  %v3219_v46 = vsel %vm3215_vm6, 1.0, %v7942_v18 }
 0x334   :  { %2824 = vst [vmem:[#allocation3 + $0x8] sm:$0xff] %v2820_v1  ;;  %v7683_v55 = vpop.eup %7682  ;;  %7692 = vpow2.f32 %v3290_v15 }
 0x335   :  { %v3246_v51 = vadd.f32 -1.4531521, %v3242_v12  ;;  %v3240_v17 = vmul.f32 1.0614054, %v7683_v55  ;;  %7694 = vpow2.f32 %v3286_v26  ;;  %v3204_v12 = vmul.f32 0.5, %v8963_v38 }
 0x337   :  { %v3250_v13 = vmul.f32 %v7681_v6, %v3246_v51  ;;  %v3244_v56 = vadd.f32 -1.4531521, %v3240_v17 }
 0x339   :  { %v3254_v20 = vadd.f32 1.4214138, %v3250_v13  ;;  %v3248_v36 = vmul.f32 %v7683_v55, %v3244_v56 }
 0x33b   :  { %v3258_v53 = vmul.f32 %v7681_v6, %v3254_v20  ;;  %v3252_v14 = vadd.f32 1.4214138, %v3248_v36  ;;  %v7685_v44 = vpop.eup %7684 }
 0x33c   :  { %v3243_v34 = vmul.f32 1.0614054, %v7685_v44 }
 0x33d   :  { %v3262_v23 = vadd.f32 -0.28449672, %v3258_v53  ;;  %v3256_v62 = vmul.f32 %v7683_v55, %v3252_v14  ;;  %v3207_v53 = vmul.f32 0.5, %v8990_v35 }
 0x33e   :  { %v3247_v19 = vadd.f32 -1.4531521, %v3243_v34  ;;  %v7687_v32 = vpop.eup %7686 }
 0x33f   :  { %v3266_v9 = vmul.f32 %v7681_v6, %v3262_v23  ;;  %v3260_v60 = vadd.f32 -0.28449672, %v3256_v62  ;;  %v7689_v11 = vpop.eup %7688  ;;  %v3241_v40 = vmul.f32 1.0614054, %v7687_v32  ;;  %v3217_v23 = vsel %vm3213_vm7, 1.0, %v7942_v18 }
 0x340   :  { %v3251_v21 = vmul.f32 %v7685_v44, %v3247_v19  ;;  %v7691_v10 = vpop.eup %7690 }
 0x341   :  { %v3270_v48 = vadd.f32 0.2548296, %v3266_v9  ;;  %v3264_v24 = vmul.f32 %v7683_v55, %v3260_v60  ;;  %v3245_v16 = vadd.f32 -1.4531521, %v3241_v40 }
 0x342   :  { %v3255_v52 = vadd.f32 1.4214138, %v3251_v21 }
 0x343   :  { %v3274_v61 = vmul.f32 %v7681_v6, %v3270_v48  ;;  %v3268_v2 = vadd.f32 0.2548296, %v3264_v24  ;;  %v3249_v31 = vmul.f32 %v7687_v32, %v3245_v16 }
 0x344   :  { %v3259_v33 = vmul.f32 %v7685_v44, %v3255_v52 }
 0x345   :  { %v3294_v37 = vmul.f32 %v7689_v11, %v3274_v61  ;;  %v3272_v49 = vmul.f32 %v7683_v55, %v3268_v2  ;;  %v3253_v54 = vadd.f32 1.4214138, %v3249_v31  ;;  %v7693_v55 = vpop.eup %7692 }
 0x346   :  { %v3263_v25 = vadd.f32 -0.28449672, %v3259_v33  ;;  %v7695_v20 = vpop.eup %7694 }
 0x347   :  { %v3298_v29 = vsub.f32 1.0, %v3294_v37  ;;  %v3292_v30 = vmul.f32 %v7691_v10, %v3272_v49  ;;  %v3257_v1 = vmul.f32 %v7687_v32, %v3253_v54 }
 0x348   :  { %v3267_v39 = vmul.f32 %v7685_v44, %v3263_v25 }
 0x349   :  { %v3302_v27 = vmul.f32 %v3298_v29, %v3218_v7  ;;  %v3296_v58 = vsub.f32 1.0, %v3292_v30  ;;  %v3261_v57 = vadd.f32 -0.28449672, %v3257_v1 }
 0x34a   :  { %v3271_v28 = vadd.f32 0.2548296, %v3267_v39 }
 0x34b   :  { %v3306_v43 = vadd.f32 1.0, %v3302_v27  ;;  %v3300_v6 = vmul.f32 %v3296_v58, %v3216_v3  ;;  %v3265_v17 = vmul.f32 %v7687_v32, %v3261_v57 }
 0x34c   :  { %v3275_v8 = vmul.f32 %v7685_v44, %v3271_v28  ;;  %v3205_v44 = vmul.f32 0.5, %v9007_v22 }
 0x34d   :  { %v3310_v59 = vmul.f32 %v3306_v43, %v3206_v4  ;;  %v3304_v41 = vadd.f32 1.0, %v3300_v6  ;;  %v3269_v50 = vadd.f32 0.2548296, %v3265_v17 }
 0x34e   :  { %v3295_v42 = vmul.f32 %v7693_v55, %v3275_v8 }
 0x34f   :  { %3314 = vst [vmem:[#allocation3 + $0x50] sm:$0xff] %v3310_v59  ;;  %v3308_v51 = vmul.f32 %v3304_v41, %v3204_v12  ;;  %v3273_v56 = vmul.f32 %v7687_v32, %v3269_v50 }
 0x350   :  { %v3299_v13 = vsub.f32 1.0, %v3295_v42 }
 0x351   :  { %3312 = vst [vmem:[#allocation3 + $0x40] sm:$0xff] %v3308_v51  ;;  %v3293_v38 = vmul.f32 %v7695_v20, %v3273_v56 }
 0x352   :  { %v3303_v36 = vmul.f32 %v3299_v13, %v3219_v46 }
 0x353   :  { %v3297_v14 = vsub.f32 1.0, %v3293_v38 }
 0x354   :  { %v3307_v0 = vadd.f32 1.0, %v3303_v36 }
 0x355   :  { %v3301_v63 = vmul.f32 %v3297_v14, %v3217_v23 }
 0x356   :  { %v3311_v5 = vmul.f32 %v3307_v0, %v3207_v53 }
 0x357   :  { %v3305_v62 = vadd.f32 1.0, %v3301_v63 }
 0x358   :  { %3315 = vst [vmem:[#allocation3 + $0x58] sm:$0x3f] %v3311_v5 }
 0x359   :  { %v3309_v9 = vmul.f32 %v3305_v62, %v3205_v44 }
 0x35b   :  { %3313 = vst [vmem:[#allocation3 + $0x48] sm:$0xff] %v3309_v9 }
 0x35c   :  { %7933 = dma.done.wait [#allocation9 + $0x2], 3072 }
 0x35d   :  { %7934 = vsyncadd [#allocation9 + $0x2], 4294964224  ;;  %v7943_v34 = vmov 0.0   ;;  %vm7944_vm8 = vmmov 0   ;;  %v7696_v35 = vld [vmem:[#allocation6 + $0x78] sm:$0xff]   ;;  %v7698_v22 = vld [vmem:[#allocation6 + $0x70] sm:$0xff]  }
 0x35e   :  { %6986 = vmatprep.subr.bf16.mxu0 %v7943_v34  ;;  %7006 = vmatprep.subr.bf16.mxu1 %v7943_v34  ;;  %v9036_v45 = vld [vmem:[#allocation6 + $0x38] sm:$0xff]   ;;  %v9040_v15 = vld [vmem:[#allocation6 + $0x30] sm:$0xff]   ;;  %v7700_v60 = vld [vmem:[#allocation6 + $0x68] sm:$0xff]   ;;  %vm3658_vm9 = vcmask 1045504  }
 0x35f   :  { %7002 = vmatprep.mubr.msk.bf16.mxu0 %vm7944_vm8, %v7943_v34  ;;  %7022 = vmatprep.mubr.msk.bf16.mxu1 %vm7944_vm8, %v7943_v34  ;;  %v9045_v47 = vld [vmem:[#allocation6 + $0x28] sm:$0xff]   ;;  %v7702_v48 = vld [vmem:[#allocation6 + $0x60] sm:$0xff]   ;;  %v7704_v24 = vld [vmem:[#allocation6 + $0x58] sm:$0xff]  }
 0x360   :  { %6987 = vmatpush3.bf16.msra.mxu0 %v7696_v35  ;;  %7007 = vmatpush3.bf16.msra.mxu1 %v9036_v45  ;;  %v9050_v19 = vld [vmem:[#allocation6 + $0x20] sm:$0xff]   ;;  %v9055_v32 = vld [vmem:[#allocation6 + $0x18] sm:$0xff]   ;;  %v7706_v61 = vld [vmem:[#allocation6 + $0x50] sm:$0xff]  }
 0x361   :  { %6988 = vmatprep.subr.bf16.mxu0 %v7943_v34  ;;  %7008 = vmatprep.subr.bf16.mxu1 %v7943_v34  ;;  %v9058_v21 = vld [vmem:[#allocation6 + $0x10] sm:$0xff]   ;;  %v7708_v11 = vld [vmem:[#allocation6 + $0x48] sm:$0xff]   ;;  %v7710_v40 = vld [vmem:[#allocation6 + $0x40] sm:$0xff]  }
 0x362   :  { %v9065_v2 = vld [vmem:[#allocation6 + $0x8] sm:$0xff]   ;;  %v3342_v37 = vld [vmem:[#allocation3 + $0x11] ss:$2 sm:$0x3f]  ;;  %v9070_v52 = vld [vmem:[#allocation6] sm:$0xff]  }
 0x363   :  { %v3340_v26 = vld [vmem:[#allocation3 + $0x1] ss:$2 sm:$0xff]  ;;  %v3319_v49 = vld [vmem:[#allocation3] ss:$2 sm:$0xff]  ;;  %v7712_v29 = vld [vmem:[#allocation6 + $0xb8] sm:$0xff]  }
 0x364   :  { %6989 = vmatpush3.bf16.msra.mxu0 %v7698_v22  ;;  %7009 = vmatpush3.bf16.msra.mxu1 %v9040_v15  ;;  %v3321_v16 = vld [vmem:[#allocation3 + $0x10] ss:$2 sm:$0x3f]  ;;  %v3343_v10 = vpack.c.bf16 %v3342_v37, %v3340_v26  ;;  %v7714_v30 = vld [vmem:[#allocation6 + $0xa8] sm:$0xff]   ;;  %v7715_v31 = vld [vmem:[#allocation6 + $0xa0] sm:$0xff]  }
 0x365   :  { %6990 = vmatprep.subr.bf16.mxu0 %v7943_v34  ;;  %7010 = vmatprep.subr.bf16.mxu1 %v7943_v34  ;;  %v3322_v7 = vpack.c.bf16 %v3321_v16, %v3319_v49  ;;  %v7713_v33 = vld [vmem:[#allocation6 + $0xb0] sm:$0xff]   ;;  %v7716_v27 = vld [vmem:[#allocation6 + $0x98] sm:$0xff]   ;;  %v7718_v58 = vld [vmem:[#allocation6 + $0x88] sm:$0xff]  }
 0x366   :  { %v7717_v25 = vld [vmem:[#allocation6 + $0x90] sm:$0xff]   ;;  %v7719_v54 = vld [vmem:[#allocation6 + $0x80] sm:$0xff]  }
 0x367   :  { %v3540_v4 = vld [vmem:[#allocation3 + $0x2] ss:$2 sm:$0xff]  ;;  %v3542_v43 = vld [vmem:[#allocation3 + $0x12] ss:$2 sm:$0x3f] }
 0x368   :  { %6991 = vmatpush3.bf16.msra.mxu0 %v7700_v60  ;;  %7011 = vmatpush3.bf16.msra.mxu1 %v9045_v47  ;;  %v3674_v3 = vld [vmem:[#allocation3 + $0x41] ss:$2 sm:$0xff]  ;;  %v3676_v39 = vld [vmem:[#allocation3 + $0x51] ss:$2 sm:$0x3f]  ;;  %v3543_v6 = vpack.c.bf16 %v3542_v43, %v3540_v4 }
 0x369   :  { %6992 = vmatprep.subr.bf16.mxu0 %v7943_v34  ;;  %7012 = vmatprep.subr.bf16.mxu1 %v7943_v34  ;;  %v3677_v1 = vpack.c.bf16 %v3676_v39, %v3674_v3  ;;  %v3669_v59 = vld [vmem:[#allocation3 + $0x40] ss:$2 sm:$0xff]  ;;  %v3671_v28 = vld [vmem:[#allocation3 + $0x50] ss:$2 sm:$0x3f] }
 0x36a   :  { %v3761_v12 = vld [vmem:[#allocation3 + $0x42] ss:$2 sm:$0xff]  ;;  %v3763_v41 = vld [vmem:[#allocation3 + $0x52] ss:$2 sm:$0x3f]  ;;  %v3672_v57 = vpack.c.bf16 %v3671_v28, %v3669_v59 }
 0x36b   :  { %v3764_v8 = vpack.c.bf16 %v3763_v41, %v3761_v12  ;;  %v6103_v63 = vld [vmem:[%s9400_s1 + $0x2] ss:$0 sm:$0xff] }
 0x36c   :  { %6993 = vmatpush3.bf16.msra.mxu0 %v7702_v48  ;;  %7013 = vmatpush3.bf16.msra.mxu1 %v9050_v19 }
 0x36d   :  { %6994 = vmatprep.subr.bf16.mxu0 %v7943_v34  ;;  %7014 = vmatprep.subr.bf16.mxu1 %v7943_v34 }
 0x370   :  { %6995 = vmatpush3.bf16.msra.mxu0 %v7704_v24  ;;  %7015 = vmatpush3.bf16.msra.mxu1 %v9055_v32 }
 0x371   :  { %6996 = vmatprep.subr.bf16.mxu0 %v7943_v34  ;;  %7016 = vmatprep.subr.bf16.mxu1 %v7943_v34 }
 0x374   :  { %6997 = vmatpush3.bf16.msra.mxu0 %v7706_v61  ;;  %7017 = vmatpush3.bf16.msra.mxu1 %v9058_v21 }
 0x375   :  { %6998 = vmatprep.subr.bf16.mxu0 %v7943_v34  ;;  %7018 = vmatprep.subr.bf16.mxu1 %v7943_v34 }
 0x378   :  { %6999 = vmatpush3.bf16.msra.mxu0 %v7708_v11  ;;  %7019 = vmatpush3.bf16.msra.mxu1 %v9065_v2 }
 0x379   :  { %7000 = vmatprep.subr.bf16.mxu0 %v7943_v34  ;;  %7020 = vmatprep.subr.bf16.mxu1 %v7943_v34 }
 0x37c   :  { %7001 = vmatpush3.bf16.msra.mxu0 %v7710_v40  ;;  %7021 = vmatpush3.bf16.msra.mxu1 %v9070_v52 }
 0x37d   :  { %7026 = vmatprep.subr.bf16.mxu0 %v7943_v34  ;;  %7046 = vmatprep.subr.bf16.mxu1 %v7943_v34 }
 0x37f   :  { %7003 = vmatmul.mubr.bf16.vlgmr.msra.gmra.mxu0 %v3343_v10  ;;  %7023 = vmatmul.mubr.bf16.vlgmr.msra.gmra.mxu1 %v3322_v7 }
 0x380   :  { %7027 = vmatpush3.bf16.msra.mxu0 %v7712_v29  ;;  %7047 = vmatpush3.bf16.msra.mxu1 %v7696_v35 }
 0x381   :  { %7028 = vmatprep.subr.bf16.mxu0 %v7943_v34  ;;  %7048 = vmatprep.subr.bf16.mxu1 %v7943_v34 }
 0x382   :  { %7042 = vmatprep.mubr.msk.bf16.mxu0 %vm7944_vm8, %v7943_v34  ;;  %7062 = vmatprep.mubr.msk.bf16.mxu1 %vm7944_vm8, %v7943_v34 }
 0x384   :  { %7029 = vmatpush3.bf16.msra.mxu0 %v7713_v33  ;;  %7049 = vmatpush3.bf16.msra.mxu1 %v7698_v22 }
 0x385   :  { %7030 = vmatprep.subr.bf16.mxu0 %v7943_v34  ;;  %7050 = vmatprep.subr.bf16.mxu1 %v7943_v34 }
 0x388   :  { %7031 = vmatpush3.bf16.msra.mxu0 %v7714_v30  ;;  %7051 = vmatpush3.bf16.msra.mxu1 %v7700_v60 }
 0x389   :  { %7032 = vmatprep.subr.bf16.mxu0 %v7943_v34  ;;  %7052 = vmatprep.subr.bf16.mxu1 %v7943_v34 }
 0x38c   :  { %7033 = vmatpush3.bf16.msra.mxu0 %v7715_v31  ;;  %7053 = vmatpush3.bf16.msra.mxu1 %v7702_v48 }
 0x38d   :  { %7034 = vmatprep.subr.bf16.mxu0 %v7943_v34  ;;  %7054 = vmatprep.subr.bf16.mxu1 %v7943_v34 }
 0x390   :  { %7035 = vmatpush3.bf16.msra.mxu0 %v7716_v27  ;;  %7055 = vmatpush3.bf16.msra.mxu1 %v7704_v24 }
 0x391   :  { %7036 = vmatprep.subr.bf16.mxu0 %v7943_v34  ;;  %7056 = vmatprep.subr.bf16.mxu1 %v7943_v34 }
 0x394   :  { %7037 = vmatpush3.bf16.msra.mxu0 %v7717_v25  ;;  %7057 = vmatpush3.bf16.msra.mxu1 %v7706_v61 }
 0x395   :  { %7038 = vmatprep.subr.bf16.mxu0 %v7943_v34  ;;  %7058 = vmatprep.subr.bf16.mxu1 %v7943_v34 }
 0x398   :  { %7039 = vmatpush3.bf16.msra.mxu0 %v7718_v58  ;;  %7059 = vmatpush3.bf16.msra.mxu1 %v7708_v11 }
 0x399   :  { %7040 = vmatprep.subr.bf16.mxu0 %v7943_v34  ;;  %7060 = vmatprep.subr.bf16.mxu1 %v7943_v34 }
 0x39c   :  { %7041 = vmatpush3.bf16.msra.mxu0 %v7719_v54  ;;  %7061 = vmatpush3.bf16.msra.mxu1 %v7710_v40 }
 0x39d   :  { %7066 = vmatprep.subr.bf16.mxu0 %v7943_v34  ;;  %7086 = vmatprep.subr.bf16.mxu1 %v7943_v34 }
 0x39f   :  { %7043 = vmatmul.mubr.bf16.vlgmr.msra.gmra.mxu0 %v3543_v6  ;;  %7063 = vmatmul.mubr.bf16.vlgmr.msra.gmra.mxu1 %v3677_v1 }
 0x3a0   :  { %7067 = vmatpush3.bf16.msra.mxu0 %v9036_v45  ;;  %7087 = vmatpush3.bf16.msra.mxu1 %v7712_v29 }
 0x3a1   :  { %7068 = vmatprep.subr.bf16.mxu0 %v7943_v34  ;;  %7088 = vmatprep.subr.bf16.mxu1 %v7943_v34 }
 0x3a2   :  { %7082 = vmatprep.mubr.msk.bf16.mxu0 %vm7944_vm8, %v7943_v34  ;;  %7102 = vmatprep.mubr.msk.bf16.mxu1 %vm7944_vm8, %v7943_v34 }
 0x3a4   :  { %7069 = vmatpush3.bf16.msra.mxu0 %v9040_v15  ;;  %7089 = vmatpush3.bf16.msra.mxu1 %v7713_v33 }
 0x3a5   :  { %7070 = vmatprep.subr.bf16.mxu0 %v7943_v34  ;;  %7090 = vmatprep.subr.bf16.mxu1 %v7943_v34 }
 0x3a8   :  { %7071 = vmatpush3.bf16.msra.mxu0 %v9045_v47  ;;  %7091 = vmatpush3.bf16.msra.mxu1 %v7714_v30 }
 0x3a9   :  { %7072 = vmatprep.subr.bf16.mxu0 %v7943_v34  ;;  %7092 = vmatprep.subr.bf16.mxu1 %v7943_v34 }
 0x3ac   :  { %7073 = vmatpush3.bf16.msra.mxu0 %v9050_v19  ;;  %7093 = vmatpush3.bf16.msra.mxu1 %v7715_v31 }
 0x3ad   :  { %7074 = vmatprep.subr.bf16.mxu0 %v7943_v34  ;;  %7094 = vmatprep.subr.bf16.mxu1 %v7943_v34 }
 0x3b0   :  { %7075 = vmatpush3.bf16.msra.mxu0 %v9055_v32  ;;  %7095 = vmatpush3.bf16.msra.mxu1 %v7716_v27 }
 0x3b1   :  { %7076 = vmatprep.subr.bf16.mxu0 %v7943_v34  ;;  %7096 = vmatprep.subr.bf16.mxu1 %v7943_v34 }
 0x3b4   :  { %7077 = vmatpush3.bf16.msra.mxu0 %v9058_v21  ;;  %7097 = vmatpush3.bf16.msra.mxu1 %v7717_v25 }
 0x3b5   :  { %7078 = vmatprep.subr.bf16.mxu0 %v7943_v34  ;;  %7098 = vmatprep.subr.bf16.mxu1 %v7943_v34 }
 0x3b8   :  { %7079 = vmatpush3.bf16.msra.mxu0 %v9065_v2  ;;  %7099 = vmatpush3.bf16.msra.mxu1 %v7718_v58 }
 0x3b9   :  { %7080 = vmatprep.subr.bf16.mxu0 %v7943_v34  ;;  %7100 = vmatprep.subr.bf16.mxu1 %v7943_v34 }
 0x3bc   :  { %7081 = vmatpush3.bf16.msra.mxu0 %v9070_v52  ;;  %7101 = vmatpush3.bf16.msra.mxu1 %v7719_v54 }
 0x3bf   :  { %7083 = vmatmul.mubr.bf16.vlgmr.msra.gmra.mxu0 %v3672_v57  ;;  %7103 = vmatmul.mubr.bf16.vlgmr.msra.gmra.mxu1 %v3764_v8 }
 0x43f   :  { %v3443_v55 = vpop.f32.mrf.mxu0  ;;  %v3532_v51 = vpop.f32.mrf.mxu1 }
 0x440   :  { %v3533_v17 = vadd.f32 %v3532_v51, %v3443_v55 }
 0x441   :  { %v7004_v42 = vpop.f32.mrf.mxu0  ;;  %v7024_v50 = vpop.f32.mrf.mxu1 }
 0x443   :  { %v3446_v13 = vpop.f32.mrf.mxu0  ;;  %v3535_v46 = vpop.f32.mrf.mxu1 }
 0x444   :  { %v3536_v0 = vadd.f32 %v3535_v46, %v3446_v13 }
 0x445   :  { %v7005_v56 = vpop.f32.mrf.mxu0  ;;  %v7025_v20 = vpop.f32.mrf.mxu1 }
 0x45f   :  { %v3643_v36 = vpop.f32.mrf.mxu0  ;;  %v3712_v38 = vpop.f32.mrf.mxu1 }
 0x460   :  { %v3650_v5 = vadd.f32 %v3643_v36, %v3533_v17 }
 0x461   :  { %v7044_v53 = vpop.f32.mrf.mxu0  ;;  %v7064_v14 = vpop.f32.mrf.mxu1 }
 0x462   :  { %v3656_v22 = vadd.f32 %v6103_v63, %v3650_v5 }
 0x463   :  { %v3646_v23 = vpop.f32.mrf.mxu0  ;;  %v3715_v62 = vpop.f32.mrf.mxu1 }
 0x464   :  { %v3651_v44 = vadd.f32 %v3646_v23, %v3536_v0 }
 0x465   :  { %v7045_v9 = vpop.f32.mrf.mxu0  ;;  %v7065_v45 = vpop.f32.mrf.mxu1 }
 0x466   :  { %v3657_v35 = vadd.f32 %v6103_v63, %v3651_v44 }
 0x468   :  { %v3659_v15 = vsel %vm3658_vm9, %v3657_v35, 0.0 }
 0x469   :  { %v3660_v60 = vadd.f32 %v3659_v15, %v3656_v22 }
 0x46b   :  { %v3661_v61 = vrot.slane %v3660_v60, 4 }
 0x46d   :  { %v3662_v49 = vadd.f32 %v3661_v61, %v3660_v60 }
 0x46f   :  { %v3663_v29 = vrot.slane %v3662_v49, 2 }
 0x471   :  { %v3664_v31 = vadd.f32 %v3663_v29, %v3662_v49 }
 0x473   :  { %v3665_v58 = vrot.slane %v3664_v31, 1 }
 0x475   :  { %v3666_v43 = vadd.f32 %v3665_v58, %v3664_v31 }
 0x47f   :  { %v3753_v47 = vpop.f32.mrf.mxu0  ;;  %v3799_v48 = vpop.f32.mrf.mxu1 }
 0x480   :  { %v3754_v19 = vadd.f32 %v3753_v47, %v3712_v38 }
 0x481   :  { %v7084_v24 = vpop.f32.mrf.mxu0  ;;  %v7104_v32 = vpop.f32.mrf.mxu1 }
 0x482   :  { %v3806_v40 = vadd.f32 %v3799_v48, %v3754_v19 }
 0x483   :  { %v3756_v21 = vpop.f32.mrf.mxu0  ;;  %v3802_v2 = vpop.f32.mrf.mxu1 }
 0x484   :  { %v3757_v11 = vadd.f32 %v3756_v21, %v3715_v62  ;;  %v3808_v10 = vadd.f32 %v6103_v63, %v3806_v40 }
 0x485   :  { %v7085_v26 = vpop.f32.mrf.mxu0  ;;  %v7105_v52 = vpop.f32.mrf.mxu1 }
 0x486   :  { %v3807_v37 = vadd.f32 %v3802_v2, %v3757_v11 }
 0x488   :  { %v3809_v16 = vadd.f32 %v6103_v63, %v3807_v37 }
 0x48a   :  { %v3810_v7 = vsel %vm3658_vm9, %v3809_v16, 0.0 }
 0x48b   :  { %v3811_v33 = vadd.f32 %v3810_v7, %v3808_v10 }
 0x48d   :  { %v3812_v30 = vrot.slane %v3811_v33, 4 }
 0x48f   :  { %v3813_v27 = vadd.f32 %v3812_v30, %v3811_v33 }
 0x491   :  { %v3814_v25 = vrot.slane %v3813_v27, 2 }
 0x493   :  { %v3815_v54 = vadd.f32 %v3814_v25, %v3813_v27 }
 0x495   :  { %v3816_v4 = vrot.slane %v3815_v54, 1 }
 0x497   :  { %v3817_v3 = vadd.f32 %v3816_v4, %v3815_v54 }
 0x499   :  { %v3818_v39 = vadd.f32 %v3817_v3, %v3666_v43 }
 0x49b   :  { %v3819_v6 = vmul.f32 0.035714287, %v3818_v39 }
 0x49d   :  { %v3820_v1 = vsub.f32 %v3656_v22, %v3819_v6  ;;  %v3821_v59 = vsub.f32 %v3657_v35, %v3819_v6  ;;  %v3822_v28 = vsub.f32 %v3808_v10, %v3819_v6  ;;  %v3823_v12 = vsub.f32 %v3809_v16, %v3819_v6 }
 0x49f   :  { %v3824_v41 = vmul.f32 %v3820_v1, %v3820_v1  ;;  %v3825_v57 = vmul.f32 %v3821_v59, %v3821_v59  ;;  %v3835_v8 = vmul.f32 %v3822_v28, %v3822_v28  ;;  %v3836_v55 = vmul.f32 %v3823_v12, %v3823_v12 }
 0x4a1   :  { %v3826_v51 = vsel %vm3658_vm9, %v3825_v57, 0.0  ;;  %v3837_v17 = vsel %vm3658_vm9, %v3836_v55, 0.0 }
 0x4a2   :  { %v3827_v42 = vadd.f32 %v3826_v51, %v3824_v41  ;;  %v3838_v50 = vadd.f32 %v3837_v17, %v3835_v8 }
 0x4a4   :  { %v3828_v13 = vrot.slane %v3827_v42, 4  ;;  %v3839_v46 = vrot.slane %v3838_v50, 4 }
 0x4a6   :  { %v3829_v56 = vadd.f32 %v3828_v13, %v3827_v42  ;;  %v3840_v20 = vadd.f32 %v3839_v46, %v3838_v50 }
 0x4a8   :  { %v3830_v36 = vrot.slane %v3829_v56, 2  ;;  %v3841_v38 = vrot.slane %v3840_v20, 2 }
 0x4aa   :  { %v3831_v53 = vadd.f32 %v3830_v36, %v3829_v56  ;;  %v3842_v0 = vadd.f32 %v3841_v38, %v3840_v20 }
 0x4ac   :  { %v3832_v14 = vrot.slane %v3831_v53, 1  ;;  %v3843_v5 = vrot.slane %v3842_v0, 1 }
 0x4ae   :  { %v3833_v23 = vadd.f32 %v3832_v14, %v3831_v53  ;;  %v3844_v63 = vadd.f32 %v3843_v5, %v3842_v0 }
 0x4b0   :  { %v3845_v44 = vadd.f32 %v3844_v63, %v3833_v23 }
 0x4b2   :  { %v3846_v62 = vmul.f32 0.035714287, %v3845_v44 }
 0x4b4   :  { %v3847_v9 = vadd.f32 1e-05, %v3846_v62 }
 0x4b6   :  { %7720 = vrsqrt.f32 %v3847_v9 }
 0x4c3   :  { %v7721_v35 = vpop.eup %7720 }
 0x4c4   :  { %v9129_v45 = vmul.f32 %v7721_v35, %v3820_v1  ;;  %v9131_v22 = vmul.f32 %v7721_v35, %v3821_v59  ;;  %v9133_v15 = vmul.f32 %v7721_v35, %v3822_v28  ;;  %v9135_v60 = vmul.f32 %v7721_v35, %v3823_v12 }
 0x4c6   :  { %v9138_v47 = vmul.f32 0.70710677, %v9129_v45  ;;  %v9141_v48 = vmul.f32 0.70710677, %v9131_v22  ;;  %v9144_v19 = vmul.f32 0.70710677, %v9133_v15 }
 0x4c7   :  { %v9147_v24 = vmul.f32 0.70710677, %v9135_v60 }
 0x4c8   :  { %v3859_v32 = vand.u32 2147483647, %v9138_v47  ;;  %v3860_v61 = vand.u32 2147483647, %v9141_v48  ;;  %v3917_v2 = vand.u32 2147483647, %v9144_v19 }
 0x4c9   :  { %v3918_v40 = vand.u32 2147483647, %v9147_v24  ;;  %vm3855_vm10 = vcmp.ge.f32.partialorder %v9138_v47, 0.0  ;;  %vm3856_vm11 = vcmp.ge.f32.partialorder %v9141_v48, 0.0  ;;  %vm3913_vm12 = vcmp.ge.f32.partialorder %v9144_v19, 0.0 }
 0x4ca   :  { %v3861_v21 = vmul.f32 0.3275911, %v3859_v32  ;;  %v3862_v11 = vmul.f32 0.3275911, %v3860_v61  ;;  %v3919_v52 = vmul.f32 0.3275911, %v3917_v2 }
 0x4cb   :  { %v3920_v49 = vmul.f32 0.3275911, %v3918_v40  ;;  %v3887_v7 = vsub.f32 0.0, %v3859_v32  ;;  %v3888_v29 = vsub.f32 0.0, %v3860_v61  ;;  %v3945_v30 = vsub.f32 0.0, %v3917_v2 }
 0x4cc   :  { %v3863_v26 = vadd.f32 1.0, %v3861_v21  ;;  %v3864_v37 = vadd.f32 1.0, %v3862_v11  ;;  %v3921_v16 = vadd.f32 1.0, %v3919_v52  ;;  %v3946_v27 = vsub.f32 0.0, %v3918_v40 }
 0x4cd   :  { %v3922_v10 = vadd.f32 1.0, %v3920_v49  ;;  %v3889_v33 = vmul.f32 %v3887_v7, %v3859_v32  ;;  %v3890_v31 = vmul.f32 %v3888_v29, %v3860_v61  ;;  %v3947_v43 = vmul.f32 %v3945_v30, %v3917_v2 }
 0x4ce   :  { %7722 = vrcp.f32 %v3863_v26  ;;  %v3948_v6 = vmul.f32 %v3946_v27, %v3918_v40  ;;  %v3857_v30 = vsel %vm3855_vm10, 1.0, %v7942_v18  ;;  %vm3914_vm13 = vcmp.ge.f32.partialorder %v9147_v24, 0.0 }
 0x4cf   :  { %7724 = vrcp.f32 %v3864_v37  ;;  %v3891_v4 = vmul.f32 1.442695, %v3889_v33  ;;  %v3893_v39 = vmul.f32 1.442695, %v3890_v31  ;;  %v3949_v8 = vmul.f32 1.442695, %v3947_v43 }
 0x4d0   :  { %7726 = vrcp.f32 %v3921_v16  ;;  %v3951_v17 = vmul.f32 1.442695, %v3948_v6  ;;  %v3851_v43 = vmul.f32 0.5, %v9129_v45  ;;  %v3852_v6 = vmul.f32 0.5, %v9131_v22 }
 0x4d1   :  { %7728 = vrcp.f32 %v3922_v10  ;;  %v3909_v24 = vmul.f32 0.5, %v9133_v15  ;;  %v3910_v45 = vmul.f32 0.5, %v9135_v60 }
 0x4d2   :  { %7730 = vpow2.f32 %v3891_v4 }
 0x4d3   :  { %7732 = vpow2.f32 %v3893_v39 }
 0x4d4   :  { %7734 = vpow2.f32 %v3949_v8 }
 0x4d5   :  { %7736 = vpow2.f32 %v3951_v17 }
 0x4db   :  { %v7723_v25 = vpop.eup %7722 }
 0x4dc   :  { %v7725_v58 = vpop.eup %7724  ;;  %v3869_v54 = vmul.f32 1.0614054, %v7723_v25 }
 0x4dd   :  { %v3870_v3 = vmul.f32 1.0614054, %v7725_v58  ;;  %v7727_v59 = vpop.eup %7726 }
 0x4de   :  { %v3871_v1 = vadd.f32 -1.4531521, %v3869_v54  ;;  %v7729_v12 = vpop.eup %7728  ;;  %v3927_v57 = vmul.f32 1.0614054, %v7727_v59 }
 0x4df   :  { %v3872_v28 = vadd.f32 -1.4531521, %v3870_v3  ;;  %v3928_v51 = vmul.f32 1.0614054, %v7729_v12  ;;  %v7731_v2 = vpop.eup %7730 }
 0x4e0   :  { %v3873_v41 = vmul.f32 %v7723_v25, %v3871_v1  ;;  %v3929_v50 = vadd.f32 -1.4531521, %v3927_v57  ;;  %v7733_v37 = vpop.eup %7732 }
 0x4e1   :  { %v3874_v55 = vmul.f32 %v7725_v58, %v3872_v28  ;;  %v3930_v46 = vadd.f32 -1.4531521, %v3928_v51  ;;  %v7735_v33 = vpop.eup %7734 }
 0x4e2   :  { %v3875_v42 = vadd.f32 1.4214138, %v3873_v41  ;;  %v3931_v20 = vmul.f32 %v7727_v59, %v3929_v50  ;;  %v3916_v41 = vsel %vm3914_vm13, 1.0, %v7942_v18 }
 0x4e3   :  { %v3876_v13 = vadd.f32 1.4214138, %v3874_v55  ;;  %v3932_v38 = vmul.f32 %v7729_v12, %v3930_v46 }
 0x4e4   :  { %v3877_v56 = vmul.f32 %v7723_v25, %v3875_v42  ;;  %v3933_v0 = vadd.f32 1.4214138, %v3931_v20 }
 0x4e5   :  { %v3878_v36 = vmul.f32 %v7725_v58, %v3876_v13  ;;  %v3934_v5 = vadd.f32 1.4214138, %v3932_v38 }
 0x4e6   :  { %v3879_v53 = vadd.f32 -0.28449672, %v3877_v56  ;;  %v3935_v63 = vmul.f32 %v7727_v59, %v3933_v0 }
 0x4e7   :  { %v3880_v14 = vadd.f32 -0.28449672, %v3878_v36  ;;  %v3936_v62 = vmul.f32 %v7729_v12, %v3934_v5 }
 0x4e8   :  { %v3881_v23 = vmul.f32 %v7723_v25, %v3879_v53  ;;  %v3937_v35 = vadd.f32 -0.28449672, %v3935_v63 }
 0x4e9   :  { %v3882_v44 = vmul.f32 %v7725_v58, %v3880_v14  ;;  %v3938_v61 = vadd.f32 -0.28449672, %v3936_v62 }
 0x4ea   :  { %v3883_v9 = vadd.f32 0.2548296, %v3881_v23  ;;  %v3939_v11 = vmul.f32 %v7727_v59, %v3937_v35 }
 0x4eb   :  { %v3884_v32 = vadd.f32 0.2548296, %v3882_v44  ;;  %v3940_v26 = vmul.f32 %v7729_v12, %v3938_v61 }
 0x4ec   :  { %v3885_v21 = vmul.f32 %v7723_v25, %v3883_v9  ;;  %v3941_v49 = vadd.f32 0.2548296, %v3939_v11  ;;  %v7737_v25 = vpop.eup %7736 }
 0x4ed   :  { %v3886_v40 = vmul.f32 %v7725_v58, %v3884_v32  ;;  %v3942_v10 = vadd.f32 0.2548296, %v3940_v26  ;;  %v3858_v58 = vsel %vm3856_vm11, 1.0, %v7942_v18 }
 0x4ee   :  { %v3895_v52 = vmul.f32 %v7731_v2, %v3885_v21  ;;  %v3943_v29 = vmul.f32 %v7727_v59, %v3941_v49  ;;  %v3915_v59 = vsel %vm3913_vm12, 1.0, %v7942_v18 }
 0x4ef   :  { %v3896_v16 = vmul.f32 %v7733_v37, %v3886_v40  ;;  %v3944_v27 = vmul.f32 %v7729_v12, %v3942_v10 }
 0x4f0   :  { %v3897_v7 = vsub.f32 1.0, %v3895_v52  ;;  %v3953_v47 = vmul.f32 %v7735_v33, %v3943_v29 }
 0x4f1   :  { %v3898_v31 = vsub.f32 1.0, %v3896_v16  ;;  %v3954_v48 = vmul.f32 %v7737_v25, %v3944_v27 }
 0x4f2   :  { %v3899_v54 = vmul.f32 %v3897_v7, %v3857_v30  ;;  %v3955_v39 = vsub.f32 1.0, %v3953_v47 }
 0x4f3   :  { %v3900_v4 = vmul.f32 %v3898_v31, %v3858_v58  ;;  %v3956_v28 = vsub.f32 1.0, %v3954_v48 }
 0x4f4   :  { %v3901_v3 = vadd.f32 1.0, %v3899_v54  ;;  %v3957_v57 = vmul.f32 %v3955_v39, %v3915_v59 }
 0x4f5   :  { %v3902_v1 = vadd.f32 1.0, %v3900_v4  ;;  %v3958_v8 = vmul.f32 %v3956_v28, %v3916_v41 }
 0x4f6   :  { %v3903_v12 = vmul.f32 %v3901_v3, %v3851_v43  ;;  %v3959_v55 = vadd.f32 1.0, %v3957_v57 }
 0x4f7   :  { %v3904_v19 = vmul.f32 %v3902_v1, %v3852_v6  ;;  %v3960_v51 = vadd.f32 1.0, %v3958_v8 }
 0x4f8   :  { %3905 = vst [vmem:[#allocation2] sm:$0xff] %v3903_v12  ;;  %v3961_v17 = vmul.f32 %v3959_v55, %v3909_v24 }
 0x4f9   :  { %3906 = vst [vmem:[#allocation2 + $0x8] sm:$0x3f] %v3904_v19  ;;  %v3962_v22 = vmul.f32 %v3960_v51, %v3910_v45 }
 0x4fa   :  { %3963 = vst [vmem:[#allocation2 + $0x40] sm:$0xff] %v3961_v17 }
 0x4fb   :  { %3964 = vst [vmem:[#allocation2 + $0x48] sm:$0x3f] %v3962_v22 }
 0x4fc   :  { %7935 = dma.done.wait [#allocation9 + $0x3], 3072 }
 0x4fd   :  { %7936 = vsyncadd [#allocation9 + $0x3], 4294964224  ;;  %7106 = vmatprep.subr.bf16.mxu0 %v7943_v34  ;;  %7126 = vmatprep.subr.bf16.mxu1 %v7943_v34  ;;  %v7738_v15 = vld [vmem:[#allocation7 + $0x78] sm:$0xff]   ;;  %v7740_v60 = vld [vmem:[#allocation7 + $0x70] sm:$0xff]  }
 0x4fe   :  { %7122 = vmatprep.mubr.msk.bf16.mxu0 %vm7944_vm8, %v7943_v34  ;;  %7142 = vmatprep.mubr.msk.bf16.mxu1 %vm7944_vm8, %v7943_v34  ;;  %v9171_v42 = vld [vmem:[#allocation7 + $0x38] sm:$0xff]   ;;  %v9175_v50 = vld [vmem:[#allocation7 + $0x30] sm:$0xff]   ;;  %v7742_v13 = vld [vmem:[#allocation7 + $0x68] sm:$0xff]  }
 0x4ff   :  { %7107 = vmatpush3.bf16.msra.mxu0 %v7738_v15  ;;  %7127 = vmatpush3.bf16.msra.mxu1 %v9171_v42  ;;  %v9180_v46 = vld [vmem:[#allocation7 + $0x28] sm:$0xff]   ;;  %v7744_v56 = vld [vmem:[#allocation7 + $0x60] sm:$0xff]   ;;  %v7746_v36 = vld [vmem:[#allocation7 + $0x58] sm:$0xff]  }
 0x500   :  { %7108 = vmatprep.subr.bf16.mxu0 %v7943_v34  ;;  %7128 = vmatprep.subr.bf16.mxu1 %v7943_v34  ;;  %v9185_v20 = vld [vmem:[#allocation7 + $0x20] sm:$0xff]   ;;  %v9190_v38 = vld [vmem:[#allocation7 + $0x18] sm:$0xff]   ;;  %v7748_v53 = vld [vmem:[#allocation7 + $0x50] sm:$0xff]  }
 0x501   :  { %v9195_v0 = vld [vmem:[#allocation7 + $0x10] sm:$0xff]   ;;  %v7750_v14 = vld [vmem:[#allocation7 + $0x48] sm:$0xff]   ;;  %v7752_v23 = vld [vmem:[#allocation7 + $0x40] sm:$0xff]  }
 0x502   :  { %v9200_v5 = vld [vmem:[#allocation7 + $0x8] sm:$0xff]   ;;  %v9205_v44 = vld [vmem:[#allocation7] sm:$0xff]   ;;  %v7754_v32 = vld [vmem:[#allocation7 + $0xb8] sm:$0xff]  }
 0x503   :  { %7109 = vmatpush3.bf16.msra.mxu0 %v7740_v60  ;;  %7129 = vmatpush3.bf16.msra.mxu1 %v9175_v50  ;;  %v3986_v63 = vld [vmem:[#allocation2 + $0x1] ss:$2 sm:$0x3f]  ;;  %v3968_v62 = vld [vmem:[#allocation2] ss:$2 sm:$0x3f] }
 0x504   :  { %7110 = vmatprep.subr.bf16.mxu0 %v7943_v34  ;;  %7130 = vmatprep.subr.bf16.mxu1 %v7943_v34  ;;  %v3987_v9 = vpack.c.bf16 %v3986_v63, %v3986_v63  ;;  %v3969_v35 = vpack.c.bf16 %v3968_v62, %v3968_v62  ;;  %v7755_v61 = vld [vmem:[#allocation7 + $0xb0] sm:$0xff]   ;;  %v7756_v21 = vld [vmem:[#allocation7 + $0xa8] sm:$0xff]   ;;  %v7757_v11 = vld [vmem:[#allocation7 + $0xa0] sm:$0xff]  }
 0x505   :  { %v7758_v2 = vld [vmem:[#allocation7 + $0x98] sm:$0xff]   ;;  %v7759_v40 = vld [vmem:[#allocation7 + $0x90] sm:$0xff]   ;;  %v7760_v26 = vld [vmem:[#allocation7 + $0x88] sm:$0xff]  }
 0x506   :  { %v7761_v37 = vld [vmem:[#allocation7 + $0x80] sm:$0xff]  }
 0x507   :  { %7111 = vmatpush3.bf16.msra.mxu0 %v7742_v13  ;;  %7131 = vmatpush3.bf16.msra.mxu1 %v9180_v46  ;;  %v4181_v52 = vld [vmem:[#allocation2 + $0x2] ss:$2 sm:$0x3f]  ;;  %v4304_v49 = vld [vmem:[#allocation2 + $0x41] ss:$2 sm:$0x3f] }
 0x508   :  { %7112 = vmatprep.subr.bf16.mxu0 %v7943_v34  ;;  %7132 = vmatprep.subr.bf16.mxu1 %v7943_v34  ;;  %v4182_v16 = vpack.c.bf16 %v4181_v52, %v4181_v52  ;;  %v4305_v10 = vpack.c.bf16 %v4304_v49, %v4304_v49  ;;  %v4302_v7 = vld [vmem:[#allocation2 + $0x40] ss:$2 sm:$0x3f]  ;;  %v6128_v19 = vld [vmem:[%s9400_s1 + $0x3] ss:$0 sm:$0xff] }
 0x509   :  { %v4386_v29 = vld [vmem:[#allocation2 + $0x42] ss:$2 sm:$0x3f]  ;;  %v4303_v33 = vpack.c.bf16 %v4302_v7, %v4302_v7 }
 0x50a   :  { %v4387_v30 = vpack.c.bf16 %v4386_v29, %v4386_v29 }
 0x50b   :  { %7113 = vmatpush3.bf16.msra.mxu0 %v7744_v56  ;;  %7133 = vmatpush3.bf16.msra.mxu1 %v9185_v20 }
 0x50c   :  { %7114 = vmatprep.subr.bf16.mxu0 %v7943_v34  ;;  %7134 = vmatprep.subr.bf16.mxu1 %v7943_v34 }
 0x50f   :  { %7115 = vmatpush3.bf16.msra.mxu0 %v7746_v36  ;;  %7135 = vmatpush3.bf16.msra.mxu1 %v9190_v38 }
 0x510   :  { %7116 = vmatprep.subr.bf16.mxu0 %v7943_v34  ;;  %7136 = vmatprep.subr.bf16.mxu1 %v7943_v34 }
 0x513   :  { %7117 = vmatpush3.bf16.msra.mxu0 %v7748_v53  ;;  %7137 = vmatpush3.bf16.msra.mxu1 %v9195_v0 }
 0x514   :  { %7118 = vmatprep.subr.bf16.mxu0 %v7943_v34  ;;  %7138 = vmatprep.subr.bf16.mxu1 %v7943_v34 }
 0x517   :  { %7119 = vmatpush3.bf16.msra.mxu0 %v7750_v14  ;;  %7139 = vmatpush3.bf16.msra.mxu1 %v9200_v5 }
 0x518   :  { %7120 = vmatprep.subr.bf16.mxu0 %v7943_v34  ;;  %7140 = vmatprep.subr.bf16.mxu1 %v7943_v34 }
 0x51b   :  { %7121 = vmatpush3.bf16.msra.mxu0 %v7752_v23  ;;  %7141 = vmatpush3.bf16.msra.mxu1 %v9205_v44 }
 0x51c   :  { %7146 = vmatprep.subr.bf16.mxu0 %v7943_v34  ;;  %7166 = vmatprep.subr.bf16.mxu1 %v7943_v34 }
 0x51e   :  { %7123 = vmatmul.mubr.bf16.vlgmr.msra.gmra.mxu0 %v3987_v9  ;;  %7143 = vmatmul.mubr.bf16.vlgmr.msra.gmra.mxu1 %v3969_v35 }
 0x51f   :  { %7147 = vmatpush3.bf16.msra.mxu0 %v7754_v32  ;;  %7167 = vmatpush3.bf16.msra.mxu1 %v7738_v15 }
 0x520   :  { %7148 = vmatprep.subr.bf16.mxu0 %v7943_v34  ;;  %7168 = vmatprep.subr.bf16.mxu1 %v7943_v34 }
 0x521   :  { %7162 = vmatprep.mubr.msk.bf16.mxu0 %vm7944_vm8, %v7943_v34  ;;  %7182 = vmatprep.mubr.msk.bf16.mxu1 %vm7944_vm8, %v7943_v34 }
 0x523   :  { %7149 = vmatpush3.bf16.msra.mxu0 %v7755_v61  ;;  %7169 = vmatpush3.bf16.msra.mxu1 %v7740_v60 }
 0x524   :  { %7150 = vmatprep.subr.bf16.mxu0 %v7943_v34  ;;  %7170 = vmatprep.subr.bf16.mxu1 %v7943_v34 }
 0x527   :  { %7151 = vmatpush3.bf16.msra.mxu0 %v7756_v21  ;;  %7171 = vmatpush3.bf16.msra.mxu1 %v7742_v13 }
 0x528   :  { %7152 = vmatprep.subr.bf16.mxu0 %v7943_v34  ;;  %7172 = vmatprep.subr.bf16.mxu1 %v7943_v34 }
 0x52b   :  { %7153 = vmatpush3.bf16.msra.mxu0 %v7757_v11  ;;  %7173 = vmatpush3.bf16.msra.mxu1 %v7744_v56 }
 0x52c   :  { %7154 = vmatprep.subr.bf16.mxu0 %v7943_v34  ;;  %7174 = vmatprep.subr.bf16.mxu1 %v7943_v34 }
 0x52f   :  { %7155 = vmatpush3.bf16.msra.mxu0 %v7758_v2  ;;  %7175 = vmatpush3.bf16.msra.mxu1 %v7746_v36 }
 0x530   :  { %7156 = vmatprep.subr.bf16.mxu0 %v7943_v34  ;;  %7176 = vmatprep.subr.bf16.mxu1 %v7943_v34 }
 0x533   :  { %7157 = vmatpush3.bf16.msra.mxu0 %v7759_v40  ;;  %7177 = vmatpush3.bf16.msra.mxu1 %v7748_v53 }
 0x534   :  { %7158 = vmatprep.subr.bf16.mxu0 %v7943_v34  ;;  %7178 = vmatprep.subr.bf16.mxu1 %v7943_v34 }
 0x537   :  { %7159 = vmatpush3.bf16.msra.mxu0 %v7760_v26  ;;  %7179 = vmatpush3.bf16.msra.mxu1 %v7750_v14 }
 0x538   :  { %7160 = vmatprep.subr.bf16.mxu0 %v7943_v34  ;;  %7180 = vmatprep.subr.bf16.mxu1 %v7943_v34 }
 0x53b   :  { %7161 = vmatpush3.bf16.msra.mxu0 %v7761_v37  ;;  %7181 = vmatpush3.bf16.msra.mxu1 %v7752_v23 }
 0x53c   :  { %7186 = vmatprep.subr.bf16.mxu0 %v7943_v34  ;;  %7206 = vmatprep.subr.bf16.mxu1 %v7943_v34 }
 0x53e   :  { %7163 = vmatmul.mubr.bf16.vlgmr.msra.gmra.mxu0 %v4182_v16  ;;  %7183 = vmatmul.mubr.bf16.vlgmr.msra.gmra.mxu1 %v4305_v10 }
 0x53f   :  { %7187 = vmatpush3.bf16.msra.mxu0 %v9171_v42  ;;  %7207 = vmatpush3.bf16.msra.mxu1 %v7754_v32 }
 0x540   :  { %7188 = vmatprep.subr.bf16.mxu0 %v7943_v34  ;;  %7208 = vmatprep.subr.bf16.mxu1 %v7943_v34 }
 0x541   :  { %7202 = vmatprep.mubr.msk.bf16.mxu0 %vm7944_vm8, %v7943_v34  ;;  %7222 = vmatprep.mubr.msk.bf16.mxu1 %vm7944_vm8, %v7943_v34 }
 0x543   :  { %7189 = vmatpush3.bf16.msra.mxu0 %v9175_v50  ;;  %7209 = vmatpush3.bf16.msra.mxu1 %v7755_v61 }
 0x544   :  { %7190 = vmatprep.subr.bf16.mxu0 %v7943_v34  ;;  %7210 = vmatprep.subr.bf16.mxu1 %v7943_v34 }
 0x547   :  { %7191 = vmatpush3.bf16.msra.mxu0 %v9180_v46  ;;  %7211 = vmatpush3.bf16.msra.mxu1 %v7756_v21 }
 0x548   :  { %7192 = vmatprep.subr.bf16.mxu0 %v7943_v34  ;;  %7212 = vmatprep.subr.bf16.mxu1 %v7943_v34 }
 0x54b   :  { %7193 = vmatpush3.bf16.msra.mxu0 %v9185_v20  ;;  %7213 = vmatpush3.bf16.msra.mxu1 %v7757_v11 }
 0x54c   :  { %7194 = vmatprep.subr.bf16.mxu0 %v7943_v34  ;;  %7214 = vmatprep.subr.bf16.mxu1 %v7943_v34 }
 0x54f   :  { %7195 = vmatpush3.bf16.msra.mxu0 %v9190_v38  ;;  %7215 = vmatpush3.bf16.msra.mxu1 %v7758_v2 }
 0x550   :  { %7196 = vmatprep.subr.bf16.mxu0 %v7943_v34  ;;  %7216 = vmatprep.subr.bf16.mxu1 %v7943_v34 }
 0x553   :  { %7197 = vmatpush3.bf16.msra.mxu0 %v9195_v0  ;;  %7217 = vmatpush3.bf16.msra.mxu1 %v7759_v40 }
 0x554   :  { %7198 = vmatprep.subr.bf16.mxu0 %v7943_v34  ;;  %7218 = vmatprep.subr.bf16.mxu1 %v7943_v34 }
 0x557   :  { %7199 = vmatpush3.bf16.msra.mxu0 %v9200_v5  ;;  %7219 = vmatpush3.bf16.msra.mxu1 %v7760_v26 }
 0x558   :  { %7200 = vmatprep.subr.bf16.mxu0 %v7943_v34  ;;  %7220 = vmatprep.subr.bf16.mxu1 %v7943_v34 }
 0x55b   :  { %7201 = vmatpush3.bf16.msra.mxu0 %v9205_v44  ;;  %7221 = vmatpush3.bf16.msra.mxu1 %v7761_v37 }
 0x55e   :  { %7203 = vmatmul.mubr.bf16.vlgmr.msra.gmra.mxu0 %v4303_v33  ;;  %7223 = vmatmul.mubr.bf16.vlgmr.msra.gmra.mxu1 %v4387_v30 }
 0x5de   :  { %v4087_v31 = vpop.f32.mrf.mxu0  ;;  %v4175_v27 = vpop.f32.mrf.mxu1 }
 0x5df   :  { %v4176_v41 = vadd.f32 %v4175_v27, %v4087_v31 }
 0x5e0   :  { %v7124_v25 = vpop.f32.mrf.mxu0  ;;  %v7144_v58 = vpop.f32.mrf.mxu1 }
 0x5e2   :  { %v4090_v54 = vpop.f32.mrf.mxu0  ;;  %v4178_v47 = vpop.f32.mrf.mxu1 }
 0x5e4   :  { %v7125_v4 = vpop.f32.mrf.mxu0  ;;  %v7145_v48 = vpop.f32.mrf.mxu1 }
 0x5fe   :  { %v4282_v43 = vpop.f32.mrf.mxu0  ;;  %v4340_v3 = vpop.f32.mrf.mxu1 }
 0x5ff   :  { %v4288_v57 = vadd.f32 %v4282_v43, %v4176_v41 }
 0x600   :  { %v7164_v39 = vpop.f32.mrf.mxu0  ;;  %v7184_v6 = vpop.f32.mrf.mxu1 }
 0x601   :  { %v4293_v8 = vadd.f32 %v6128_v19, %v4288_v57 }
 0x602   :  { %v4285_v1 = vpop.f32.mrf.mxu0  ;;  %v4343_v59 = vpop.f32.mrf.mxu1 }
 0x603   :  { %v4294_v24 = vsel %vm3658_vm9, %v4293_v8, 0.0 }
 0x604   :  { %v7165_v28 = vpop.f32.mrf.mxu0  ;;  %v7185_v12 = vpop.f32.mrf.mxu1  ;;  %v4295_v55 = vrot.slane %v4294_v24, 4 }
 0x606   :  { %v4296_v22 = vadd.f32 %v4295_v55, %v4294_v24 }
 0x608   :  { %v4297_v56 = vrot.slane %v4296_v22, 2 }
 0x60a   :  { %v4298_v0 = vadd.f32 %v4297_v56, %v4296_v22 }
 0x60c   :  { %v4299_v23 = vrot.slane %v4298_v0, 1 }
 0x60e   :  { %v4300_v62 = vadd.f32 %v4299_v23, %v4298_v0 }
 0x61e   :  { %v4380_v45 = vpop.f32.mrf.mxu0  ;;  %v4422_v17 = vpop.f32.mrf.mxu1 }
 0x61f   :  { %v4381_v51 = vadd.f32 %v4380_v45, %v4340_v3 }
 0x620   :  { %v7204_v15 = vpop.f32.mrf.mxu0  ;;  %v7224_v60 = vpop.f32.mrf.mxu1 }
 0x621   :  { %v4428_v42 = vadd.f32 %v4422_v17, %v4381_v51 }
 0x622   :  { %v4383_v50 = vpop.f32.mrf.mxu0  ;;  %v4425_v46 = vpop.f32.mrf.mxu1 }
 0x623   :  { %v4429_v13 = vadd.f32 %v6128_v19, %v4428_v42 }
 0x624   :  { %v7205_v20 = vpop.f32.mrf.mxu0  ;;  %v7225_v38 = vpop.f32.mrf.mxu1 }
 0x625   :  { %v4430_v36 = vsel %vm3658_vm9, %v4429_v13, 0.0 }
 0x626   :  { %v4431_v53 = vrot.slane %v4430_v36, 4 }
 0x628   :  { %v4432_v14 = vadd.f32 %v4431_v53, %v4430_v36 }
 0x62a   :  { %v4433_v5 = vrot.slane %v4432_v14, 2 }
 0x62c   :  { %v4434_v63 = vadd.f32 %v4433_v5, %v4432_v14 }
 0x62e   :  { %v4435_v44 = vrot.slane %v4434_v63, 1 }
 0x630   :  { %v4436_v9 = vadd.f32 %v4435_v44, %v4434_v63 }
 0x632   :  { %v4437_v35 = vadd.f32 %v4436_v9, %v4300_v62 }
 0x634   :  { %v4438_v32 = vmul.f32 0.083333336, %v4437_v35 }
 0x636   :  { %v4439_v61 = vsub.f32 %v4293_v8, %v4438_v32  ;;  %v4440_v21 = vsub.f32 %v4429_v13, %v4438_v32 }
 0x638   :  { %v4441_v11 = vmul.f32 %v4439_v61, %v4439_v61  ;;  %v4450_v2 = vmul.f32 %v4440_v21, %v4440_v21 }
 0x63a   :  { %v4442_v40 = vsel %vm3658_vm9, %v4441_v11, 0.0  ;;  %v4451_v26 = vsel %vm3658_vm9, %v4450_v2, 0.0 }
 0x63b   :  { %v4443_v37 = vrot.slane %v4442_v40, 4  ;;  %v4452_v52 = vrot.slane %v4451_v26, 4 }
 0x63d   :  { %v4444_v49 = vadd.f32 %v4443_v37, %v4442_v40  ;;  %v4453_v16 = vadd.f32 %v4452_v52, %v4451_v26 }
 0x63f   :  { %v4445_v10 = vrot.slane %v4444_v49, 2  ;;  %v4454_v7 = vrot.slane %v4453_v16, 2 }
 0x641   :  { %v4446_v29 = vadd.f32 %v4445_v10, %v4444_v49  ;;  %v4455_v33 = vadd.f32 %v4454_v7, %v4453_v16 }
 0x643   :  { %v4447_v30 = vrot.slane %v4446_v29, 1  ;;  %v4456_v31 = vrot.slane %v4455_v33, 1 }
 0x645   :  { %v4448_v27 = vadd.f32 %v4447_v30, %v4446_v29  ;;  %v4457_v25 = vadd.f32 %v4456_v31, %v4455_v33 }
 0x647   :  { %v4458_v58 = vadd.f32 %v4457_v25, %v4448_v27 }
 0x649   :  { %v4459_v54 = vmul.f32 0.083333336, %v4458_v58 }
 0x64b   :  { %v4460_v47 = vadd.f32 1e-05, %v4459_v54 }
 0x64d   :  { %7762 = vrsqrt.f32 %v4460_v47 }
 0x65a   :  { %v7763_v4 = vpop.eup %7762 }
 0x65b   :  { %v4462_v48 = vmul.f32 %v7763_v4, %v4439_v61  ;;  %v4491_v43 = vmul.f32 %v7763_v4, %v4440_v21 }
 0x65d   :  { %v4464_v3 = vmul.f32 0.70710677, %v4462_v48  ;;  %v4493_v39 = vmul.f32 0.70710677, %v4491_v43  ;;  %v4463_v37 = vmul.f32 0.5, %v4462_v48  ;;  %v4492_v49 = vmul.f32 0.5, %v4491_v43 }
 0x65f   :  { %v4467_v6 = vand.u32 2147483647, %v4464_v3  ;;  %v4496_v1 = vand.u32 2147483647, %v4493_v39  ;;  %vm4465_vm14 = vcmp.ge.f32.partialorder %v4464_v3, 0.0  ;;  %vm4494_vm15 = vcmp.ge.f32.partialorder %v4493_v39, 0.0 }
 0x660   :  { %v4466_v21 = vsel %vm4465_vm14, 1.0, %v7942_v18  ;;  %v4495_v40 = vsel %vm4494_vm15, 1.0, %v7942_v18 }
 0x661   :  { %v4468_v59 = vmul.f32 0.3275911, %v4467_v6  ;;  %v4497_v28 = vmul.f32 0.3275911, %v4496_v1  ;;  %v4481_v57 = vsub.f32 0.0, %v4467_v6  ;;  %v4510_v19 = vsub.f32 0.0, %v4496_v1 }
 0x663   :  { %v4469_v12 = vadd.f32 1.0, %v4468_v59  ;;  %v4498_v41 = vadd.f32 1.0, %v4497_v28  ;;  %v4482_v8 = vmul.f32 %v4481_v57, %v4467_v6  ;;  %v4511_v24 = vmul.f32 %v4510_v19, %v4496_v1 }
 0x665   :  { %7764 = vrcp.f32 %v4469_v12  ;;  %v4483_v17 = vmul.f32 1.442695, %v4482_v8  ;;  %v4512_v15 = vmul.f32 1.442695, %v4511_v24 }
 0x666   :  { %7766 = vrcp.f32 %v4498_v41 }
 0x667   :  { %7768 = vpow2.f32 %v4483_v17 }
 0x668   :  { %7770 = vpow2.f32 %v4512_v15 }
 0x672   :  { %v7765_v55 = vpop.eup %7764 }
 0x673   :  { %v7767_v45 = vpop.eup %7766  ;;  %v4472_v51 = vmul.f32 1.0614054, %v7765_v55 }
 0x674   :  { %v4501_v22 = vmul.f32 1.0614054, %v7767_v45  ;;  %v7769_v44 = vpop.eup %7768 }
 0x675   :  { %v4473_v42 = vadd.f32 -1.4531521, %v4472_v51  ;;  %v7771_v9 = vpop.eup %7770 }
 0x676   :  { %v4502_v60 = vadd.f32 -1.4531521, %v4501_v22 }
 0x677   :  { %v4474_v50 = vmul.f32 %v7765_v55, %v4473_v42 }
 0x678   :  { %v4503_v13 = vmul.f32 %v7767_v45, %v4502_v60 }
 0x679   :  { %v4475_v46 = vadd.f32 1.4214138, %v4474_v50 }
 0x67a   :  { %v4504_v56 = vadd.f32 1.4214138, %v4503_v13 }
 0x67b   :  { %v4476_v20 = vmul.f32 %v7765_v55, %v4475_v46 }
 0x67c   :  { %v4505_v36 = vmul.f32 %v7767_v45, %v4504_v56 }
 0x67d   :  { %v4477_v38 = vadd.f32 -0.28449672, %v4476_v20 }
 0x67e   :  { %v4506_v53 = vadd.f32 -0.28449672, %v4505_v36 }
 0x67f   :  { %v4478_v0 = vmul.f32 %v7765_v55, %v4477_v38 }
 0x680   :  { %v4507_v14 = vmul.f32 %v7767_v45, %v4506_v53 }
 0x681   :  { %v4479_v5 = vadd.f32 0.2548296, %v4478_v0 }
 0x682   :  { %v4508_v23 = vadd.f32 0.2548296, %v4507_v14 }
 0x683   :  { %v4480_v63 = vmul.f32 %v7765_v55, %v4479_v5 }
 0x684   :  { %v4509_v62 = vmul.f32 %v7767_v45, %v4508_v23 }
 0x685   :  { %v4485_v35 = vmul.f32 %v7769_v44, %v4480_v63 }
 0x686   :  { %v4514_v32 = vmul.f32 %v7771_v9, %v4509_v62 }
 0x687   :  { %v4486_v61 = vsub.f32 1.0, %v4485_v35 }
 0x688   :  { %v4515_v11 = vsub.f32 1.0, %v4514_v32 }
 0x689   :  { %v4487_v2 = vmul.f32 %v4486_v61, %v4466_v21 }
 0x68a   :  { %v4516_v26 = vmul.f32 %v4515_v11, %v4495_v40 }
 0x68b   :  { %v4488_v52 = vadd.f32 1.0, %v4487_v2 }
 0x68c   :  { %v4517_v16 = vadd.f32 1.0, %v4516_v26 }
 0x68d   :  { %v4489_v10 = vmul.f32 %v4488_v52, %v4463_v37 }
 0x68e   :  { %v4518_v7 = vmul.f32 %v4517_v16, %v4492_v49 }
 0x68f   :  { %4490 = vst [vmem:[#allocation3] sm:$0x3f] %v4489_v10 }
 0x690   :  { %4519 = vst [vmem:[#allocation3 + $0x40] sm:$0x3f] %v4518_v7 }
 0x691   :  { %7937 = dma.done.wait [#allocation9 + $0x4], 6144 }
 0x692   :  { %7938 = vsyncadd [#allocation9 + $0x4], 4294961152  ;;  %7226 = vmatprep.subr.bf16.mxu0 %v7943_v34  ;;  %7246 = vmatprep.subr.bf16.mxu1 %v7943_v34  ;;  %4526 = vst [vmem:[%s9406_s7] sm:$0xff] %v7943_v34  ;;  %v7772_v18 = vld [vmem:[#allocation8 + $0x78] sm:$0xff]   ;;  %v7774_v33 = vld [vmem:[#allocation8 + $0x70] sm:$0xff]  }
 0x693   :  { %7242 = vmatprep.mubr.msk.bf16.mxu0 %vm7944_vm8, %v7943_v34  ;;  %7262 = vmatprep.mubr.msk.bf16.mxu1 %vm7944_vm8, %v7943_v34  ;;  %v7773_v29 = vld [vmem:[#allocation8 + $0x38] sm:$0xff]   ;;  %v7775_v30 = vld [vmem:[#allocation8 + $0x30] sm:$0xff]   ;;  %v7776_v31 = vld [vmem:[#allocation8 + $0x68] sm:$0xff]  }
 0x694   :  { %7227 = vmatpush3.bf16.msra.mxu0 %v7772_v18  ;;  %7247 = vmatpush3.bf16.msra.mxu1 %v7773_v29  ;;  %v7777_v27 = vld [vmem:[#allocation8 + $0x28] sm:$0xff]   ;;  %v7778_v25 = vld [vmem:[#allocation8 + $0x60] sm:$0xff]   ;;  %v7780_v54 = vld [vmem:[#allocation8 + $0x58] sm:$0xff]  }
 0x695   :  { %7228 = vmatprep.subr.bf16.mxu0 %v7943_v34  ;;  %7248 = vmatprep.subr.bf16.mxu1 %v7943_v34  ;;  %v7779_v58 = vld [vmem:[#allocation8 + $0x20] sm:$0xff]   ;;  %v7781_v47 = vld [vmem:[#allocation8 + $0x18] sm:$0xff]   ;;  %v7782_v4 = vld [vmem:[#allocation8 + $0x50] sm:$0xff]  }
 0x696   :  { %v7783_v48 = vld [vmem:[#allocation8 + $0x10] sm:$0xff]   ;;  %v7784_v43 = vld [vmem:[#allocation8 + $0x48] sm:$0xff]   ;;  %v7786_v39 = vld [vmem:[#allocation8 + $0x40] sm:$0xff]  }
 0x697   :  { %v7785_v3 = vld [vmem:[#allocation8 + $0x8] sm:$0xff]   ;;  %v7787_v6 = vld [vmem:[#allocation8] sm:$0xff]   ;;  %v7788_v41 = vld [vmem:[#allocation8 + $0xb8] sm:$0xff]  }
 0x698   :  { %7229 = vmatpush3.bf16.msra.mxu0 %v7774_v33  ;;  %7249 = vmatpush3.bf16.msra.mxu1 %v7775_v30  ;;  %v4545_v1 = vld [vmem:[#allocation3 + $0x1] sm:$0x1]  ;;  %v4527_v59 = vld [vmem:[#allocation3] sm:$0x1]  ;;  %v7789_v57 = vld [vmem:[#allocation8 + $0xf8] sm:$0xff]  }
 0x699   :  { %7230 = vmatprep.subr.bf16.mxu0 %v7943_v34  ;;  %7250 = vmatprep.subr.bf16.mxu1 %v7943_v34  ;;  %v4546_v28 = vpack.c.bf16 %v4545_v1, %v4545_v1  ;;  %v4528_v12 = vpack.c.bf16 %v4527_v59, %v4527_v59  ;;  %v7790_v19 = vld [vmem:[#allocation8 + $0xb0] sm:$0xff]   ;;  %v7792_v24 = vld [vmem:[#allocation8 + $0xa8] sm:$0xff]   ;;  %v7794_v45 = vld [vmem:[#allocation8 + $0xa0] sm:$0xff]  }
 0x69a   :  { %v7791_v8 = vld [vmem:[#allocation8 + $0xf0] sm:$0xff]   ;;  %v7793_v55 = vld [vmem:[#allocation8 + $0xe8] sm:$0xff]   ;;  %v7795_v51 = vld [vmem:[#allocation8 + $0xe0] sm:$0xff]  }
 0x69b   :  { %v7796_v17 = vld [vmem:[#allocation8 + $0x98] sm:$0xff]   ;;  %v7798_v15 = vld [vmem:[#allocation8 + $0x90] sm:$0xff]   ;;  %v7800_v60 = vld [vmem:[#allocation8 + $0x88] sm:$0xff]  }
 0x69c   :  { %7231 = vmatpush3.bf16.msra.mxu0 %v7776_v31  ;;  %7251 = vmatpush3.bf16.msra.mxu1 %v7777_v27  ;;  %v7797_v22 = vld [vmem:[#allocation8 + $0xd8] sm:$0xff]   ;;  %v7799_v42 = vld [vmem:[#allocation8 + $0xd0] sm:$0xff]   ;;  %v7801_v50 = vld [vmem:[#allocation8 + $0xc8] sm:$0xff]  }
 0x69d   :  { %7232 = vmatprep.subr.bf16.mxu0 %v7943_v34  ;;  %7252 = vmatprep.subr.bf16.mxu1 %v7943_v34  ;;  %v7802_v13 = vld [vmem:[#allocation8 + $0x80] sm:$0xff]   ;;  %v7804_v53 = vld [vmem:[#allocation8 + $0x138] sm:$0xff]   ;;  %v7806_v14 = vld [vmem:[#allocation8 + $0x130] sm:$0xff]  }
 0x69e   :  { %v7803_v46 = vld [vmem:[#allocation8 + $0xc0] sm:$0xff]   ;;  %v7805_v0 = vld [vmem:[#allocation8 + $0x178] sm:$0xff]   ;;  %v7807_v5 = vld [vmem:[#allocation8 + $0x170] sm:$0xff]  }
 0x69f   :  { %v4740_v56 = vld [vmem:[#allocation3 + $0x2] sm:$0x1]  ;;  %v4848_v20 = vld [vmem:[#allocation3 + $0x3] sm:$0x1]  ;;  %v7808_v23 = vld [vmem:[#allocation8 + $0x128] sm:$0xff]  }
 0x6a0   :  { %7233 = vmatpush3.bf16.msra.mxu0 %v7778_v25  ;;  %7253 = vmatpush3.bf16.msra.mxu1 %v7779_v58  ;;  %v4741_v36 = vpack.c.bf16 %v4740_v56, %v4740_v56  ;;  %v4849_v38 = vpack.c.bf16 %v4848_v20, %v4848_v20  ;;  %v7809_v63 = vld [vmem:[#allocation8 + $0x168] sm:$0xff]   ;;  %v7810_v44 = vld [vmem:[#allocation8 + $0x120] sm:$0xff]   ;;  %v7812_v9 = vld [vmem:[#allocation8 + $0x118] sm:$0xff]  }
 0x6a1   :  { %7234 = vmatprep.subr.bf16.mxu0 %v7943_v34  ;;  %7254 = vmatprep.subr.bf16.mxu1 %v7943_v34  ;;  %v7811_v62 = vld [vmem:[#allocation8 + $0x160] sm:$0xff]   ;;  %v7813_v35 = vld [vmem:[#allocation8 + $0x158] sm:$0xff]   ;;  %v7814_v32 = vld [vmem:[#allocation8 + $0x110] sm:$0xff]  }
 0x6a2   :  { %v7815_v61 = vld [vmem:[#allocation8 + $0x150] sm:$0xff]   ;;  %v7816_v21 = vld [vmem:[#allocation8 + $0x108] sm:$0xff]   ;;  %v7818_v2 = vld [vmem:[#allocation8 + $0x100] sm:$0xff]  }
 0x6a3   :  { %v7817_v11 = vld [vmem:[#allocation8 + $0x148] sm:$0xff]   ;;  %v7819_v40 = vld [vmem:[#allocation8 + $0x140] sm:$0xff]   ;;  %v7820_v16 = vld [vmem:[#allocation8 + $0x78] sm:$0xff]  }
 0x6a4   :  { %7235 = vmatpush3.bf16.msra.mxu0 %v7780_v54  ;;  %7255 = vmatpush3.bf16.msra.mxu1 %v7781_v47  ;;  %v4956_v26 = vld [vmem:[#allocation3 + $0x4] sm:$0x1]  ;;  %v5064_v37 = vld [vmem:[#allocation3 + $0x5] sm:$0x1]  ;;  %v7821_v10 = vld [vmem:[#allocation8 + $0x38] sm:$0xff]  }
 0x6a5   :  { %7236 = vmatprep.subr.bf16.mxu0 %v7943_v34  ;;  %7256 = vmatprep.subr.bf16.mxu1 %v7943_v34  ;;  %v4957_v52 = vpack.c.bf16 %v4956_v26, %v4956_v26  ;;  %v5065_v49 = vpack.c.bf16 %v5064_v37, %v5064_v37  ;;  %v7822_v7 = vld [vmem:[#allocation8 + $0x70] sm:$0xff]   ;;  %v7824_v29 = vld [vmem:[#allocation8 + $0x68] sm:$0xff]   ;;  %v7826_v30 = vld [vmem:[#allocation8 + $0x60] sm:$0xff]  }
 0x6a6   :  { %v7823_v18 = vld [vmem:[#allocation8 + $0x30] sm:$0xff]   ;;  %v7825_v33 = vld [vmem:[#allocation8 + $0x28] sm:$0xff]   ;;  %v7827_v31 = vld [vmem:[#allocation8 + $0x20] sm:$0xff]  }
 0x6a7   :  { %v7828_v27 = vld [vmem:[#allocation8 + $0x58] sm:$0xff]   ;;  %v7830_v58 = vld [vmem:[#allocation8 + $0x50] sm:$0xff]   ;;  %v7832_v47 = vld [vmem:[#allocation8 + $0x48] sm:$0xff]  }
 0x6a8   :  { %7237 = vmatpush3.bf16.msra.mxu0 %v7782_v4  ;;  %7257 = vmatpush3.bf16.msra.mxu1 %v7783_v48  ;;  %v7829_v25 = vld [vmem:[#allocation8 + $0x18] sm:$0xff]   ;;  %v7831_v54 = vld [vmem:[#allocation8 + $0x10] sm:$0xff]   ;;  %v7833_v4 = vld [vmem:[#allocation8 + $0x8] sm:$0xff]  }
 0x6a9   :  { %7238 = vmatprep.subr.bf16.mxu0 %v7943_v34  ;;  %7258 = vmatprep.subr.bf16.mxu1 %v7943_v34  ;;  %v7834_v48 = vld [vmem:[#allocation8 + $0x40] sm:$0xff]   ;;  %v7836_v59 = vld [vmem:[#allocation8 + $0xb8] sm:$0xff]  }
 0x6aa   :  { %v7852_v20 = vld [vmem:[#allocation8 + $0x138] sm:$0xff]  }
 0x6ac   :  { %7239 = vmatpush3.bf16.msra.mxu0 %v7784_v43  ;;  %7259 = vmatpush3.bf16.msra.mxu1 %v7785_v3  ;;  %v5192_v43 = vld [vmem:[#allocation3 + $0x41] sm:$0x1] }
 0x6ad   :  { %7240 = vmatprep.subr.bf16.mxu0 %v7943_v34  ;;  %7260 = vmatprep.subr.bf16.mxu1 %v7943_v34  ;;  %v7835_v3 = vld [vmem:[#allocation8] sm:$0xff]  }
 0x6b0   :  { %7241 = vmatpush3.bf16.msra.mxu0 %v7786_v39  ;;  %7261 = vmatpush3.bf16.msra.mxu1 %v7787_v6  ;;  %v5174_v39 = vld [vmem:[#allocation3 + $0x40] sm:$0x1]  ;;  %v5193_v6 = vpack.c.bf16 %v5192_v43, %v5192_v43 }
 0x6b1   :  { %7266 = vmatprep.subr.bf16.mxu0 %v7943_v34  ;;  %7286 = vmatprep.subr.bf16.mxu1 %v7943_v34  ;;  %v5175_v1 = vpack.c.bf16 %v5174_v39, %v5174_v39 }
 0x6b3   :  { %7243 = vmatmul.mubr.bf16.vlgmr.msra.gmra.mxu0 %v4546_v28  ;;  %7263 = vmatmul.mubr.bf16.vlgmr.msra.gmra.mxu1 %v4528_v12  ;;  %v7837_v28 = vld [vmem:[#allocation8 + $0xf8] sm:$0xff]   ;;  %v7838_v12 = vld [vmem:[#allocation8 + $0xb0] sm:$0xff]  }
 0x6b4   :  { %7267 = vmatpush3.bf16.msra.mxu0 %v7788_v41  ;;  %7287 = vmatpush3.bf16.msra.mxu1 %v7789_v57  ;;  %v7839_v41 = vld [vmem:[#allocation8 + $0xf0] sm:$0xff]   ;;  %v7840_v57 = vld [vmem:[#allocation8 + $0xa8] sm:$0xff]  }
 0x6b5   :  { %7268 = vmatprep.subr.bf16.mxu0 %v7943_v34  ;;  %7288 = vmatprep.subr.bf16.mxu1 %v7943_v34 }
 0x6b6   :  { %7282 = vmatprep.mubr.msk.bf16.mxu0 %vm7944_vm8, %v7943_v34  ;;  %7302 = vmatprep.mubr.msk.bf16.mxu1 %vm7944_vm8, %v7943_v34 }
 0x6b8   :  { %7269 = vmatpush3.bf16.msra.mxu0 %v7790_v19  ;;  %7289 = vmatpush3.bf16.msra.mxu1 %v7791_v8  ;;  %v7841_v19 = vld [vmem:[#allocation8 + $0xe8] sm:$0xff]   ;;  %v7842_v8 = vld [vmem:[#allocation8 + $0xa0] sm:$0xff]  }
 0x6b9   :  { %7270 = vmatprep.subr.bf16.mxu0 %v7943_v34  ;;  %7290 = vmatprep.subr.bf16.mxu1 %v7943_v34 }
 0x6bc   :  { %7271 = vmatpush3.bf16.msra.mxu0 %v7792_v24  ;;  %7291 = vmatpush3.bf16.msra.mxu1 %v7793_v55  ;;  %v7843_v24 = vld [vmem:[#allocation8 + $0xe0] sm:$0xff]   ;;  %v7844_v55 = vld [vmem:[#allocation8 + $0x98] sm:$0xff]  }
 0x6bd   :  { %7272 = vmatprep.subr.bf16.mxu0 %v7943_v34  ;;  %7292 = vmatprep.subr.bf16.mxu1 %v7943_v34 }
 0x6c0   :  { %7273 = vmatpush3.bf16.msra.mxu0 %v7794_v45  ;;  %7293 = vmatpush3.bf16.msra.mxu1 %v7795_v51  ;;  %v7845_v45 = vld [vmem:[#allocation8 + $0xd8] sm:$0xff]   ;;  %v7846_v51 = vld [vmem:[#allocation8 + $0x90] sm:$0xff]  }
 0x6c1   :  { %7274 = vmatprep.subr.bf16.mxu0 %v7943_v34  ;;  %7294 = vmatprep.subr.bf16.mxu1 %v7943_v34 }
 0x6c4   :  { %7275 = vmatpush3.bf16.msra.mxu0 %v7796_v17  ;;  %7295 = vmatpush3.bf16.msra.mxu1 %v7797_v22  ;;  %v7847_v17 = vld [vmem:[#allocation8 + $0xd0] sm:$0xff]   ;;  %v7848_v22 = vld [vmem:[#allocation8 + $0x88] sm:$0xff]  }
 0x6c5   :  { %7276 = vmatprep.subr.bf16.mxu0 %v7943_v34  ;;  %7296 = vmatprep.subr.bf16.mxu1 %v7943_v34 }
 0x6c8   :  { %7277 = vmatpush3.bf16.msra.mxu0 %v7798_v15  ;;  %7297 = vmatpush3.bf16.msra.mxu1 %v7799_v42  ;;  %v7849_v15 = vld [vmem:[#allocation8 + $0xc8] sm:$0xff]   ;;  %v7850_v42 = vld [vmem:[#allocation8 + $0x80] sm:$0xff]  }
 0x6c9   :  { %7278 = vmatprep.subr.bf16.mxu0 %v7943_v34  ;;  %7298 = vmatprep.subr.bf16.mxu1 %v7943_v34 }
 0x6cc   :  { %7279 = vmatpush3.bf16.msra.mxu0 %v7800_v60  ;;  %7299 = vmatpush3.bf16.msra.mxu1 %v7801_v50  ;;  %v5386_v60 = vld [vmem:[#allocation3 + $0x42] sm:$0x1] }
 0x6cd   :  { %7280 = vmatprep.subr.bf16.mxu0 %v7943_v34  ;;  %7300 = vmatprep.subr.bf16.mxu1 %v7943_v34  ;;  %v7851_v50 = vld [vmem:[#allocation8 + $0xc0] sm:$0xff]  }
 0x6d0   :  { %7281 = vmatpush3.bf16.msra.mxu0 %v7802_v13  ;;  %7301 = vmatpush3.bf16.msra.mxu1 %v7803_v46  ;;  %v5493_v13 = vld [vmem:[#allocation3 + $0x43] sm:$0x1]  ;;  %v5387_v46 = vpack.c.bf16 %v5386_v60, %v5386_v60 }
 0x6d1   :  { %7306 = vmatprep.subr.bf16.mxu0 %v7943_v34  ;;  %7326 = vmatprep.subr.bf16.mxu1 %v7943_v34  ;;  %v5494_v56 = vpack.c.bf16 %v5493_v13, %v5493_v13 }
 0x6d3   :  { %7283 = vmatmul.mubr.bf16.vlgmr.msra.gmra.mxu0 %v4741_v36  ;;  %7303 = vmatmul.mubr.bf16.vlgmr.msra.gmra.mxu1 %v4849_v38  ;;  %v7853_v36 = vld [vmem:[#allocation8 + $0x178] sm:$0xff]   ;;  %v7854_v38 = vld [vmem:[#allocation8 + $0x130] sm:$0xff]  }
 0x6d4   :  { %7307 = vmatpush3.bf16.msra.mxu0 %v7804_v53  ;;  %7327 = vmatpush3.bf16.msra.mxu1 %v7805_v0  ;;  %v7855_v53 = vld [vmem:[#allocation8 + $0x170] sm:$0xff]   ;;  %v7856_v0 = vld [vmem:[#allocation8 + $0x128] sm:$0xff]  }
 0x6d5   :  { %7308 = vmatprep.subr.bf16.mxu0 %v7943_v34  ;;  %7328 = vmatprep.subr.bf16.mxu1 %v7943_v34 }
 0x6d6   :  { %7322 = vmatprep.mubr.msk.bf16.mxu0 %vm7944_vm8, %v7943_v34  ;;  %7342 = vmatprep.mubr.msk.bf16.mxu1 %vm7944_vm8, %v7943_v34 }
 0x6d8   :  { %7309 = vmatpush3.bf16.msra.mxu0 %v7806_v14  ;;  %7329 = vmatpush3.bf16.msra.mxu1 %v7807_v5  ;;  %v7857_v14 = vld [vmem:[#allocation8 + $0x168] sm:$0xff]   ;;  %v7858_v5 = vld [vmem:[#allocation8 + $0x120] sm:$0xff]  }
 0x6d9   :  { %7310 = vmatprep.subr.bf16.mxu0 %v7943_v34  ;;  %7330 = vmatprep.subr.bf16.mxu1 %v7943_v34 }
 0x6dc   :  { %7311 = vmatpush3.bf16.msra.mxu0 %v7808_v23  ;;  %7331 = vmatpush3.bf16.msra.mxu1 %v7809_v63  ;;  %v7859_v23 = vld [vmem:[#allocation8 + $0x160] sm:$0xff]   ;;  %v7860_v63 = vld [vmem:[#allocation8 + $0x118] sm:$0xff]  }
 0x6dd   :  { %7312 = vmatprep.subr.bf16.mxu0 %v7943_v34  ;;  %7332 = vmatprep.subr.bf16.mxu1 %v7943_v34 }
 0x6e0   :  { %7313 = vmatpush3.bf16.msra.mxu0 %v7810_v44  ;;  %7333 = vmatpush3.bf16.msra.mxu1 %v7811_v62  ;;  %v7861_v44 = vld [vmem:[#allocation8 + $0x158] sm:$0xff]   ;;  %v7862_v62 = vld [vmem:[#allocation8 + $0x110] sm:$0xff]  }
 0x6e1   :  { %7314 = vmatprep.subr.bf16.mxu0 %v7943_v34  ;;  %7334 = vmatprep.subr.bf16.mxu1 %v7943_v34 }
 0x6e4   :  { %7315 = vmatpush3.bf16.msra.mxu0 %v7812_v9  ;;  %7335 = vmatpush3.bf16.msra.mxu1 %v7813_v35  ;;  %v7863_v9 = vld [vmem:[#allocation8 + $0x150] sm:$0xff]   ;;  %v7864_v35 = vld [vmem:[#allocation8 + $0x108] sm:$0xff]  }
 0x6e5   :  { %7316 = vmatprep.subr.bf16.mxu0 %v7943_v34  ;;  %7336 = vmatprep.subr.bf16.mxu1 %v7943_v34 }
 0x6e8   :  { %7317 = vmatpush3.bf16.msra.mxu0 %v7814_v32  ;;  %7337 = vmatpush3.bf16.msra.mxu1 %v7815_v61  ;;  %v7865_v32 = vld [vmem:[#allocation8 + $0x148] sm:$0xff]   ;;  %v7868_v61 = vld [vmem:[%s9406_s7] sm:$0xff] }
 0x6e9   :  { %7318 = vmatprep.subr.bf16.mxu0 %v7943_v34  ;;  %7338 = vmatprep.subr.bf16.mxu1 %v7943_v34 }
 0x6ec   :  { %7319 = vmatpush3.bf16.msra.mxu0 %v7816_v21  ;;  %7339 = vmatpush3.bf16.msra.mxu1 %v7817_v11  ;;  %v7866_v21 = vld [vmem:[#allocation8 + $0x100] sm:$0xff]  }
 0x6ed   :  { %7320 = vmatprep.subr.bf16.mxu0 %v7943_v34  ;;  %7340 = vmatprep.subr.bf16.mxu1 %v7943_v34  ;;  %v5600_v11 = vld [vmem:[#allocation3 + $0x44] sm:$0x1] }
 0x6ee   :  { %v5601_v26 = vpack.c.bf16 %v5600_v11, %v5600_v11 }
 0x6f0   :  { %7321 = vmatpush3.bf16.msra.mxu0 %v7818_v2  ;;  %7341 = vmatpush3.bf16.msra.mxu1 %v7819_v40  ;;  %v7867_v2 = vld [vmem:[#allocation8 + $0x140] sm:$0xff]  }
 0x6f1   :  { %7346 = vmatprep.subr.bf16.mxu0 %v7943_v34  ;;  %7366 = vmatprep.subr.bf16.mxu1 %v7943_v34  ;;  %v5707_v40 = vld [vmem:[#allocation3 + $0x45] sm:$0x1] }
 0x6f2   :  { %v5708_v37 = vpack.c.bf16 %v5707_v40, %v5707_v40 }
 0x6f3   :  { %7323 = vmatmul.mubr.bf16.vlgmr.msra.gmra.mxu0 %v4957_v52  ;;  %7343 = vmatmul.mubr.bf16.vlgmr.msra.gmra.mxu1 %v5065_v49 }
 0x6f4   :  { %7347 = vmatpush3.bf16.msra.mxu0 %v7820_v16  ;;  %7367 = vmatpush3.bf16.msra.mxu1 %v7821_v10 }
 0x6f5   :  { %7348 = vmatprep.subr.bf16.mxu0 %v7943_v34  ;;  %7368 = vmatprep.subr.bf16.mxu1 %v7943_v34 }
 0x6f6   :  { %7362 = vmatprep.mubr.msk.bf16.mxu0 %vm7944_vm8, %v7943_v34  ;;  %7382 = vmatprep.mubr.msk.bf16.mxu1 %vm7944_vm8, %v7943_v34 }
 0x6f8   :  { %7349 = vmatpush3.bf16.msra.mxu0 %v7822_v7  ;;  %7369 = vmatpush3.bf16.msra.mxu1 %v7823_v18 }
 0x6f9   :  { %7350 = vmatprep.subr.bf16.mxu0 %v7943_v34  ;;  %7370 = vmatprep.subr.bf16.mxu1 %v7943_v34 }
 0x6fc   :  { %7351 = vmatpush3.bf16.msra.mxu0 %v7824_v29  ;;  %7371 = vmatpush3.bf16.msra.mxu1 %v7825_v33 }
 0x6fd   :  { %7352 = vmatprep.subr.bf16.mxu0 %v7943_v34  ;;  %7372 = vmatprep.subr.bf16.mxu1 %v7943_v34 }
 0x700   :  { %7353 = vmatpush3.bf16.msra.mxu0 %v7826_v30  ;;  %7373 = vmatpush3.bf16.msra.mxu1 %v7827_v31 }
 0x701   :  { %7354 = vmatprep.subr.bf16.mxu0 %v7943_v34  ;;  %7374 = vmatprep.subr.bf16.mxu1 %v7943_v34 }
 0x704   :  { %7355 = vmatpush3.bf16.msra.mxu0 %v7828_v27  ;;  %7375 = vmatpush3.bf16.msra.mxu1 %v7829_v25 }
 0x705   :  { %7356 = vmatprep.subr.bf16.mxu0 %v7943_v34  ;;  %7376 = vmatprep.subr.bf16.mxu1 %v7943_v34 }
 0x708   :  { %7357 = vmatpush3.bf16.msra.mxu0 %v7830_v58  ;;  %7377 = vmatpush3.bf16.msra.mxu1 %v7831_v54 }
 0x709   :  { %7358 = vmatprep.subr.bf16.mxu0 %v7943_v34  ;;  %7378 = vmatprep.subr.bf16.mxu1 %v7943_v34 }
 0x70c   :  { %7359 = vmatpush3.bf16.msra.mxu0 %v7832_v47  ;;  %7379 = vmatpush3.bf16.msra.mxu1 %v7833_v4 }
 0x70d   :  { %7360 = vmatprep.subr.bf16.mxu0 %v7943_v34  ;;  %7380 = vmatprep.subr.bf16.mxu1 %v7943_v34 }
 0x710   :  { %7361 = vmatpush3.bf16.msra.mxu0 %v7834_v48  ;;  %7381 = vmatpush3.bf16.msra.mxu1 %v7835_v3 }
 0x711   :  { %7386 = vmatprep.subr.bf16.mxu0 %v7943_v34  ;;  %7406 = vmatprep.subr.bf16.mxu1 %v7943_v34 }
 0x713   :  { %7363 = vmatmul.mubr.bf16.vlgmr.msra.gmra.mxu0 %v5193_v6  ;;  %7383 = vmatmul.mubr.bf16.vlgmr.msra.gmra.mxu1 %v5175_v1  ;;  %v4525_v1 = vld [vmem:[%s9400_s1 + $0x4] sm:$0x1] }
 0x714   :  { %7387 = vmatpush3.bf16.msra.mxu0 %v7836_v59  ;;  %7407 = vmatpush3.bf16.msra.mxu1 %v7837_v28 }
 0x715   :  { %7388 = vmatprep.subr.bf16.mxu0 %v7943_v34  ;;  %7408 = vmatprep.subr.bf16.mxu1 %v7943_v34 }
 0x716   :  { %7402 = vmatprep.mubr.msk.bf16.mxu0 %vm7944_vm8, %v7943_v34  ;;  %7422 = vmatprep.mubr.msk.bf16.mxu1 %vm7944_vm8, %v7943_v34 }
 0x718   :  { %7389 = vmatpush3.bf16.msra.mxu0 %v7838_v12  ;;  %7409 = vmatpush3.bf16.msra.mxu1 %v7839_v41 }
 0x719   :  { %7390 = vmatprep.subr.bf16.mxu0 %v7943_v34  ;;  %7410 = vmatprep.subr.bf16.mxu1 %v7943_v34 }
 0x71c   :  { %7391 = vmatpush3.bf16.msra.mxu0 %v7840_v57  ;;  %7411 = vmatpush3.bf16.msra.mxu1 %v7841_v19 }
 0x71d   :  { %7392 = vmatprep.subr.bf16.mxu0 %v7943_v34  ;;  %7412 = vmatprep.subr.bf16.mxu1 %v7943_v34 }
 0x720   :  { %7393 = vmatpush3.bf16.msra.mxu0 %v7842_v8  ;;  %7413 = vmatpush3.bf16.msra.mxu1 %v7843_v24 }
 0x721   :  { %7394 = vmatprep.subr.bf16.mxu0 %v7943_v34  ;;  %7414 = vmatprep.subr.bf16.mxu1 %v7943_v34 }
 0x724   :  { %7395 = vmatpush3.bf16.msra.mxu0 %v7844_v55  ;;  %7415 = vmatpush3.bf16.msra.mxu1 %v7845_v45 }
 0x725   :  { %7396 = vmatprep.subr.bf16.mxu0 %v7943_v34  ;;  %7416 = vmatprep.subr.bf16.mxu1 %v7943_v34 }
 0x728   :  { %7397 = vmatpush3.bf16.msra.mxu0 %v7846_v51  ;;  %7417 = vmatpush3.bf16.msra.mxu1 %v7847_v17 }
 0x729   :  { %7398 = vmatprep.subr.bf16.mxu0 %v7943_v34  ;;  %7418 = vmatprep.subr.bf16.mxu1 %v7943_v34 }
 0x72c   :  { %7399 = vmatpush3.bf16.msra.mxu0 %v7848_v22  ;;  %7419 = vmatpush3.bf16.msra.mxu1 %v7849_v15 }
 0x72d   :  { %7400 = vmatprep.subr.bf16.mxu0 %v7943_v34  ;;  %7420 = vmatprep.subr.bf16.mxu1 %v7943_v34 }
 0x730   :  { %7401 = vmatpush3.bf16.msra.mxu0 %v7850_v42  ;;  %7421 = vmatpush3.bf16.msra.mxu1 %v7851_v50 }
 0x731   :  { %7426 = vmatprep.subr.bf16.mxu0 %v7943_v34  ;;  %7446 = vmatprep.subr.bf16.mxu1 %v7943_v34 }
 0x733   :  { %7403 = vmatmul.mubr.bf16.vlgmr.msra.gmra.mxu0 %v5387_v46  ;;  %7423 = vmatmul.mubr.bf16.vlgmr.msra.gmra.mxu1 %v5494_v56 }
 0x734   :  { %7427 = vmatpush3.bf16.msra.mxu0 %v7852_v20  ;;  %7447 = vmatpush3.bf16.msra.mxu1 %v7853_v36 }
 0x735   :  { %7428 = vmatprep.subr.bf16.mxu0 %v7943_v34  ;;  %7448 = vmatprep.subr.bf16.mxu1 %v7943_v34 }
 0x736   :  { %7442 = vmatprep.mubr.msk.bf16.mxu0 %vm7944_vm8, %v7943_v34  ;;  %7462 = vmatprep.mubr.msk.bf16.mxu1 %vm7944_vm8, %v7943_v34 }
 0x738   :  { %7429 = vmatpush3.bf16.msra.mxu0 %v7854_v38  ;;  %7449 = vmatpush3.bf16.msra.mxu1 %v7855_v53 }
 0x739   :  { %7430 = vmatprep.subr.bf16.mxu0 %v7943_v34  ;;  %7450 = vmatprep.subr.bf16.mxu1 %v7943_v34 }
 0x73c   :  { %7431 = vmatpush3.bf16.msra.mxu0 %v7856_v0  ;;  %7451 = vmatpush3.bf16.msra.mxu1 %v7857_v14 }
 0x73d   :  { %7432 = vmatprep.subr.bf16.mxu0 %v7943_v34  ;;  %7452 = vmatprep.subr.bf16.mxu1 %v7943_v34 }
 0x740   :  { %7433 = vmatpush3.bf16.msra.mxu0 %v7858_v5  ;;  %7453 = vmatpush3.bf16.msra.mxu1 %v7859_v23 }
 0x741   :  { %7434 = vmatprep.subr.bf16.mxu0 %v7943_v34  ;;  %7454 = vmatprep.subr.bf16.mxu1 %v7943_v34 }
 0x744   :  { %7435 = vmatpush3.bf16.msra.mxu0 %v7860_v63  ;;  %7455 = vmatpush3.bf16.msra.mxu1 %v7861_v44 }
 0x745   :  { %7436 = vmatprep.subr.bf16.mxu0 %v7943_v34  ;;  %7456 = vmatprep.subr.bf16.mxu1 %v7943_v34 }
 0x748   :  { %7437 = vmatpush3.bf16.msra.mxu0 %v7862_v62  ;;  %7457 = vmatpush3.bf16.msra.mxu1 %v7863_v9 }
 0x749   :  { %7438 = vmatprep.subr.bf16.mxu0 %v7943_v34  ;;  %7458 = vmatprep.subr.bf16.mxu1 %v7868_v61 }
 0x74c   :  { %7439 = vmatpush3.bf16.msra.mxu0 %v7864_v35  ;;  %7459 = vmatpush3.bf16.msra.mxu1 %v7865_v32 }
 0x74d   :  { %7440 = vmatprep.subr.bf16.mxu0 %v7868_v61  ;;  %7460 = vmatprep.subr.bf16.mxu1 %v7868_v61 }
 0x750   :  { %7441 = vmatpush3.bf16.msra.mxu0 %v7866_v21  ;;  %7461 = vmatpush3.bf16.msra.mxu1 %v7867_v2 }
 0x753   :  { %7443 = vmatmul.mubr.bf16.vlgmr.msra.gmra.mxu0 %v5601_v26  ;;  %7463 = vmatmul.mubr.bf16.vlgmr.msra.gmra.mxu1 %v5708_v37 }
 0x773   :  { %v4646_v34 = vpop.f32.mrf.mxu0  ;;  %v4734_v52 = vpop.f32.mrf.mxu1 }
 0x774   :  { %v4735_v4 = vadd.f32 %v4734_v52, %v4646_v34 }
 0x775   :  { %v7244_v49 = vpop.f32.mrf.mxu0  ;;  %v7264_v16 = vpop.f32.mrf.mxu1 }
 0x777   :  { %v4649_v10 = vpop.f32.mrf.mxu0  ;;  %v4737_v7 = vpop.f32.mrf.mxu1 }
 0x779   :  { %v7245_v18 = vpop.f32.mrf.mxu0  ;;  %v7265_v29 = vpop.f32.mrf.mxu1 }
 0x793   :  { %v4841_v33 = vpop.f32.mrf.mxu0  ;;  %v4949_v30 = vpop.f32.mrf.mxu1 }
 0x794   :  { %v4847_v48 = vadd.f32 %v4841_v33, %v4735_v4 }
 0x795   :  { %v7284_v31 = vpop.f32.mrf.mxu0  ;;  %v7304_v27 = vpop.f32.mrf.mxu1 }
 0x796   :  { %v4955_v43 = vadd.f32 %v4949_v30, %v4847_v48 }
 0x797   :  { %v4844_v25 = vpop.f32.mrf.mxu0  ;;  %v4952_v58 = vpop.f32.mrf.mxu1 }
 0x799   :  { %v7285_v54 = vpop.f32.mrf.mxu0  ;;  %v7305_v47 = vpop.f32.mrf.mxu1 }
 0x7b3   :  { %v5057_v3 = vpop.f32.mrf.mxu0  ;;  %v5165_v6 = vpop.f32.mrf.mxu1 }
 0x7b4   :  { %v5063_v39 = vadd.f32 %v5057_v3, %v4955_v43 }
 0x7b5   :  { %v7324_v59 = vpop.f32.mrf.mxu0  ;;  %v7344_v12 = vpop.f32.mrf.mxu1 }
 0x7b6   :  { %v5171_v28 = vadd.f32 %v5165_v6, %v5063_v39 }
 0x7b7   :  { %v5060_v41 = vpop.f32.mrf.mxu0  ;;  %v5168_v19 = vpop.f32.mrf.mxu1 }
 0x7b8   :  { %v5172_v57 = vadd.f32 %v5171_v28, %v4525_v1 }
 0x7b9   :  { %v7325_v8 = vpop.f32.mrf.mxu0  ;;  %v7345_v24 = vpop.f32.mrf.mxu1 }
 0x7ba   :  { %5173 = vst [vmem:[%s9406_s7] sm:$0x1] %v5172_v57 }
 0x7d3   :  { %v5292_v55 = vpop.f32.mrf.mxu0  ;;  %v5380_v45 = vpop.f32.mrf.mxu1 }
 0x7d4   :  { %v5381_v0 = vadd.f32 %v5380_v45, %v5292_v55 }
 0x7d5   :  { %v7364_v51 = vpop.f32.mrf.mxu0  ;;  %v7384_v17 = vpop.f32.mrf.mxu1 }
 0x7d7   :  { %v5295_v22 = vpop.f32.mrf.mxu0  ;;  %v5383_v15 = vpop.f32.mrf.mxu1 }
 0x7d9   :  { %v7365_v42 = vpop.f32.mrf.mxu0  ;;  %v7385_v60 = vpop.f32.mrf.mxu1 }
 0x7f3   :  { %v5486_v50 = vpop.f32.mrf.mxu0  ;;  %v5593_v13 = vpop.f32.mrf.mxu1 }
 0x7f4   :  { %v5492_v14 = vadd.f32 %v5486_v50, %v5381_v0 }
 0x7f5   :  { %v7404_v46 = vpop.f32.mrf.mxu0  ;;  %v7424_v56 = vpop.f32.mrf.mxu1 }
 0x7f6   :  { %v5599_v5 = vadd.f32 %v5593_v13, %v5492_v14 }
 0x7f7   :  { %v5489_v20 = vpop.f32.mrf.mxu0  ;;  %v5596_v36 = vpop.f32.mrf.mxu1 }
 0x7f9   :  { %v7405_v38 = vpop.f32.mrf.mxu0  ;;  %v7425_v53 = vpop.f32.mrf.mxu1 }
 0x813   :  { %v5700_v23 = vpop.f32.mrf.mxu0  ;;  %v5807_v44 = vpop.f32.mrf.mxu1 }
 0x814   :  { %v5706_v63 = vadd.f32 %v5700_v23, %v5599_v5 }
 0x815   :  { %v7444_v62 = vpop.f32.mrf.mxu0  ;;  %v7464_v35 = vpop.f32.mrf.mxu1 }
 0x816   :  { %v5813_v9 = vadd.f32 %v5807_v44, %v5706_v63 }
 0x817   :  { %v5703_v32 = vpop.f32.mrf.mxu0  ;;  %v5810_v21 = vpop.f32.mrf.mxu1 }
 0x818   :  { %v5814_v61 = vadd.f32 %v5813_v9, %v4525_v1 }
 0x819   :  { %v7445_v11 = vpop.f32.mrf.mxu0  ;;  %v7465_v2 = vpop.f32.mrf.mxu1 }
 0x81a   :  { %5815 = vst [vmem:[%s9406_s7 + $0x1] sm:$0x1] %v5814_v61 }
 0x81b   :  { %5820 = vsyncmov [#allocation9] }
 0x81e   :  { %s5821_s25 = vpop.sfrf %5820 }
 0x81f   :  { %p6225_p1 = scmp.ne.s32.totalorder %s5821_s25, 0 }
 0x821   :  { %5825 = shalt.err (%p6225_p1)  }
 0x822   :  { %5827 = vsyncmov [#allocation9 + $0x1] }
 0x825   :  { %s5828_s4 = vpop.sfrf %5827 }
 0x826   :  { %p6226_p2 = scmp.ne.s32.totalorder %s5828_s4, 0 }
 0x828   :  { %5832 = shalt.err (%p6226_p2)  }
 0x829   :  { %5834 = vsyncmov [#allocation9 + $0x2] }
 0x82c   :  { %s5835_s19 = vpop.sfrf %5834 }
 0x82d   :  { %p6227_p3 = scmp.ne.s32.totalorder %s5835_s19, 0 }
 0x82f   :  { %5839 = shalt.err (%p6227_p3)  }
 0x830   :  { %5841 = vsyncmov [#allocation9 + $0x3] }
 0x833   :  { %s5842_s26 = vpop.sfrf %5841 }
 0x834   :  { %p6228_p4 = scmp.ne.s32.totalorder %s5842_s26, 0 }
 0x836   :  { %5846 = shalt.err (%p6228_p4)  }
 0x837   :  { %5848 = vsyncmov [#allocation9 + $0x4] }
 0x83a   :  { %s5849_s5 = vpop.sfrf %5848 }
 0x83b   :  { %p6229_p5 = scmp.ne.s32.totalorder %s5849_s5, 0 }
 0x83d   :  { %5853 = shalt.err (%p6229_p5)  }

</bundles_post_ra>
